<compile_context>
chip_gen: v7x
topology: tpu7x:2x2x1
jax: 0.10.0
libtpu: 0.0.40
codegen_flags: <defaults>
</compile_context>

<pallas_src>
import functools

import jax
import jax.numpy as jnp
from jax.experimental import pallas as pl
from jax.experimental.pallas import tpu as pltpu


def _round_up(n, m):
    return ((n + m - 1) // m) * m


def _pad_gate_weight(w, in_pad, h, h_pad):
    """[in_dim, 4*h] -> [in_pad, 4*h_pad]; gate block k lands at columns k*h_pad."""
    in_dim = w.shape[0]
    w4 = w.reshape(in_dim, 4, h)
    w4 = jnp.pad(w4, ((0, in_pad - in_dim), (0, 0), (0, h_pad - h)))
    return w4.reshape(in_pad, 4 * h_pad)


# ----------------------------------------------------------------------------
# Fused decoder kernel: L-layer LSTM over all T steps + global attention.
# ----------------------------------------------------------------------------
def _decoder_kernel(x_ref, wih_ref, whh_ref, b_ref, h0_ref, c0_ref,
                    ctx_ref, mask_ref, wa_ref, woc_ref, woh_ref,
                    attn_ref, align_ref, hN_ref, cN_ref,
                    rnn_sc, h_sc, c_sc, gate_sc, *, n_batch):
    T, Bp, F = x_ref.shape
    L = wih_ref.shape[0]

    # Deterministic outputs (padded batch rows are never computed below).
    attn_ref[...] = jnp.zeros_like(attn_ref)
    align_ref[...] = jnp.zeros_like(align_ref)

    # ---------------- multi-layer LSTM (time-major, fully VMEM-resident) --------
    for l in range(L):                                     # static layer loop
        src = x_ref[...] if l == 0 else rnn_sc[...]        # [T, Bp, F]
        # Hoist the input projection of all T steps into one MXU matmul.
        gate_sc[...] = (
            jnp.dot(src.reshape(T * Bp, F), wih_ref[l],
                    preferred_element_type=jnp.float32) + b_ref[l]
        ).reshape(T, Bp, 4 * F)
        h_sc[...] = h0_ref[l]
        c_sc[...] = c0_ref[l]

        for t in range(T):                                 # static time loop
            g = gate_sc[t] + jnp.dot(h_sc[...], whh_ref[l],
                                     preferred_element_type=jnp.float32)
            i_g = jax.nn.sigmoid(g[:, 0 * F:1 * F])        # 128-lane aligned slices
            f_g = jax.nn.sigmoid(g[:, 1 * F:2 * F])
            g_g = jnp.tanh(g[:, 2 * F:3 * F])
            o_g = jax.nn.sigmoid(g[:, 3 * F:4 * F])
            c_new = f_g * c_sc[...] + i_g * g_g
            h_new = o_g * jnp.tanh(c_new)
            c_sc[...] = c_new
            h_sc[...] = h_new
            rnn_sc[t] = h_new

        hN_ref[l] = h_sc[...]                              # final state, written once
        cN_ref[l] = c_sc[...]

    # ---------------- GlobalAttention ("general") -------------------------------
    h_flat = rnn_sc[...].reshape(T * Bp, F)                # rows in (t, b) order
    hw_flat = jnp.dot(h_flat, wa_ref[...], preferred_element_type=jnp.float32)
    ho_flat = jnp.dot(h_flat, woh_ref[...], preferred_element_type=jnp.float32)

    # One-hot selection matrices gather each batch element's T rows from the
    # time-major flat layout with a tiny MXU matmul (no cross-vreg transposes).
    row_i = jax.lax.broadcasted_iota(jnp.int32, (T, T * Bp), 0)
    col_i = jax.lax.broadcasted_iota(jnp.int32, (T, T * Bp), 1)

    for b in range(n_batch):                               # static loop, real batch only
        sel = (col_i == row_i * Bp + b).astype(jnp.float32)               # [T, T*Bp]
        hw_b = jnp.dot(sel, hw_flat, preferred_element_type=jnp.float32)  # [T, F]
        ho_b = jnp.dot(sel, ho_flat, preferred_element_type=jnp.float32)  # [T, F]
        ctx_b = ctx_ref[b]                                                # [Sp, F]
        mask_b = mask_ref[b]                               # [T, Sp]; 1.0 valid, 0.0 pad

        scores = jax.lax.dot_general(                      # h W_a  @  ctx^T -> [T, Sp]
            hw_b, ctx_b, (((1,), (1,)), ((), ())),
            preferred_element_type=jnp.float32)
        scores = jnp.where(mask_b > 0.5, scores, -1e30)    # src padding / length mask
        m = jnp.max(scores, axis=-1, keepdims=True)
        e = jnp.exp(scores - m) * mask_b                   # exact zeros on padding
        denom = jnp.sum(e, axis=-1, keepdims=True)
        align = e / denom                                  # exact normalization

        c_vec = jnp.dot(align, ctx_b, preferred_element_type=jnp.float32)  # [T, F]
        attn_h = jnp.tanh(jnp.dot(c_vec, woc_ref[...],
                                  preferred_element_type=jnp.float32) + ho_b)
        attn_ref[b] = attn_h
        align_ref[b] = align


def _decoder_forward(x_p, wih_p, whh_p, b_p, h0_p, c0_p, ctx_p, mask_p,
                     wa_p, woc_p, woh_p, *, n_batch):
    T, Bp, F = x_p.shape
    L = wih_p.shape[0]
    Sp = ctx_p.shape[1]
    kernel = functools.partial(_decoder_kernel, n_batch=n_batch)
    return pl.pallas_call(
        kernel,
        out_shape=(
            jax.ShapeDtypeStruct((Bp, T, F), jnp.float32),   # attn output (batch-major)
            jax.ShapeDtypeStruct((Bp, T, Sp), jnp.float32),  # attention weights
            jax.ShapeDtypeStruct((L, Bp, F), jnp.float32),   # final h per layer
            jax.ShapeDtypeStruct((L, Bp, F), jnp.float32),   # final c per layer
        ),
        scratch_shapes=[
            pltpu.VMEM((T, Bp, F), jnp.float32),       # current layer's outputs
            pltpu.VMEM((Bp, F), jnp.float32),          # h state
            pltpu.VMEM((Bp, F), jnp.float32),          # c state
            pltpu.VMEM((T, Bp, 4 * F), jnp.float32),   # hoisted input-projection gates
        ],
    )(x_p, wih_p, whh_p, b_p, h0_p, c0_p, ctx_p, mask_p, wa_p, woc_p, woh_p)


# ----------------------------------------------------------------------------
# Decoder state / module (plain-JAX glue, mirrors the PyTorch classes)
# ----------------------------------------------------------------------------
class RNNDecoderState:
    def __init__(self, context, hidden_size, rnnstate):
        self.hidden = rnnstate if isinstance(rnnstate, tuple) else (rnnstate,)
        self.coverage = None
        batch = context.shape[1]
        self.input_feed = jnp.zeros((1, batch, hidden_size), dtype=context.dtype)

    def update_state(self, rnnstate, input_feed, coverage):
        self.hidden = rnnstate if isinstance(rnnstate, tuple) else (rnnstate,)
        self.input_feed = input_feed
        self.coverage = coverage


class RNNDecoderBase:
    """LSTM + 'general' global-attention decoder (eval mode, dropout is identity)."""

    def __init__(self, rnn_type, bidirectional_encoder, num_layers, hidden_size,
                 emb_dim, vocab_size, key, dropout=0.0):
        assert rnn_type == "LSTM"
        self.bidirectional_encoder = bidirectional_encoder
        self.num_layers = num_layers
        self.hidden_size = hidden_size
        self.emb_dim = emb_dim
        self.dropout = dropout  # 0.0 -> identity (eval semantics)

        keys = jax.random.split(key, 3 + 3 * num_layers)
        s = 0.1
        self.emb_table = s * jax.random.normal(keys[0], (vocab_size, emb_dim), jnp.float32)
        self.w_a = s * jax.random.normal(keys[1], (hidden_size, hidden_size), jnp.float32)
        self.w_out = s * jax.random.normal(keys[2], (2 * hidden_size, hidden_size), jnp.float32)
        self.lstm_params = []
        for l in range(num_layers):
            in_dim = emb_dim if l == 0 else hidden_size
            kw = keys[3 + 3 * l: 6 + 3 * l]
            self.lstm_params.append(dict(
                # single bias == (b_ih + b_hh) of the PyTorch LSTM, pre-summed
                w_ih=s * jax.random.normal(kw[0], (in_dim, 4 * hidden_size), jnp.float32),
                w_hh=s * jax.random.normal(kw[1], (hidden_size, 4 * hidden_size), jnp.float32),
                b=s * jax.random.normal(kw[2], (1, 4 * hidden_size), jnp.float32),
            ))

        # ---- padded / stacked parameters for the fused Pallas kernel ----
        # TODO(synk): on v6e/v7x the padded weights could be stored in bfloat16
        # (f32 accumulation); kept f32 so the same script is optimal on v5e too.
        F = _round_up(max(emb_dim, hidden_size), 128)
        self._feat_pad = F
        H = hidden_size
        self._wih_p = jnp.stack(
            [_pad_gate_weight(p["w_ih"], F, H, F) for p in self.lstm_params])
        self._whh_p = jnp.stack(
            [_pad_gate_weight(p["w_hh"], F, H, F) for p in self.lstm_params])
        self._b_p = jnp.stack(
            [_pad_gate_weight(p["b"], 1, H, F) for p in self.lstm_params])
        self._wa_p = jnp.zeros((F, F), jnp.float32).at[:H, :H].set(self.w_a)
        self._woc_p = jnp.zeros((F, F), jnp.float32).at[:H, :H].set(self.w_out[:H])
        self._woh_p = jnp.zeros((F, F), jnp.float32).at[:H, :H].set(self.w_out[H:])

    def _fix_enc_hidden(self, h):
        if self.bidirectional_encoder:
            h = jnp.concatenate([h[0::2], h[1::2]], axis=2)
        return h

    def init_decoder_state(self, src, context, enc_hidden):
        if isinstance(enc_hidden, tuple):
            fixed = tuple(self._fix_enc_hidden(e) for e in enc_hidden)
        else:
            fixed = self._fix_enc_hidden(enc_hidden)
        return RNNDecoderState(context, self.hidden_size, fixed)

    def _run_forward_pass(self, inp, context, state, context_lengths=None):
        T, B = inp.shape[0], inp.shape[1]
        S = context.shape[0]
        H, E, L = self.hidden_size, self.emb_dim, self.num_layers
        F = self._feat_pad
        Bp = _round_up(B, 8)
        Sp = _round_up(S, 128)

        tokens = inp[:, :, 0]                                   # [T, B]
        emb = self.emb_table[tokens]                            # gather in plain JAX glue

        # Padded kernel inputs (pad + layout change fused into one copy each).
        x_p = jnp.zeros((T, Bp, F), jnp.float32).at[:, :B, :E].set(emb)
        h0_all, c0_all = state.hidden                           # each [L, B, H]
        h0_p = jnp.zeros((L, Bp, F), jnp.float32).at[:, :B, :H].set(h0_all)
        c0_p = jnp.zeros((L, Bp, F), jnp.float32).at[:, :B, :H].set(c0_all)
        ctx_p = jnp.zeros((Bp, Sp, F), jnp.float32).at[:B, :S, :H].set(
            jnp.transpose(context, (1, 0, 2)))                  # batch-major context

        # Source-validity mask: 1.0 on valid positions, 0.0 on padding and (when
        # given) positions >= context_lengths[b].  Full [Bp, T, Sp] so the kernel
        # never broadcasts a thin dim.
        pos = jnp.arange(Sp)
        if context_lengths is None:
            valid = jnp.broadcast_to(pos[None, :] < S, (Bp, Sp))
        else:
            lens = jnp.zeros((Bp,), jnp.int32).at[:B].set(
                jnp.asarray(context_lengths, jnp.int32))
            valid = pos[None, :] < jnp.minimum(lens, S)[:, None]
        mask_p = jnp.broadcast_to(
            valid.astype(jnp.float32)[:, None, :], (Bp, T, Sp))

        attn_bm, align_bm, hN_p, cN_p = _decoder_forward(
            x_p, self._wih_p, self._whh_p, self._b_p, h0_p, c0_p,
            ctx_p, mask_p, self._wa_p, self._woc_p, self._woh_p, n_batch=B)

        hidden = (hN_p[:, :B, :H], cN_p[:, :B, :H])
        outputs = jnp.transpose(attn_bm[:B, :, :H], (1, 0, 2))          # [T, B, H]
        attns = {"std": jnp.transpose(align_bm[:B, :, :S], (1, 0, 2))}  # [T, B, S]
        coverage = None
        return hidden, outputs, attns, coverage

    def forward(self, inp, context, state, context_lengths=None):
        assert isinstance(state, RNNDecoderState)
        assert inp.shape[1] == context.shape[1]
        hidden, outputs, attns, coverage = self._run_forward_pass(
            inp, context, state, context_lengths=context_lengths)
        final_output = outputs[-1]
        state.update_state(hidden, final_output[None, :, :],
                           coverage[None] if coverage is not None else None)
        return outputs, state, attns


# ----------------------------------------------------------------------------
# Pure-JAX reference (same math, no Pallas) for the self-check.
# ----------------------------------------------------------------------------
def _reference_forward(decoder, inp, context, h0, c0, context_lengths=None):
    H = decoder.hidden_size
    S = context.shape[0]
    x = decoder.emb_table[inp[:, :, 0]]                       # [T, B, E]
    hs, cs = [], []
    for l, p in enumerate(decoder.lstm_params):
        def step(carry, x_t, w_ih=p["w_ih"], w_hh=p["w_hh"], bias=p["b"]):
            h, c = carry
            g = x_t @ w_ih + h @ w_hh + bias
            i = jax.nn.sigmoid(g[:, 0 * H:1 * H])
            f = jax.nn.sigmoid(g[:, 1 * H:2 * H])
            gg = jnp.tanh(g[:, 2 * H:3 * H])
            o = jax.nn.sigmoid(g[:, 3 * H:4 * H])
            c = f * c + i * gg
            h = o * jnp.tanh(c)
            return (h, c), h
        (hT, cT), x = jax.lax.scan(step, (h0[l], c0[l]), x)
        hs.append(hT)
        cs.append(cT)
    rnn_out = x                                               # [T, B, H]
    ctx_bm = jnp.transpose(context, (1, 0, 2))                # [B, S, H]
    hw = rnn_out @ decoder.w_a
    scores = jnp.einsum('tbh,bsh->tbs', hw, ctx_bm)
    if context_lengths is not None:
        m = jnp.arange(S)[None, None, :] < jnp.asarray(context_lengths)[None, :, None]
        scores = jnp.where(m, scores, -1e30)
    align = jax.nn.softmax(scores, axis=-1)
    c_vec = jnp.einsum('tbs,bsh->tbh', align, ctx_bm)
    attn_h = jnp.tanh(c_vec @ decoder.w_out[:H] + rnn_out @ decoder.w_out[H:])
    return attn_h, align, (jnp.stack(hs), jnp.stack(cs))


# ----------------------------------------------------------------------------
# TODO(synk): the encoder half of NMTModel is not implemented here; the decoder
# consumes precomputed encoder context / hidden states as inputs (same scope as
# the previous version).
if __name__ == "__main__":
    key = jax.random.PRNGKey(0)
    k_model, k_tgt, k_ctx, k_h, k_c = jax.random.split(key, 5)

    T, S, B, H, E, V, L = 8, 10, 2, 32, 16, 20, 2

    decoder = RNNDecoderBase("LSTM", bidirectional_encoder=False, num_layers=L,
                             hidden_size=H, emb_dim=E, vocab_size=V, key=k_model)

    tgt = jax.random.randint(k_tgt, (T, B, 1), 0, V)            # [tgt_len, batch, nfeats]
    context = jax.random.normal(k_ctx, (S, B, H), jnp.float32)  # [src_len, batch, hidden]
    enc_h = jax.random.normal(k_h, (L, B, H), jnp.float32)
    enc_c = jax.random.normal(k_c, (L, B, H), jnp.float32)
    lengths = jnp.array([S, S - 3], dtype=jnp.int32)            # src lengths (pre-padding)

    state = decoder.init_decoder_state(None, context, (enc_h, enc_c))
    outputs, state, attns = decoder.forward(tgt, context, state, context_lengths=lengths)

    jax.block_until_ready((outputs, attns["std"], state.hidden, state.input_feed))
    assert outputs.shape == (T, B, H)
    assert attns["std"].shape == (T, B, S)
    assert state.hidden[0].shape == (L, B, H) and state.hidden[1].shape == (L, B, H)
    assert state.input_feed.shape == (1, B, H)
    assert bool(jnp.all(jnp.isfinite(outputs)))
    # attention rows are an exact softmax over the (length-masked) source positions
    assert bool(jnp.allclose(jnp.sum(attns["std"], axis=-1), 1.0, atol=5e-3))

    # cross-check the fused kernel against a pure-JAX reference
    with jax.default_matmul_precision("highest"):
        out_ref, align_ref_val, (h_ref, c_ref) = _reference_forward(
            decoder, tgt, context, enc_h, enc_c, context_lengths=lengths)
        out_ref, align_ref_val, h_ref, c_ref = jax.block_until_ready(
            (out_ref, align_ref_val, h_ref, c_ref))
    assert float(jnp.max(jnp.abs(outputs - out_ref))) < 5e-2
    assert float(jnp.max(jnp.abs(attns["std"] - align_ref_val))) < 5e-2
    assert float(jnp.max(jnp.abs(state.hidden[0] - h_ref))) < 5e-2
    assert float(jnp.max(jnp.abs(state.hidden[1] - c_ref))) < 5e-2

    print("KERNEL_OK")
</pallas_src>

<mosaic_0001>
module attributes {stable_mosaic.version = 11 : i64} {
  func.func @_decoder_kernel(%arg0: memref<8x8x128xf32, #tpu.memory_space<vmem>>, %arg1: memref<2x128x512xf32, #tpu.memory_space<vmem>>, %arg2: memref<2x128x512xf32, #tpu.memory_space<vmem>>, %arg3: memref<2x1x512xf32, #tpu.memory_space<vmem>>, %arg4: memref<2x8x128xf32, #tpu.memory_space<vmem>>, %arg5: memref<2x8x128xf32, #tpu.memory_space<vmem>>, %arg6: memref<8x128x128xf32, #tpu.memory_space<vmem>>, %arg7: memref<8x8x128xf32, #tpu.memory_space<vmem>>, %arg8: memref<128x128xf32, #tpu.memory_space<vmem>>, %arg9: memref<128x128xf32, #tpu.memory_space<vmem>>, %arg10: memref<128x128xf32, #tpu.memory_space<vmem>>, %arg11: memref<8x8x128xf32, #tpu.memory_space<vmem>>, %arg12: memref<8x8x128xf32, #tpu.memory_space<vmem>>, %arg13: memref<2x8x128xf32, #tpu.memory_space<vmem>>, %arg14: memref<2x8x128xf32, #tpu.memory_space<vmem>>, %arg15: memref<8x8x128xf32, #tpu.memory_space<vmem>>, %arg16: memref<8x128xf32, #tpu.memory_space<vmem>>, %arg17: memref<8x128xf32, #tpu.memory_space<vmem>>, %arg18: memref<8x8x512xf32, #tpu.memory_space<vmem>>) attributes {dimension_semantics = [], scalar_prefetch = 0 : i64, scratch_operands = 4 : i64, tpu.core_type = #tpu.core_type<tc>} {
    %cst = arith.constant 0.000000e+00 : f32
    %0 = vector.broadcast %cst : f32 to vector<8x8x128xf32>
    %c0 = arith.constant 0 : index
    %c0_0 = arith.constant 0 : index
    %c0_1 = arith.constant 0 : index
    %1 = vector.load %arg11[%c0, %c0_0, %c0_1] : memref<8x8x128xf32, #tpu.memory_space<vmem>>, vector<8x8x128xf32>
    tpu.vector_store %arg11[%c0, %c0_0, %c0_1], %0 {strides = array<i32>} : memref<8x8x128xf32, #tpu.memory_space<vmem>>, vector<8x8x128xf32>,
    %cst_2 = arith.constant 0.000000e+00 : f32
    %2 = vector.broadcast %cst_2 : f32 to vector<8x8x128xf32>
    %c0_3 = arith.constant 0 : index
    %c0_4 = arith.constant 0 : index
    %c0_5 = arith.constant 0 : index
    %3 = vector.load %arg12[%c0_3, %c0_4, %c0_5] : memref<8x8x128xf32, #tpu.memory_space<vmem>>, vector<8x8x128xf32>
    tpu.vector_store %arg12[%c0_3, %c0_4, %c0_5], %2 {strides = array<i32>} : memref<8x8x128xf32, #tpu.memory_space<vmem>>, vector<8x8x128xf32>,
    %c0_6 = arith.constant 0 : index
    %c0_7 = arith.constant 0 : index
    %c0_8 = arith.constant 0 : index
    %4 = vector.load %arg0[%c0_6, %c0_7, %c0_8] : memref<8x8x128xf32, #tpu.memory_space<vmem>>, vector<8x8x128xf32>
    %5 = vector.shape_cast %4 : vector<8x8x128xf32> to vector<64x128xf32>
    %c0_9 = arith.constant 0 : index
    %c0_10 = arith.constant 0 : index
    %c0_11 = arith.constant 0 : index
    %6 = vector.load %arg1[%c0_9, %c0_10, %c0_11] : memref<2x128x512xf32, #tpu.memory_space<vmem>>, vector<1x128x512xf32>
    %7 = vector.shape_cast %6 : vector<1x128x512xf32> to vector<128x512xf32>
    %cst_12 = arith.constant dense<0.000000e+00> : vector<64x512xf32>
    %8 = tpu.matmul %5, %7, %cst_12 {dimension_numbers = #tpu.dot_dimension_numbers<[1], [0], [0], [1], [0, 0, 1, 1], [], []>} : vector<64x128xf32>, vector<128x512xf32>, vector<64x512xf32> -> vector<64x512xf32>
    %c0_13 = arith.constant 0 : index
    %c0_14 = arith.constant 0 : index
    %c0_15 = arith.constant 0 : index
    %9 = vector.load %arg3[%c0_13, %c0_14, %c0_15] : memref<2x1x512xf32, #tpu.memory_space<vmem>>, vector<1x1x512xf32>
    %10 = vector.shape_cast %9 : vector<1x1x512xf32> to vector<1x512xf32>
    %11 = vector.broadcast %10 : vector<1x512xf32> to vector<64x512xf32>
    %12 = arith.addf %8, %11 : vector<64x512xf32>
    %13 = vector.shape_cast %12 : vector<64x512xf32> to vector<8x8x512xf32>
    %c0_16 = arith.constant 0 : index
    %c0_17 = arith.constant 0 : index
    %c0_18 = arith.constant 0 : index
    %14 = vector.load %arg18[%c0_16, %c0_17, %c0_18] : memref<8x8x512xf32, #tpu.memory_space<vmem>>, vector<8x8x512xf32>
    tpu.vector_store %arg18[%c0_16, %c0_17, %c0_18], %13 {strides = array<i32>} : memref<8x8x512xf32, #tpu.memory_space<vmem>>, vector<8x8x512xf32>,
    %c0_19 = arith.constant 0 : index
    %c0_20 = arith.constant 0 : index
    %c0_21 = arith.constant 0 : index
    %15 = vector.load %arg4[%c0_19, %c0_20, %c0_21] : memref<2x8x128xf32, #tpu.memory_space<vmem>>, vector<1x8x128xf32>
    %16 = vector.shape_cast %15 : vector<1x8x128xf32> to vector<8x128xf32>
    %c0_22 = arith.constant 0 : index
    %c0_23 = arith.constant 0 : index
    %17 = vector.load %arg16[%c0_22, %c0_23] : memref<8x128xf32, #tpu.memory_space<vmem>>, vector<8x128xf32>
    tpu.vector_store %arg16[%c0_22, %c0_23], %16 {strides = array<i32>} : memref<8x128xf32, #tpu.memory_space<vmem>>, vector<8x128xf32>,
    %c0_24 = arith.constant 0 : index
    %c0_25 = arith.constant 0 : index
    %c0_26 = arith.constant 0 : index
    %18 = vector.load %arg5[%c0_24, %c0_25, %c0_26] : memref<2x8x128xf32, #tpu.memory_space<vmem>>, vector<1x8x128xf32>
    %19 = vector.shape_cast %18 : vector<1x8x128xf32> to vector<8x128xf32>
    %c0_27 = arith.constant 0 : index
    %c0_28 = arith.constant 0 : index
    %20 = vector.load %arg17[%c0_27, %c0_28] : memref<8x128xf32, #tpu.memory_space<vmem>>, vector<8x128xf32>
    tpu.vector_store %arg17[%c0_27, %c0_28], %19 {strides = array<i32>} : memref<8x128xf32, #tpu.memory_space<vmem>>, vector<8x128xf32>,
    %c0_29 = arith.constant 0 : index
    %c0_30 = arith.constant 0 : index
    %c0_31 = arith.constant 0 : index
    %21 = vector.load %arg18[%c0_29, %c0_30, %c0_31] : memref<8x8x512xf32, #tpu.memory_space<vmem>>, vector<1x8x512xf32>
    %22 = vector.shape_cast %21 : vector<1x8x512xf32> to vector<8x512xf32>
    %c0_32 = arith.constant 0 : index
    %c0_33 = arith.constant 0 : index
    %23 = vector.load %arg16[%c0_32, %c0_33] : memref<8x128xf32, #tpu.memory_space<vmem>>, vector<8x128xf32>
    %c0_34 = arith.constant 0 : index
    %c0_35 = arith.constant 0 : index
    %c0_36 = arith.constant 0 : index
    %24 = vector.load %arg2[%c0_34, %c0_35, %c0_36] : memref<2x128x512xf32, #tpu.memory_space<vmem>>, vector<1x128x512xf32>
    %25 = vector.shape_cast %24 : vector<1x128x512xf32> to vector<128x512xf32>
    %cst_37 = arith.constant dense<0.000000e+00> : vector<8x512xf32>
    %26 = tpu.matmul %23, %25, %cst_37 {dimension_numbers = #tpu.dot_dimension_numbers<[1], [0], [0], [1], [0, 0, 1, 1], [], []>} : vector<8x128xf32>, vector<128x512xf32>, vector<8x512xf32> -> vector<8x512xf32>
    %27 = arith.addf %22, %26 : vector<8x512xf32>
    %28 = vector.extract_strided_slice %27 {offsets = [0, 0], sizes = [8, 128], strides = [1, 1]} : vector<8x512xf32> to vector<8x128xf32>
    %29 = arith.negf %28 : vector<8x128xf32>
    %30 = math.exp %29 : vector<8x128xf32>
    %cst_38 = arith.constant 1.000000e+00 : f32
    %31 = vector.broadcast %cst_38 : f32 to vector<8x128xf32>
    %32 = arith.addf %31, %30 : vector<8x128xf32>
    %33 = arith.divf %31, %32 : vector<8x128xf32>
    %34 = vector.extract_strided_slice %27 {offsets = [0, 128], sizes = [8, 128], strides = [1, 1]} : vector<8x512xf32> to vector<8x128xf32>
    %35 = arith.negf %34 : vector<8x128xf32>
    %36 = math.exp %35 : vector<8x128xf32>
    %cst_39 = arith.constant 1.000000e+00 : f32
    %37 = vector.broadcast %cst_39 : f32 to vector<8x128xf32>
    %38 = arith.addf %37, %36 : vector<8x128xf32>
    %39 = arith.divf %37, %38 : vector<8x128xf32>
    %40 = vector.extract_strided_slice %27 {offsets = [0, 256], sizes = [8, 128], strides = [1, 1]} : vector<8x512xf32> to vector<8x128xf32>
    %41 = math.tanh %40 : vector<8x128xf32>
    %42 = vector.extract_strided_slice %27 {offsets = [0, 384], sizes = [8, 128], strides = [1, 1]} : vector<8x512xf32> to vector<8x128xf32>
    %43 = arith.negf %42 : vector<8x128xf32>
    %44 = math.exp %43 : vector<8x128xf32>
    %cst_40 = arith.constant 1.000000e+00 : f32
    %45 = vector.broadcast %cst_40 : f32 to vector<8x128xf32>
    %46 = arith.addf %45, %44 : vector<8x128xf32>
    %47 = arith.divf %45, %46 : vector<8x128xf32>
    %c0_41 = arith.constant 0 : index
    %c0_42 = arith.constant 0 : index
    %48 = vector.load %arg17[%c0_41, %c0_42] : memref<8x128xf32, #tpu.memory_space<vmem>>, vector<8x128xf32>
    %49 = arith.mulf %39, %48 : vector<8x128xf32>
    %50 = arith.mulf %33, %41 : vector<8x128xf32>
    %51 = arith.addf %49, %50 : vector<8x128xf32>
    %52 = math.tanh %51 : vector<8x128xf32>
    %53 = arith.mulf %47, %52 : vector<8x128xf32>
    %c0_43 = arith.constant 0 : index
    %c0_44 = arith.constant 0 : index
    %54 = vector.load %arg17[%c0_43, %c0_44] : memref<8x128xf32, #tpu.memory_space<vmem>>, vector<8x128xf32>
    tpu.vector_store %arg17[%c0_43, %c0_44], %51 {strides = array<i32>} : memref<8x128xf32, #tpu.memory_space<vmem>>, vector<8x128xf32>,
    %c0_45 = arith.constant 0 : index
    %c0_46 = arith.constant 0 : index
    %55 = vector.load %arg16[%c0_45, %c0_46] : memref<8x128xf32, #tpu.memory_space<vmem>>, vector<8x128xf32>
    tpu.vector_store %arg16[%c0_45, %c0_46], %53 {strides = array<i32>} : memref<8x128xf32, #tpu.memory_space<vmem>>, vector<8x128xf32>,
    %c0_47 = arith.constant 0 : index
    %c0_48 = arith.constant 0 : index
    %c0_49 = arith.constant 0 : index
    %56 = vector.load %arg15[%c0_47, %c0_48, %c0_49] : memref<8x8x128xf32, #tpu.memory_space<vmem>>, vector<1x8x128xf32>
    %57 = vector.shape_cast %56 : vector<1x8x128xf32> to vector<8x128xf32>
    %58 = vector.shape_cast %53 : vector<8x128xf32> to vector<1x8x128xf32>
    tpu.vector_store %arg15[%c0_47, %c0_48, %c0_49], %58 {strides = array<i32>} : memref<8x8x128xf32, #tpu.memory_space<vmem>>, vector<1x8x128xf32>,
    %c1 = arith.constant 1 : index
    %c0_50 = arith.constant 0 : index
    %c0_51 = arith.constant 0 : index
    %59 = vector.load %arg18[%c1, %c0_50, %c0_51] : memref<8x8x512xf32, #tpu.memory_space<vmem>>, vector<1x8x512xf32>
    %60 = vector.shape_cast %59 : vector<1x8x512xf32> to vector<8x512xf32>
    %c0_52 = arith.constant 0 : index
    %c0_53 = arith.constant 0 : index
    %61 = vector.load %arg16[%c0_52, %c0_53] : memref<8x128xf32, #tpu.memory_space<vmem>>, vector<8x128xf32>
    %c0_54 = arith.constant 0 : index
    %c0_55 = arith.constant 0 : index
    %c0_56 = arith.constant 0 : index
    %62 = vector.load %arg2[%c0_54, %c0_55, %c0_56] : memref<2x128x512xf32, #tpu.memory_space<vmem>>, vector<1x128x512xf32>
    %63 = vector.shape_cast %62 : vector<1x128x512xf32> to vector<128x512xf32>
    %cst_57 = arith.constant dense<0.000000e+00> : vector<8x512xf32>
    %64 = tpu.matmul %61, %63, %cst_57 {dimension_numbers = #tpu.dot_dimension_numbers<[1], [0], [0], [1], [0, 0, 1, 1], [], []>} : vector<8x128xf32>, vector<128x512xf32>, vector<8x512xf32> -> vector<8x512xf32>
    %65 = arith.addf %60, %64 : vector<8x512xf32>
    %66 = vector.extract_strided_slice %65 {offsets = [0, 0], sizes = [8, 128], strides = [1, 1]} : vector<8x512xf32> to vector<8x128xf32>
    %67 = arith.negf %66 : vector<8x128xf32>
    %68 = math.exp %67 : vector<8x128xf32>
    %cst_58 = arith.constant 1.000000e+00 : f32
    %69 = vector.broadcast %cst_58 : f32 to vector<8x128xf32>
    %70 = arith.addf %69, %68 : vector<8x128xf32>
    %71 = arith.divf %69, %70 : vector<8x128xf32>
    %72 = vector.extract_strided_slice %65 {offsets = [0, 128], sizes = [8, 128], strides = [1, 1]} : vector<8x512xf32> to vector<8x128xf32>
    %73 = arith.negf %72 : vector<8x128xf32>
    %74 = math.exp %73 : vector<8x128xf32>
    %cst_59 = arith.constant 1.000000e+00 : f32
    %75 = vector.broadcast %cst_59 : f32 to vector<8x128xf32>
    %76 = arith.addf %75, %74 : vector<8x128xf32>
    %77 = arith.divf %75, %76 : vector<8x128xf32>
    %78 = vector.extract_strided_slice %65 {offsets = [0, 256], sizes = [8, 128], strides = [1, 1]} : vector<8x512xf32> to vector<8x128xf32>
    %79 = math.tanh %78 : vector<8x128xf32>
    %80 = vector.extract_strided_slice %65 {offsets = [0, 384], sizes = [8, 128], strides = [1, 1]} : vector<8x512xf32> to vector<8x128xf32>
    %81 = arith.negf %80 : vector<8x128xf32>
    %82 = math.exp %81 : vector<8x128xf32>
    %cst_60 = arith.constant 1.000000e+00 : f32
    %83 = vector.broadcast %cst_60 : f32 to vector<8x128xf32>
    %84 = arith.addf %83, %82 : vector<8x128xf32>
    %85 = arith.divf %83, %84 : vector<8x128xf32>
    %c0_61 = arith.constant 0 : index
    %c0_62 = arith.constant 0 : index
    %86 = vector.load %arg17[%c0_61, %c0_62] : memref<8x128xf32, #tpu.memory_space<vmem>>, vector<8x128xf32>
    %87 = arith.mulf %77, %86 : vector<8x128xf32>
    %88 = arith.mulf %71, %79 : vector<8x128xf32>
    %89 = arith.addf %87, %88 : vector<8x128xf32>
    %90 = math.tanh %89 : vector<8x128xf32>
    %91 = arith.mulf %85, %90 : vector<8x128xf32>
    %c0_63 = arith.constant 0 : index
    %c0_64 = arith.constant 0 : index
    %92 = vector.load %arg17[%c0_63, %c0_64] : memref<8x128xf32, #tpu.memory_space<vmem>>, vector<8x128xf32>
    tpu.vector_store %arg17[%c0_63, %c0_64], %89 {strides = array<i32>} : memref<8x128xf32, #tpu.memory_space<vmem>>, vector<8x128xf32>,
    %c0_65 = arith.constant 0 : index
    %c0_66 = arith.constant 0 : index
    %93 = vector.load %arg16[%c0_65, %c0_66] : memref<8x128xf32, #tpu.memory_space<vmem>>, vector<8x128xf32>
    tpu.vector_store %arg16[%c0_65, %c0_66], %91 {strides = array<i32>} : memref<8x128xf32, #tpu.memory_space<vmem>>, vector<8x128xf32>,
    %c1_67 = arith.constant 1 : index
    %c0_68 = arith.constant 0 : index
    %c0_69 = arith.constant 0 : index
    %94 = vector.load %arg15[%c1_67, %c0_68, %c0_69] : memref<8x8x128xf32, #tpu.memory_space<vmem>>, vector<1x8x128xf32>
    %95 = vector.shape_cast %94 : vector<1x8x128xf32> to vector<8x128xf32>
    %96 = vector.shape_cast %91 : vector<8x128xf32> to vector<1x8x128xf32>
    tpu.vector_store %arg15[%c1_67, %c0_68, %c0_69], %96 {strides = array<i32>} : memref<8x8x128xf32, #tpu.memory_space<vmem>>, vector<1x8x128xf32>,
    %c2 = arith.constant 2 : index
    %c0_70 = arith.constant 0 : index
    %c0_71 = arith.constant 0 : index
    %97 = vector.load %arg18[%c2, %c0_70, %c0_71] : memref<8x8x512xf32, #tpu.memory_space<vmem>>, vector<1x8x512xf32>
    %98 = vector.shape_cast %97 : vector<1x8x512xf32> to vector<8x512xf32>
    %c0_72 = arith.constant 0 : index
    %c0_73 = arith.constant 0 : index
    %99 = vector.load %arg16[%c0_72, %c0_73] : memref<8x128xf32, #tpu.memory_space<vmem>>, vector<8x128xf32>
    %c0_74 = arith.constant 0 : index
    %c0_75 = arith.constant 0 : index
    %c0_76 = arith.constant 0 : index
    %100 = vector.load %arg2[%c0_74, %c0_75, %c0_76] : memref<2x128x512xf32, #tpu.memory_space<vmem>>, vector<1x128x512xf32>
    %101 = vector.shape_cast %100 : vector<1x128x512xf32> to vector<128x512xf32>
    %cst_77 = arith.constant dense<0.000000e+00> : vector<8x512xf32>
    %102 = tpu.matmul %99, %101, %cst_77 {dimension_numbers = #tpu.dot_dimension_numbers<[1], [0], [0], [1], [0, 0, 1, 1], [], []>} : vector<8x128xf32>, vector<128x512xf32>, vector<8x512xf32> -> vector<8x512xf32>
    %103 = arith.addf %98, %102 : vector<8x512xf32>
    %104 = vector.extract_strided_slice %103 {offsets = [0, 0], sizes = [8, 128], strides = [1, 1]} : vector<8x512xf32> to vector<8x128xf32>
    %105 = arith.negf %104 : vector<8x128xf32>
    %106 = math.exp %105 : vector<8x128xf32>
    %cst_78 = arith.constant 1.000000e+00 : f32
    %107 = vector.broadcast %cst_78 : f32 to vector<8x128xf32>
    %108 = arith.addf %107, %106 : vector<8x128xf32>
    %109 = arith.divf %107, %108 : vector<8x128xf32>
    %110 = vector.extract_strided_slice %103 {offsets = [0, 128], sizes = [8, 128], strides = [1, 1]} : vector<8x512xf32> to vector<8x128xf32>
    %111 = arith.negf %110 : vector<8x128xf32>
    %112 = math.exp %111 : vector<8x128xf32>
    %cst_79 = arith.constant 1.000000e+00 : f32
    %113 = vector.broadcast %cst_79 : f32 to vector<8x128xf32>
    %114 = arith.addf %113, %112 : vector<8x128xf32>
    %115 = arith.divf %113, %114 : vector<8x128xf32>
    %116 = vector.extract_strided_slice %103 {offsets = [0, 256], sizes = [8, 128], strides = [1, 1]} : vector<8x512xf32> to vector<8x128xf32>
    %117 = math.tanh %116 : vector<8x128xf32>
    %118 = vector.extract_strided_slice %103 {offsets = [0, 384], sizes = [8, 128], strides = [1, 1]} : vector<8x512xf32> to vector<8x128xf32>
    %119 = arith.negf %118 : vector<8x128xf32>
    %120 = math.exp %119 : vector<8x128xf32>
    %cst_80 = arith.constant 1.000000e+00 : f32
    %121 = vector.broadcast %cst_80 : f32 to vector<8x128xf32>
    %122 = arith.addf %121, %120 : vector<8x128xf32>
    %123 = arith.divf %121, %122 : vector<8x128xf32>
    %c0_81 = arith.constant 0 : index
    %c0_82 = arith.constant 0 : index
    %124 = vector.load %arg17[%c0_81, %c0_82] : memref<8x128xf32, #tpu.memory_space<vmem>>, vector<8x128xf32>
    %125 = arith.mulf %115, %124 : vector<8x128xf32>
    %126 = arith.mulf %109, %117 : vector<8x128xf32>
    %127 = arith.addf %125, %126 : vector<8x128xf32>
    %128 = math.tanh %127 : vector<8x128xf32>
    %129 = arith.mulf %123, %128 : vector<8x128xf32>
    %c0_83 = arith.constant 0 : index
    %c0_84 = arith.constant 0 : index
    %130 = vector.load %arg17[%c0_83, %c0_84] : memref<8x128xf32, #tpu.memory_space<vmem>>, vector<8x128xf32>
    tpu.vector_store %arg17[%c0_83, %c0_84], %127 {strides = array<i32>} : memref<8x128xf32, #tpu.memory_space<vmem>>, vector<8x128xf32>,
    %c0_85 = arith.constant 0 : index
    %c0_86 = arith.constant 0 : index
    %131 = vector.load %arg16[%c0_85, %c0_86] : memref<8x128xf32, #tpu.memory_space<vmem>>, vector<8x128xf32>
    tpu.vector_store %arg16[%c0_85, %c0_86], %129 {strides = array<i32>} : memref<8x128xf32, #tpu.memory_space<vmem>>, vector<8x128xf32>,
    %c2_87 = arith.constant 2 : index
    %c0_88 = arith.constant 0 : index
    %c0_89 = arith.constant 0 : index
    %132 = vector.load %arg15[%c2_87, %c0_88, %c0_89] : memref<8x8x128xf32, #tpu.memory_space<vmem>>, vector<1x8x128xf32>
    %133 = vector.shape_cast %132 : vector<1x8x128xf32> to vector<8x128xf32>
    %134 = vector.shape_cast %129 : vector<8x128xf32> to vector<1x8x128xf32>
    tpu.vector_store %arg15[%c2_87, %c0_88, %c0_89], %134 {strides = array<i32>} : memref<8x8x128xf32, #tpu.memory_space<vmem>>, vector<1x8x128xf32>,
    %c3 = arith.constant 3 : index
    %c0_90 = arith.constant 0 : index
    %c0_91 = arith.constant 0 : index
    %135 = vector.load %arg18[%c3, %c0_90, %c0_91] : memref<8x8x512xf32, #tpu.memory_space<vmem>>, vector<1x8x512xf32>
    %136 = vector.shape_cast %135 : vector<1x8x512xf32> to vector<8x512xf32>
    %c0_92 = arith.constant 0 : index
    %c0_93 = arith.constant 0 : index
    %137 = vector.load %arg16[%c0_92, %c0_93] : memref<8x128xf32, #tpu.memory_space<vmem>>, vector<8x128xf32>
    %c0_94 = arith.constant 0 : index
    %c0_95 = arith.constant 0 : index
    %c0_96 = arith.constant 0 : index
    %138 = vector.load %arg2[%c0_94, %c0_95, %c0_96] : memref<2x128x512xf32, #tpu.memory_space<vmem>>, vector<1x128x512xf32>
    %139 = vector.shape_cast %138 : vector<1x128x512xf32> to vector<128x512xf32>
    %cst_97 = arith.constant dense<0.000000e+00> : vector<8x512xf32>
    %140 = tpu.matmul %137, %139, %cst_97 {dimension_numbers = #tpu.dot_dimension_numbers<[1], [0], [0], [1], [0, 0, 1, 1], [], []>} : vector<8x128xf32>, vector<128x512xf32>, vector<8x512xf32> -> vector<8x512xf32>
    %141 = arith.addf %136, %140 : vector<8x512xf32>
    %142 = vector.extract_strided_slice %141 {offsets = [0, 0], sizes = [8, 128], strides = [1, 1]} : vector<8x512xf32> to vector<8x128xf32>
    %143 = arith.negf %142 : vector<8x128xf32>
    %144 = math.exp %143 : vector<8x128xf32>
    %cst_98 = arith.constant 1.000000e+00 : f32
    %145 = vector.broadcast %cst_98 : f32 to vector<8x128xf32>
    %146 = arith.addf %145, %144 : vector<8x128xf32>
    %147 = arith.divf %145, %146 : vector<8x128xf32>
    %148 = vector.extract_strided_slice %141 {offsets = [0, 128], sizes = [8, 128], strides = [1, 1]} : vector<8x512xf32> to vector<8x128xf32>
    %149 = arith.negf %148 : vector<8x128xf32>
    %150 = math.exp %149 : vector<8x128xf32>
    %cst_99 = arith.constant 1.000000e+00 : f32
    %151 = vector.broadcast %cst_99 : f32 to vector<8x128xf32>
    %152 = arith.addf %151, %150 : vector<8x128xf32>
    %153 = arith.divf %151, %152 : vector<8x128xf32>
    %154 = vector.extract_strided_slice %141 {offsets = [0, 256], sizes = [8, 128], strides = [1, 1]} : vector<8x512xf32> to vector<8x128xf32>
    %155 = math.tanh %154 : vector<8x128xf32>
    %156 = vector.extract_strided_slice %141 {offsets = [0, 384], sizes = [8, 128], strides = [1, 1]} : vector<8x512xf32> to vector<8x128xf32>
    %157 = arith.negf %156 : vector<8x128xf32>
    %158 = math.exp %157 : vector<8x128xf32>
    %cst_100 = arith.constant 1.000000e+00 : f32
    %159 = vector.broadcast %cst_100 : f32 to vector<8x128xf32>
    %160 = arith.addf %159, %158 : vector<8x128xf32>
    %161 = arith.divf %159, %160 : vector<8x128xf32>
    %c0_101 = arith.constant 0 : index
    %c0_102 = arith.constant 0 : index
    %162 = vector.load %arg17[%c0_101, %c0_102] : memref<8x128xf32, #tpu.memory_space<vmem>>, vector<8x128xf32>
    %163 = arith.mulf %153, %162 : vector<8x128xf32>
    %164 = arith.mulf %147, %155 : vector<8x128xf32>
    %165 = arith.addf %163, %164 : vector<8x128xf32>
    %166 = math.tanh %165 : vector<8x128xf32>
    %167 = arith.mulf %161, %166 : vector<8x128xf32>
    %c0_103 = arith.constant 0 : index
    %c0_104 = arith.constant 0 : index
    %168 = vector.load %arg17[%c0_103, %c0_104] : memref<8x128xf32, #tpu.memory_space<vmem>>, vector<8x128xf32>
    tpu.vector_store %arg17[%c0_103, %c0_104], %165 {strides = array<i32>} : memref<8x128xf32, #tpu.memory_space<vmem>>, vector<8x128xf32>,
    %c0_105 = arith.constant 0 : index
    %c0_106 = arith.constant 0 : index
    %169 = vector.load %arg16[%c0_105, %c0_106] : memref<8x128xf32, #tpu.memory_space<vmem>>, vector<8x128xf32>
    tpu.vector_store %arg16[%c0_105, %c0_106], %167 {strides = array<i32>} : memref<8x128xf32, #tpu.memory_space<vmem>>, vector<8x128xf32>,
    %c3_107 = arith.constant 3 : index
    %c0_108 = arith.constant 0 : index
    %c0_109 = arith.constant 0 : index
    %170 = vector.load %arg15[%c3_107, %c0_108, %c0_109] : memref<8x8x128xf32, #tpu.memory_space<vmem>>, vector<1x8x128xf32>
    %171 = vector.shape_cast %170 : vector<1x8x128xf32> to vector<8x128xf32>
    %172 = vector.shape_cast %167 : vector<8x128xf32> to vector<1x8x128xf32>
    tpu.vector_store %arg15[%c3_107, %c0_108, %c0_109], %172 {strides = array<i32>} : memref<8x8x128xf32, #tpu.memory_space<vmem>>, vector<1x8x128xf32>,
    %c4 = arith.constant 4 : index
    %c0_110 = arith.constant 0 : index
    %c0_111 = arith.constant 0 : index
    %173 = vector.load %arg18[%c4, %c0_110, %c0_111] : memref<8x8x512xf32, #tpu.memory_space<vmem>>, vector<1x8x512xf32>
    %174 = vector.shape_cast %173 : vector<1x8x512xf32> to vector<8x512xf32>
    %c0_112 = arith.constant 0 : index
    %c0_113 = arith.constant 0 : index
    %175 = vector.load %arg16[%c0_112, %c0_113] : memref<8x128xf32, #tpu.memory_space<vmem>>, vector<8x128xf32>
    %c0_114 = arith.constant 0 : index
    %c0_115 = arith.constant 0 : index
    %c0_116 = arith.constant 0 : index
    %176 = vector.load %arg2[%c0_114, %c0_115, %c0_116] : memref<2x128x512xf32, #tpu.memory_space<vmem>>, vector<1x128x512xf32>
    %177 = vector.shape_cast %176 : vector<1x128x512xf32> to vector<128x512xf32>
    %cst_117 = arith.constant dense<0.000000e+00> : vector<8x512xf32>
    %178 = tpu.matmul %175, %177, %cst_117 {dimension_numbers = #tpu.dot_dimension_numbers<[1], [0], [0], [1], [0, 0, 1, 1], [], []>} : vector<8x128xf32>, vector<128x512xf32>, vector<8x512xf32> -> vector<8x512xf32>
    %179 = arith.addf %174, %178 : vector<8x512xf32>
    %180 = vector.extract_strided_slice %179 {offsets = [0, 0], sizes = [8, 128], strides = [1, 1]} : vector<8x512xf32> to vector<8x128xf32>
    %181 = arith.negf %180 : vector<8x128xf32>
    %182 = math.exp %181 : vector<8x128xf32>
    %cst_118 = arith.constant 1.000000e+00 : f32
    %183 = vector.broadcast %cst_118 : f32 to vector<8x128xf32>
    %184 = arith.addf %183, %182 : vector<8x128xf32>
    %185 = arith.divf %183, %184 : vector<8x128xf32>
    %186 = vector.extract_strided_slice %179 {offsets = [0, 128], sizes = [8, 128], strides = [1, 1]} : vector<8x512xf32> to vector<8x128xf32>
    %187 = arith.negf %186 : vector<8x128xf32>
    %188 = math.exp %187 : vector<8x128xf32>
    %cst_119 = arith.constant 1.000000e+00 : f32
    %189 = vector.broadcast %cst_119 : f32 to vector<8x128xf32>
    %190 = arith.addf %189, %188 : vector<8x128xf32>
    %191 = arith.divf %189, %190 : vector<8x128xf32>
    %192 = vector.extract_strided_slice %179 {offsets = [0, 256], sizes = [8, 128], strides = [1, 1]} : vector<8x512xf32> to vector<8x128xf32>
    %193 = math.tanh %192 : vector<8x128xf32>
    %194 = vector.extract_strided_slice %179 {offsets = [0, 384], sizes = [8, 128], strides = [1, 1]} : vector<8x512xf32> to vector<8x128xf32>
    %195 = arith.negf %194 : vector<8x128xf32>
    %196 = math.exp %195 : vector<8x128xf32>
    %cst_120 = arith.constant 1.000000e+00 : f32
    %197 = vector.broadcast %cst_120 : f32 to vector<8x128xf32>
    %198 = arith.addf %197, %196 : vector<8x128xf32>
    %199 = arith.divf %197, %198 : vector<8x128xf32>
    %c0_121 = arith.constant 0 : index
    %c0_122 = arith.constant 0 : index
    %200 = vector.load %arg17[%c0_121, %c0_122] : memref<8x128xf32, #tpu.memory_space<vmem>>, vector<8x128xf32>
    %201 = arith.mulf %191, %200 : vector<8x128xf32>
    %202 = arith.mulf %185, %193 : vector<8x128xf32>
    %203 = arith.addf %201, %202 : vector<8x128xf32>
    %204 = math.tanh %203 : vector<8x128xf32>
    %205 = arith.mulf %199, %204 : vector<8x128xf32>
    %c0_123 = arith.constant 0 : index
    %c0_124 = arith.constant 0 : index
    %206 = vector.load %arg17[%c0_123, %c0_124] : memref<8x128xf32, #tpu.memory_space<vmem>>, vector<8x128xf32>
    tpu.vector_store %arg17[%c0_123, %c0_124], %203 {strides = array<i32>} : memref<8x128xf32, #tpu.memory_space<vmem>>, vector<8x128xf32>,
    %c0_125 = arith.constant 0 : index
    %c0_126 = arith.constant 0 : index
    %207 = vector.load %arg16[%c0_125, %c0_126] : memref<8x128xf32, #tpu.memory_space<vmem>>, vector<8x128xf32>
    tpu.vector_store %arg16[%c0_125, %c0_126], %205 {strides = array<i32>} : memref<8x128xf32, #tpu.memory_space<vmem>>, vector<8x128xf32>,
    %c4_127 = arith.constant 4 : index
    %c0_128 = arith.constant 0 : index
    %c0_129 = arith.constant 0 : index
    %208 = vector.load %arg15[%c4_127, %c0_128, %c0_129] : memref<8x8x128xf32, #tpu.memory_space<vmem>>, vector<1x8x128xf32>
    %209 = vector.shape_cast %208 : vector<1x8x128xf32> to vector<8x128xf32>
    %210 = vector.shape_cast %205 : vector<8x128xf32> to vector<1x8x128xf32>
    tpu.vector_store %arg15[%c4_127, %c0_128, %c0_129], %210 {strides = array<i32>} : memref<8x8x128xf32, #tpu.memory_space<vmem>>, vector<1x8x128xf32>,
    %c5 = arith.constant 5 : index
    %c0_130 = arith.constant 0 : index
    %c0_131 = arith.constant 0 : index
    %211 = vector.load %arg18[%c5, %c0_130, %c0_131] : memref<8x8x512xf32, #tpu.memory_space<vmem>>, vector<1x8x512xf32>
    %212 = vector.shape_cast %211 : vector<1x8x512xf32> to vector<8x512xf32>
    %c0_132 = arith.constant 0 : index
    %c0_133 = arith.constant 0 : index
    %213 = vector.load %arg16[%c0_132, %c0_133] : memref<8x128xf32, #tpu.memory_space<vmem>>, vector<8x128xf32>
    %c0_134 = arith.constant 0 : index
    %c0_135 = arith.constant 0 : index
    %c0_136 = arith.constant 0 : index
    %214 = vector.load %arg2[%c0_134, %c0_135, %c0_136] : memref<2x128x512xf32, #tpu.memory_space<vmem>>, vector<1x128x512xf32>
    %215 = vector.shape_cast %214 : vector<1x128x512xf32> to vector<128x512xf32>
    %cst_137 = arith.constant dense<0.000000e+00> : vector<8x512xf32>
    %216 = tpu.matmul %213, %215, %cst_137 {dimension_numbers = #tpu.dot_dimension_numbers<[1], [0], [0], [1], [0, 0, 1, 1], [], []>} : vector<8x128xf32>, vector<128x512xf32>, vector<8x512xf32> -> vector<8x512xf32>
    %217 = arith.addf %212, %216 : vector<8x512xf32>
    %218 = vector.extract_strided_slice %217 {offsets = [0, 0], sizes = [8, 128], strides = [1, 1]} : vector<8x512xf32> to vector<8x128xf32>
    %219 = arith.negf %218 : vector<8x128xf32>
    %220 = math.exp %219 : vector<8x128xf32>
    %cst_138 = arith.constant 1.000000e+00 : f32
    %221 = vector.broadcast %cst_138 : f32 to vector<8x128xf32>
    %222 = arith.addf %221, %220 : vector<8x128xf32>
    %223 = arith.divf %221, %222 : vector<8x128xf32>
    %224 = vector.extract_strided_slice %217 {offsets = [0, 128], sizes = [8, 128], strides = [1, 1]} : vector<8x512xf32> to vector<8x128xf32>
    %225 = arith.negf %224 : vector<8x128xf32>
    %226 = math.exp %225 : vector<8x128xf32>
    %cst_139 = arith.constant 1.000000e+00 : f32
    %227 = vector.broadcast %cst_139 : f32 to vector<8x128xf32>
    %228 = arith.addf %227, %226 : vector<8x128xf32>
    %229 = arith.divf %227, %228 : vector<8x128xf32>
    %230 = vector.extract_strided_slice %217 {offsets = [0, 256], sizes = [8, 128], strides = [1, 1]} : vector<8x512xf32> to vector<8x128xf32>
    %231 = math.tanh %230 : vector<8x128xf32>
    %232 = vector.extract_strided_slice %217 {offsets = [0, 384], sizes = [8, 128], strides = [1, 1]} : vector<8x512xf32> to vector<8x128xf32>
    %233 = arith.negf %232 : vector<8x128xf32>
    %234 = math.exp %233 : vector<8x128xf32>
    %cst_140 = arith.constant 1.000000e+00 : f32
    %235 = vector.broadcast %cst_140 : f32 to vector<8x128xf32>
    %236 = arith.addf %235, %234 : vector<8x128xf32>
    %237 = arith.divf %235, %236 : vector<8x128xf32>
    %c0_141 = arith.constant 0 : index
    %c0_142 = arith.constant 0 : index
    %238 = vector.load %arg17[%c0_141, %c0_142] : memref<8x128xf32, #tpu.memory_space<vmem>>, vector<8x128xf32>
    %239 = arith.mulf %229, %238 : vector<8x128xf32>
    %240 = arith.mulf %223, %231 : vector<8x128xf32>
    %241 = arith.addf %239, %240 : vector<8x128xf32>
    %242 = math.tanh %241 : vector<8x128xf32>
    %243 = arith.mulf %237, %242 : vector<8x128xf32>
    %c0_143 = arith.constant 0 : index
    %c0_144 = arith.constant 0 : index
    %244 = vector.load %arg17[%c0_143, %c0_144] : memref<8x128xf32, #tpu.memory_space<vmem>>, vector<8x128xf32>
    tpu.vector_store %arg17[%c0_143, %c0_144], %241 {strides = array<i32>} : memref<8x128xf32, #tpu.memory_space<vmem>>, vector<8x128xf32>,
    %c0_145 = arith.constant 0 : index
    %c0_146 = arith.constant 0 : index
    %245 = vector.load %arg16[%c0_145, %c0_146] : memref<8x128xf32, #tpu.memory_space<vmem>>, vector<8x128xf32>
    tpu.vector_store %arg16[%c0_145, %c0_146], %243 {strides = array<i32>} : memref<8x128xf32, #tpu.memory_space<vmem>>, vector<8x128xf32>,
    %c5_147 = arith.constant 5 : index
    %c0_148 = arith.constant 0 : index
    %c0_149 = arith.constant 0 : index
    %246 = vector.load %arg15[%c5_147, %c0_148, %c0_149] : memref<8x8x128xf32, #tpu.memory_space<vmem>>, vector<1x8x128xf32>
    %247 = vector.shape_cast %246 : vector<1x8x128xf32> to vector<8x128xf32>
    %248 = vector.shape_cast %243 : vector<8x128xf32> to vector<1x8x128xf32>
    tpu.vector_store %arg15[%c5_147, %c0_148, %c0_149], %248 {strides = array<i32>} : memref<8x8x128xf32, #tpu.memory_space<vmem>>, vector<1x8x128xf32>,
    %c6 = arith.constant 6 : index
    %c0_150 = arith.constant 0 : index
    %c0_151 = arith.constant 0 : index
    %249 = vector.load %arg18[%c6, %c0_150, %c0_151] : memref<8x8x512xf32, #tpu.memory_space<vmem>>, vector<1x8x512xf32>
    %250 = vector.shape_cast %249 : vector<1x8x512xf32> to vector<8x512xf32>
    %c0_152 = arith.constant 0 : index
    %c0_153 = arith.constant 0 : index
    %251 = vector.load %arg16[%c0_152, %c0_153] : memref<8x128xf32, #tpu.memory_space<vmem>>, vector<8x128xf32>
    %c0_154 = arith.constant 0 : index
    %c0_155 = arith.constant 0 : index
    %c0_156 = arith.constant 0 : index
    %252 = vector.load %arg2[%c0_154, %c0_155, %c0_156] : memref<2x128x512xf32, #tpu.memory_space<vmem>>, vector<1x128x512xf32>
    %253 = vector.shape_cast %252 : vector<1x128x512xf32> to vector<128x512xf32>
    %cst_157 = arith.constant dense<0.000000e+00> : vector<8x512xf32>
    %254 = tpu.matmul %251, %253, %cst_157 {dimension_numbers = #tpu.dot_dimension_numbers<[1], [0], [0], [1], [0, 0, 1, 1], [], []>} : vector<8x128xf32>, vector<128x512xf32>, vector<8x512xf32> -> vector<8x512xf32>
    %255 = arith.addf %250, %254 : vector<8x512xf32>
    %256 = vector.extract_strided_slice %255 {offsets = [0, 0], sizes = [8, 128], strides = [1, 1]} : vector<8x512xf32> to vector<8x128xf32>
    %257 = arith.negf %256 : vector<8x128xf32>
    %258 = math.exp %257 : vector<8x128xf32>
    %cst_158 = arith.constant 1.000000e+00 : f32
    %259 = vector.broadcast %cst_158 : f32 to vector<8x128xf32>
    %260 = arith.addf %259, %258 : vector<8x128xf32>
    %261 = arith.divf %259, %260 : vector<8x128xf32>
    %262 = vector.extract_strided_slice %255 {offsets = [0, 128], sizes = [8, 128], strides = [1, 1]} : vector<8x512xf32> to vector<8x128xf32>
    %263 = arith.negf %262 : vector<8x128xf32>
    %264 = math.exp %263 : vector<8x128xf32>
    %cst_159 = arith.constant 1.000000e+00 : f32
    %265 = vector.broadcast %cst_159 : f32 to vector<8x128xf32>
    %266 = arith.addf %265, %264 : vector<8x128xf32>
    %267 = arith.divf %265, %266 : vector<8x128xf32>
    %268 = vector.extract_strided_slice %255 {offsets = [0, 256], sizes = [8, 128], strides = [1, 1]} : vector<8x512xf32> to vector<8x128xf32>
    %269 = math.tanh %268 : vector<8x128xf32>
    %270 = vector.extract_strided_slice %255 {offsets = [0, 384], sizes = [8, 128], strides = [1, 1]} : vector<8x512xf32> to vector<8x128xf32>
    %271 = arith.negf %270 : vector<8x128xf32>
    %272 = math.exp %271 : vector<8x128xf32>
    %cst_160 = arith.constant 1.000000e+00 : f32
    %273 = vector.broadcast %cst_160 : f32 to vector<8x128xf32>
    %274 = arith.addf %273, %272 : vector<8x128xf32>
    %275 = arith.divf %273, %274 : vector<8x128xf32>
    %c0_161 = arith.constant 0 : index
    %c0_162 = arith.constant 0 : index
    %276 = vector.load %arg17[%c0_161, %c0_162] : memref<8x128xf32, #tpu.memory_space<vmem>>, vector<8x128xf32>
    %277 = arith.mulf %267, %276 : vector<8x128xf32>
    %278 = arith.mulf %261, %269 : vector<8x128xf32>
    %279 = arith.addf %277, %278 : vector<8x128xf32>
    %280 = math.tanh %279 : vector<8x128xf32>
    %281 = arith.mulf %275, %280 : vector<8x128xf32>
    %c0_163 = arith.constant 0 : index
    %c0_164 = arith.constant 0 : index
    %282 = vector.load %arg17[%c0_163, %c0_164] : memref<8x128xf32, #tpu.memory_space<vmem>>, vector<8x128xf32>
    tpu.vector_store %arg17[%c0_163, %c0_164], %279 {strides = array<i32>} : memref<8x128xf32, #tpu.memory_space<vmem>>, vector<8x128xf32>,
    %c0_165 = arith.constant 0 : index
    %c0_166 = arith.constant 0 : index
    %283 = vector.load %arg16[%c0_165, %c0_166] : memref<8x128xf32, #tpu.memory_space<vmem>>, vector<8x128xf32>
    tpu.vector_store %arg16[%c0_165, %c0_166], %281 {strides = array<i32>} : memref<8x128xf32, #tpu.memory_space<vmem>>, vector<8x128xf32>,
    %c6_167 = arith.constant 6 : index
    %c0_168 = arith.constant 0 : index
    %c0_169 = arith.constant 0 : index
    %284 = vector.load %arg15[%c6_167, %c0_168, %c0_169] : memref<8x8x128xf32, #tpu.memory_space<vmem>>, vector<1x8x128xf32>
    %285 = vector.shape_cast %284 : vector<1x8x128xf32> to vector<8x128xf32>
    %286 = vector.shape_cast %281 : vector<8x128xf32> to vector<1x8x128xf32>
    tpu.vector_store %arg15[%c6_167, %c0_168, %c0_169], %286 {strides = array<i32>} : memref<8x8x128xf32, #tpu.memory_space<vmem>>, vector<1x8x128xf32>,
    %c7 = arith.constant 7 : index
    %c0_170 = arith.constant 0 : index
    %c0_171 = arith.constant 0 : index
    %287 = vector.load %arg18[%c7, %c0_170, %c0_171] : memref<8x8x512xf32, #tpu.memory_space<vmem>>, vector<1x8x512xf32>
    %288 = vector.shape_cast %287 : vector<1x8x512xf32> to vector<8x512xf32>
    %c0_172 = arith.constant 0 : index
    %c0_173 = arith.constant 0 : index
    %289 = vector.load %arg16[%c0_172, %c0_173] : memref<8x128xf32, #tpu.memory_space<vmem>>, vector<8x128xf32>
    %c0_174 = arith.constant 0 : index
    %c0_175 = arith.constant 0 : index
    %c0_176 = arith.constant 0 : index
    %290 = vector.load %arg2[%c0_174, %c0_175, %c0_176] : memref<2x128x512xf32, #tpu.memory_space<vmem>>, vector<1x128x512xf32>
    %291 = vector.shape_cast %290 : vector<1x128x512xf32> to vector<128x512xf32>
    %cst_177 = arith.constant dense<0.000000e+00> : vector<8x512xf32>
    %292 = tpu.matmul %289, %291, %cst_177 {dimension_numbers = #tpu.dot_dimension_numbers<[1], [0], [0], [1], [0, 0, 1, 1], [], []>} : vector<8x128xf32>, vector<128x512xf32>, vector<8x512xf32> -> vector<8x512xf32>
    %293 = arith.addf %288, %292 : vector<8x512xf32>
    %294 = vector.extract_strided_slice %293 {offsets = [0, 0], sizes = [8, 128], strides = [1, 1]} : vector<8x512xf32> to vector<8x128xf32>
    %295 = arith.negf %294 : vector<8x128xf32>
    %296 = math.exp %295 : vector<8x128xf32>
    %cst_178 = arith.constant 1.000000e+00 : f32
    %297 = vector.broadcast %cst_178 : f32 to vector<8x128xf32>
    %298 = arith.addf %297, %296 : vector<8x128xf32>
    %299 = arith.divf %297, %298 : vector<8x128xf32>
    %300 = vector.extract_strided_slice %293 {offsets = [0, 128], sizes = [8, 128], strides = [1, 1]} : vector<8x512xf32> to vector<8x128xf32>
    %301 = arith.negf %300 : vector<8x128xf32>
    %302 = math.exp %301 : vector<8x128xf32>
    %cst_179 = arith.constant 1.000000e+00 : f32
    %303 = vector.broadcast %cst_179 : f32 to vector<8x128xf32>
    %304 = arith.addf %303, %302 : vector<8x128xf32>
    %305 = arith.divf %303, %304 : vector<8x128xf32>
    %306 = vector.extract_strided_slice %293 {offsets = [0, 256], sizes = [8, 128], strides = [1, 1]} : vector<8x512xf32> to vector<8x128xf32>
    %307 = math.tanh %306 : vector<8x128xf32>
    %308 = vector.extract_strided_slice %293 {offsets = [0, 384], sizes = [8, 128], strides = [1, 1]} : vector<8x512xf32> to vector<8x128xf32>
    %309 = arith.negf %308 : vector<8x128xf32>
    %310 = math.exp %309 : vector<8x128xf32>
    %cst_180 = arith.constant 1.000000e+00 : f32
    %311 = vector.broadcast %cst_180 : f32 to vector<8x128xf32>
    %312 = arith.addf %311, %310 : vector<8x128xf32>
    %313 = arith.divf %311, %312 : vector<8x128xf32>
    %c0_181 = arith.constant 0 : index
    %c0_182 = arith.constant 0 : index
    %314 = vector.load %arg17[%c0_181, %c0_182] : memref<8x128xf32, #tpu.memory_space<vmem>>, vector<8x128xf32>
    %315 = arith.mulf %305, %314 : vector<8x128xf32>
    %316 = arith.mulf %299, %307 : vector<8x128xf32>
    %317 = arith.addf %315, %316 : vector<8x128xf32>
    %318 = math.tanh %317 : vector<8x128xf32>
    %319 = arith.mulf %313, %318 : vector<8x128xf32>
    %c0_183 = arith.constant 0 : index
    %c0_184 = arith.constant 0 : index
    %320 = vector.load %arg17[%c0_183, %c0_184] : memref<8x128xf32, #tpu.memory_space<vmem>>, vector<8x128xf32>
    tpu.vector_store %arg17[%c0_183, %c0_184], %317 {strides = array<i32>} : memref<8x128xf32, #tpu.memory_space<vmem>>, vector<8x128xf32>,
    %c0_185 = arith.constant 0 : index
    %c0_186 = arith.constant 0 : index
    %321 = vector.load %arg16[%c0_185, %c0_186] : memref<8x128xf32, #tpu.memory_space<vmem>>, vector<8x128xf32>
    tpu.vector_store %arg16[%c0_185, %c0_186], %319 {strides = array<i32>} : memref<8x128xf32, #tpu.memory_space<vmem>>, vector<8x128xf32>,
    %c7_187 = arith.constant 7 : index
    %c0_188 = arith.constant 0 : index
    %c0_189 = arith.constant 0 : index
    %322 = vector.load %arg15[%c7_187, %c0_188, %c0_189] : memref<8x8x128xf32, #tpu.memory_space<vmem>>, vector<1x8x128xf32>
    %323 = vector.shape_cast %322 : vector<1x8x128xf32> to vector<8x128xf32>
    %324 = vector.shape_cast %319 : vector<8x128xf32> to vector<1x8x128xf32>
    tpu.vector_store %arg15[%c7_187, %c0_188, %c0_189], %324 {strides = array<i32>} : memref<8x8x128xf32, #tpu.memory_space<vmem>>, vector<1x8x128xf32>,
    %c0_190 = arith.constant 0 : index
    %c0_191 = arith.constant 0 : index
    %325 = vector.load %arg16[%c0_190, %c0_191] : memref<8x128xf32, #tpu.memory_space<vmem>>, vector<8x128xf32>
    %c0_192 = arith.constant 0 : index
    %c0_193 = arith.constant 0 : index
    %c0_194 = arith.constant 0 : index
    %326 = vector.load %arg13[%c0_192, %c0_193, %c0_194] : memref<2x8x128xf32, #tpu.memory_space<vmem>>, vector<1x8x128xf32>
    %327 = vector.shape_cast %326 : vector<1x8x128xf32> to vector<8x128xf32>
    %328 = vector.shape_cast %325 : vector<8x128xf32> to vector<1x8x128xf32>
    tpu.vector_store %arg13[%c0_192, %c0_193, %c0_194], %328 {strides = array<i32>} : memref<2x8x128xf32, #tpu.memory_space<vmem>>, vector<1x8x128xf32>,
    %c0_195 = arith.constant 0 : index
    %c0_196 = arith.constant 0 : index
    %329 = vector.load %arg17[%c0_195, %c0_196] : memref<8x128xf32, #tpu.memory_space<vmem>>, vector<8x128xf32>
    %c0_197 = arith.constant 0 : index
    %c0_198 = arith.constant 0 : index
    %c0_199 = arith.constant 0 : index
    %330 = vector.load %arg14[%c0_197, %c0_198, %c0_199] : memref<2x8x128xf32, #tpu.memory_space<vmem>>, vector<1x8x128xf32>
    %331 = vector.shape_cast %330 : vector<1x8x128xf32> to vector<8x128xf32>
    %332 = vector.shape_cast %329 : vector<8x128xf32> to vector<1x8x128xf32>
    tpu.vector_store %arg14[%c0_197, %c0_198, %c0_199], %332 {strides = array<i32>} : memref<2x8x128xf32, #tpu.memory_space<vmem>>, vector<1x8x128xf32>,
    %c0_200 = arith.constant 0 : index
    %c0_201 = arith.constant 0 : index
    %c0_202 = arith.constant 0 : index
    %333 = vector.load %arg15[%c0_200, %c0_201, %c0_202] : memref<8x8x128xf32, #tpu.memory_space<vmem>>, vector<8x8x128xf32>
    %334 = vector.shape_cast %333 : vector<8x8x128xf32> to vector<64x128xf32>
    %c1_203 = arith.constant 1 : index
    %c0_204 = arith.constant 0 : index
    %c0_205 = arith.constant 0 : index
    %335 = vector.load %arg1[%c1_203, %c0_204, %c0_205] : memref<2x128x512xf32, #tpu.memory_space<vmem>>, vector<1x128x512xf32>
    %336 = vector.shape_cast %335 : vector<1x128x512xf32> to vector<128x512xf32>
    %cst_206 = arith.constant dense<0.000000e+00> : vector<64x512xf32>
    %337 = tpu.matmul %334, %336, %cst_206 {dimension_numbers = #tpu.dot_dimension_numbers<[1], [0], [0], [1], [0, 0, 1, 1], [], []>} : vector<64x128xf32>, vector<128x512xf32>, vector<64x512xf32> -> vector<64x512xf32>
    %c1_207 = arith.constant 1 : index
    %c0_208 = arith.constant 0 : index
    %c0_209 = arith.constant 0 : index
    %338 = vector.load %arg3[%c1_207, %c0_208, %c0_209] : memref<2x1x512xf32, #tpu.memory_space<vmem>>, vector<1x1x512xf32>
    %339 = vector.shape_cast %338 : vector<1x1x512xf32> to vector<1x512xf32>
    %340 = vector.broadcast %339 : vector<1x512xf32> to vector<64x512xf32>
    %341 = arith.addf %337, %340 : vector<64x512xf32>
    %342 = vector.shape_cast %341 : vector<64x512xf32> to vector<8x8x512xf32>
    %c0_210 = arith.constant 0 : index
    %c0_211 = arith.constant 0 : index
    %c0_212 = arith.constant 0 : index
    %343 = vector.load %arg18[%c0_210, %c0_211, %c0_212] : memref<8x8x512xf32, #tpu.memory_space<vmem>>, vector<8x8x512xf32>
    tpu.vector_store %arg18[%c0_210, %c0_211, %c0_212], %342 {strides = array<i32>} : memref<8x8x512xf32, #tpu.memory_space<vmem>>, vector<8x8x512xf32>,
    %c1_213 = arith.constant 1 : index
    %c0_214 = arith.constant 0 : index
    %c0_215 = arith.constant 0 : index
    %344 = vector.load %arg4[%c1_213, %c0_214, %c0_215] : memref<2x8x128xf32, #tpu.memory_space<vmem>>, vector<1x8x128xf32>
    %345 = vector.shape_cast %344 : vector<1x8x128xf32> to vector<8x128xf32>
    %c0_216 = arith.constant 0 : index
    %c0_217 = arith.constant 0 : index
    %346 = vector.load %arg16[%c0_216, %c0_217] : memref<8x128xf32, #tpu.memory_space<vmem>>, vector<8x128xf32>
    tpu.vector_store %arg16[%c0_216, %c0_217], %345 {strides = array<i32>} : memref<8x128xf32, #tpu.memory_space<vmem>>, vector<8x128xf32>,
    %c1_218 = arith.constant 1 : index
    %c0_219 = arith.constant 0 : index
    %c0_220 = arith.constant 0 : index
    %347 = vector.load %arg5[%c1_218, %c0_219, %c0_220] : memref<2x8x128xf32, #tpu.memory_space<vmem>>, vector<1x8x128xf32>
    %348 = vector.shape_cast %347 : vector<1x8x128xf32> to vector<8x128xf32>
    %c0_221 = arith.constant 0 : index
    %c0_222 = arith.constant 0 : index
    %349 = vector.load %arg17[%c0_221, %c0_222] : memref<8x128xf32, #tpu.memory_space<vmem>>, vector<8x128xf32>
    tpu.vector_store %arg17[%c0_221, %c0_222], %348 {strides = array<i32>} : memref<8x128xf32, #tpu.memory_space<vmem>>, vector<8x128xf32>,
    %c0_223 = arith.constant 0 : index
    %c0_224 = arith.constant 0 : index
    %c0_225 = arith.constant 0 : index
    %350 = vector.load %arg18[%c0_223, %c0_224, %c0_225] : memref<8x8x512xf32, #tpu.memory_space<vmem>>, vector<1x8x512xf32>
    %351 = vector.shape_cast %350 : vector<1x8x512xf32> to vector<8x512xf32>
    %c0_226 = arith.constant 0 : index
    %c0_227 = arith.constant 0 : index
    %352 = vector.load %arg16[%c0_226, %c0_227] : memref<8x128xf32, #tpu.memory_space<vmem>>, vector<8x128xf32>
    %c1_228 = arith.constant 1 : index
    %c0_229 = arith.constant 0 : index
    %c0_230 = arith.constant 0 : index
    %353 = vector.load %arg2[%c1_228, %c0_229, %c0_230] : memref<2x128x512xf32, #tpu.memory_space<vmem>>, vector<1x128x512xf32>
    %354 = vector.shape_cast %353 : vector<1x128x512xf32> to vector<128x512xf32>
    %cst_231 = arith.constant dense<0.000000e+00> : vector<8x512xf32>
    %355 = tpu.matmul %352, %354, %cst_231 {dimension_numbers = #tpu.dot_dimension_numbers<[1], [0], [0], [1], [0, 0, 1, 1], [], []>} : vector<8x128xf32>, vector<128x512xf32>, vector<8x512xf32> -> vector<8x512xf32>
    %356 = arith.addf %351, %355 : vector<8x512xf32>
    %357 = vector.extract_strided_slice %356 {offsets = [0, 0], sizes = [8, 128], strides = [1, 1]} : vector<8x512xf32> to vector<8x128xf32>
    %358 = arith.negf %357 : vector<8x128xf32>
    %359 = math.exp %358 : vector<8x128xf32>
    %cst_232 = arith.constant 1.000000e+00 : f32
    %360 = vector.broadcast %cst_232 : f32 to vector<8x128xf32>
    %361 = arith.addf %360, %359 : vector<8x128xf32>
    %362 = arith.divf %360, %361 : vector<8x128xf32>
    %363 = vector.extract_strided_slice %356 {offsets = [0, 128], sizes = [8, 128], strides = [1, 1]} : vector<8x512xf32> to vector<8x128xf32>
    %364 = arith.negf %363 : vector<8x128xf32>
    %365 = math.exp %364 : vector<8x128xf32>
    %cst_233 = arith.constant 1.000000e+00 : f32
    %366 = vector.broadcast %cst_233 : f32 to vector<8x128xf32>
    %367 = arith.addf %366, %365 : vector<8x128xf32>
    %368 = arith.divf %366, %367 : vector<8x128xf32>
    %369 = vector.extract_strided_slice %356 {offsets = [0, 256], sizes = [8, 128], strides = [1, 1]} : vector<8x512xf32> to vector<8x128xf32>
    %370 = math.tanh %369 : vector<8x128xf32>
    %371 = vector.extract_strided_slice %356 {offsets = [0, 384], sizes = [8, 128], strides = [1, 1]} : vector<8x512xf32> to vector<8x128xf32>
    %372 = arith.negf %371 : vector<8x128xf32>
    %373 = math.exp %372 : vector<8x128xf32>
    %cst_234 = arith.constant 1.000000e+00 : f32
    %374 = vector.broadcast %cst_234 : f32 to vector<8x128xf32>
    %375 = arith.addf %374, %373 : vector<8x128xf32>
    %376 = arith.divf %374, %375 : vector<8x128xf32>
    %c0_235 = arith.constant 0 : index
    %c0_236 = arith.constant 0 : index
    %377 = vector.load %arg17[%c0_235, %c0_236] : memref<8x128xf32, #tpu.memory_space<vmem>>, vector<8x128xf32>
    %378 = arith.mulf %368, %377 : vector<8x128xf32>
    %379 = arith.mulf %362, %370 : vector<8x128xf32>
    %380 = arith.addf %378, %379 : vector<8x128xf32>
    %381 = math.tanh %380 : vector<8x128xf32>
    %382 = arith.mulf %376, %381 : vector<8x128xf32>
    %c0_237 = arith.constant 0 : index
    %c0_238 = arith.constant 0 : index
    %383 = vector.load %arg17[%c0_237, %c0_238] : memref<8x128xf32, #tpu.memory_space<vmem>>, vector<8x128xf32>
    tpu.vector_store %arg17[%c0_237, %c0_238], %380 {strides = array<i32>} : memref<8x128xf32, #tpu.memory_space<vmem>>, vector<8x128xf32>,
    %c0_239 = arith.constant 0 : index
    %c0_240 = arith.constant 0 : index
    %384 = vector.load %arg16[%c0_239, %c0_240] : memref<8x128xf32, #tpu.memory_space<vmem>>, vector<8x128xf32>
    tpu.vector_store %arg16[%c0_239, %c0_240], %382 {strides = array<i32>} : memref<8x128xf32, #tpu.memory_space<vmem>>, vector<8x128xf32>,
    %c0_241 = arith.constant 0 : index
    %c0_242 = arith.constant 0 : index
    %c0_243 = arith.constant 0 : index
    %385 = vector.load %arg15[%c0_241, %c0_242, %c0_243] : memref<8x8x128xf32, #tpu.memory_space<vmem>>, vector<1x8x128xf32>
    %386 = vector.shape_cast %385 : vector<1x8x128xf32> to vector<8x128xf32>
    %387 = vector.shape_cast %382 : vector<8x128xf32> to vector<1x8x128xf32>
    tpu.vector_store %arg15[%c0_241, %c0_242, %c0_243], %387 {strides = array<i32>} : memref<8x8x128xf32, #tpu.memory_space<vmem>>, vector<1x8x128xf32>,
    %c1_244 = arith.constant 1 : index
    %c0_245 = arith.constant 0 : index
    %c0_246 = arith.constant 0 : index
    %388 = vector.load %arg18[%c1_244, %c0_245, %c0_246] : memref<8x8x512xf32, #tpu.memory_space<vmem>>, vector<1x8x512xf32>
    %389 = vector.shape_cast %388 : vector<1x8x512xf32> to vector<8x512xf32>
    %c0_247 = arith.constant 0 : index
    %c0_248 = arith.constant 0 : index
    %390 = vector.load %arg16[%c0_247, %c0_248] : memref<8x128xf32, #tpu.memory_space<vmem>>, vector<8x128xf32>
    %c1_249 = arith.constant 1 : index
    %c0_250 = arith.constant 0 : index
    %c0_251 = arith.constant 0 : index
    %391 = vector.load %arg2[%c1_249, %c0_250, %c0_251] : memref<2x128x512xf32, #tpu.memory_space<vmem>>, vector<1x128x512xf32>
    %392 = vector.shape_cast %391 : vector<1x128x512xf32> to vector<128x512xf32>
    %cst_252 = arith.constant dense<0.000000e+00> : vector<8x512xf32>
    %393 = tpu.matmul %390, %392, %cst_252 {dimension_numbers = #tpu.dot_dimension_numbers<[1], [0], [0], [1], [0, 0, 1, 1], [], []>} : vector<8x128xf32>, vector<128x512xf32>, vector<8x512xf32> -> vector<8x512xf32>
    %394 = arith.addf %389, %393 : vector<8x512xf32>
    %395 = vector.extract_strided_slice %394 {offsets = [0, 0], sizes = [8, 128], strides = [1, 1]} : vector<8x512xf32> to vector<8x128xf32>
    %396 = arith.negf %395 : vector<8x128xf32>
    %397 = math.exp %396 : vector<8x128xf32>
    %cst_253 = arith.constant 1.000000e+00 : f32
    %398 = vector.broadcast %cst_253 : f32 to vector<8x128xf32>
    %399 = arith.addf %398, %397 : vector<8x128xf32>
    %400 = arith.divf %398, %399 : vector<8x128xf32>
    %401 = vector.extract_strided_slice %394 {offsets = [0, 128], sizes = [8, 128], strides = [1, 1]} : vector<8x512xf32> to vector<8x128xf32>
    %402 = arith.negf %401 : vector<8x128xf32>
    %403 = math.exp %402 : vector<8x128xf32>
    %cst_254 = arith.constant 1.000000e+00 : f32
    %404 = vector.broadcast %cst_254 : f32 to vector<8x128xf32>
    %405 = arith.addf %404, %403 : vector<8x128xf32>
    %406 = arith.divf %404, %405 : vector<8x128xf32>
    %407 = vector.extract_strided_slice %394 {offsets = [0, 256], sizes = [8, 128], strides = [1, 1]} : vector<8x512xf32> to vector<8x128xf32>
    %408 = math.tanh %407 : vector<8x128xf32>
    %409 = vector.extract_strided_slice %394 {offsets = [0, 384], sizes = [8, 128], strides = [1, 1]} : vector<8x512xf32> to vector<8x128xf32>
    %410 = arith.negf %409 : vector<8x128xf32>
    %411 = math.exp %410 : vector<8x128xf32>
    %cst_255 = arith.constant 1.000000e+00 : f32
    %412 = vector.broadcast %cst_255 : f32 to vector<8x128xf32>
    %413 = arith.addf %412, %411 : vector<8x128xf32>
    %414 = arith.divf %412, %413 : vector<8x128xf32>
    %c0_256 = arith.constant 0 : index
    %c0_257 = arith.constant 0 : index
    %415 = vector.load %arg17[%c0_256, %c0_257] : memref<8x128xf32, #tpu.memory_space<vmem>>, vector<8x128xf32>
    %416 = arith.mulf %406, %415 : vector<8x128xf32>
    %417 = arith.mulf %400, %408 : vector<8x128xf32>
    %418 = arith.addf %416, %417 : vector<8x128xf32>
    %419 = math.tanh %418 : vector<8x128xf32>
    %420 = arith.mulf %414, %419 : vector<8x128xf32>
    %c0_258 = arith.constant 0 : index
    %c0_259 = arith.constant 0 : index
    %421 = vector.load %arg17[%c0_258, %c0_259] : memref<8x128xf32, #tpu.memory_space<vmem>>, vector<8x128xf32>
    tpu.vector_store %arg17[%c0_258, %c0_259], %418 {strides = array<i32>} : memref<8x128xf32, #tpu.memory_space<vmem>>, vector<8x128xf32>,
    %c0_260 = arith.constant 0 : index
    %c0_261 = arith.constant 0 : index
    %422 = vector.load %arg16[%c0_260, %c0_261] : memref<8x128xf32, #tpu.memory_space<vmem>>, vector<8x128xf32>
    tpu.vector_store %arg16[%c0_260, %c0_261], %420 {strides = array<i32>} : memref<8x128xf32, #tpu.memory_space<vmem>>, vector<8x128xf32>,
    %c1_262 = arith.constant 1 : index
    %c0_263 = arith.constant 0 : index
    %c0_264 = arith.constant 0 : index
    %423 = vector.load %arg15[%c1_262, %c0_263, %c0_264] : memref<8x8x128xf32, #tpu.memory_space<vmem>>, vector<1x8x128xf32>
    %424 = vector.shape_cast %423 : vector<1x8x128xf32> to vector<8x128xf32>
    %425 = vector.shape_cast %420 : vector<8x128xf32> to vector<1x8x128xf32>
    tpu.vector_store %arg15[%c1_262, %c0_263, %c0_264], %425 {strides = array<i32>} : memref<8x8x128xf32, #tpu.memory_space<vmem>>, vector<1x8x128xf32>,
    %c2_265 = arith.constant 2 : index
    %c0_266 = arith.constant 0 : index
    %c0_267 = arith.constant 0 : index
    %426 = vector.load %arg18[%c2_265, %c0_266, %c0_267] : memref<8x8x512xf32, #tpu.memory_space<vmem>>, vector<1x8x512xf32>
    %427 = vector.shape_cast %426 : vector<1x8x512xf32> to vector<8x512xf32>
    %c0_268 = arith.constant 0 : index
    %c0_269 = arith.constant 0 : index
    %428 = vector.load %arg16[%c0_268, %c0_269] : memref<8x128xf32, #tpu.memory_space<vmem>>, vector<8x128xf32>
    %c1_270 = arith.constant 1 : index
    %c0_271 = arith.constant 0 : index
    %c0_272 = arith.constant 0 : index
    %429 = vector.load %arg2[%c1_270, %c0_271, %c0_272] : memref<2x128x512xf32, #tpu.memory_space<vmem>>, vector<1x128x512xf32>
    %430 = vector.shape_cast %429 : vector<1x128x512xf32> to vector<128x512xf32>
    %cst_273 = arith.constant dense<0.000000e+00> : vector<8x512xf32>
    %431 = tpu.matmul %428, %430, %cst_273 {dimension_numbers = #tpu.dot_dimension_numbers<[1], [0], [0], [1], [0, 0, 1, 1], [], []>} : vector<8x128xf32>, vector<128x512xf32>, vector<8x512xf32> -> vector<8x512xf32>
    %432 = arith.addf %427, %431 : vector<8x512xf32>
    %433 = vector.extract_strided_slice %432 {offsets = [0, 0], sizes = [8, 128], strides = [1, 1]} : vector<8x512xf32> to vector<8x128xf32>
    %434 = arith.negf %433 : vector<8x128xf32>
    %435 = math.exp %434 : vector<8x128xf32>
    %cst_274 = arith.constant 1.000000e+00 : f32
    %436 = vector.broadcast %cst_274 : f32 to vector<8x128xf32>
    %437 = arith.addf %436, %435 : vector<8x128xf32>
    %438 = arith.divf %436, %437 : vector<8x128xf32>
    %439 = vector.extract_strided_slice %432 {offsets = [0, 128], sizes = [8, 128], strides = [1, 1]} : vector<8x512xf32> to vector<8x128xf32>
    %440 = arith.negf %439 : vector<8x128xf32>
    %441 = math.exp %440 : vector<8x128xf32>
    %cst_275 = arith.constant 1.000000e+00 : f32
    %442 = vector.broadcast %cst_275 : f32 to vector<8x128xf32>
    %443 = arith.addf %442, %441 : vector<8x128xf32>
    %444 = arith.divf %442, %443 : vector<8x128xf32>
    %445 = vector.extract_strided_slice %432 {offsets = [0, 256], sizes = [8, 128], strides = [1, 1]} : vector<8x512xf32> to vector<8x128xf32>
    %446 = math.tanh %445 : vector<8x128xf32>
    %447 = vector.extract_strided_slice %432 {offsets = [0, 384], sizes = [8, 128], strides = [1, 1]} : vector<8x512xf32> to vector<8x128xf32>
    %448 = arith.negf %447 : vector<8x128xf32>
    %449 = math.exp %448 : vector<8x128xf32>
    %cst_276 = arith.constant 1.000000e+00 : f32
    %450 = vector.broadcast %cst_276 : f32 to vector<8x128xf32>
    %451 = arith.addf %450, %449 : vector<8x128xf32>
    %452 = arith.divf %450, %451 : vector<8x128xf32>
    %c0_277 = arith.constant 0 : index
    %c0_278 = arith.constant 0 : index
    %453 = vector.load %arg17[%c0_277, %c0_278] : memref<8x128xf32, #tpu.memory_space<vmem>>, vector<8x128xf32>
    %454 = arith.mulf %444, %453 : vector<8x128xf32>
    %455 = arith.mulf %438, %446 : vector<8x128xf32>
    %456 = arith.addf %454, %455 : vector<8x128xf32>
    %457 = math.tanh %456 : vector<8x128xf32>
    %458 = arith.mulf %452, %457 : vector<8x128xf32>
    %c0_279 = arith.constant 0 : index
    %c0_280 = arith.constant 0 : index
    %459 = vector.load %arg17[%c0_279, %c0_280] : memref<8x128xf32, #tpu.memory_space<vmem>>, vector<8x128xf32>
    tpu.vector_store %arg17[%c0_279, %c0_280], %456 {strides = array<i32>} : memref<8x128xf32, #tpu.memory_space<vmem>>, vector<8x128xf32>,
    %c0_281 = arith.constant 0 : index
    %c0_282 = arith.constant 0 : index
    %460 = vector.load %arg16[%c0_281, %c0_282] : memref<8x128xf32, #tpu.memory_space<vmem>>, vector<8x128xf32>
    tpu.vector_store %arg16[%c0_281, %c0_282], %458 {strides = array<i32>} : memref<8x128xf32, #tpu.memory_space<vmem>>, vector<8x128xf32>,
    %c2_283 = arith.constant 2 : index
    %c0_284 = arith.constant 0 : index
    %c0_285 = arith.constant 0 : index
    %461 = vector.load %arg15[%c2_283, %c0_284, %c0_285] : memref<8x8x128xf32, #tpu.memory_space<vmem>>, vector<1x8x128xf32>
    %462 = vector.shape_cast %461 : vector<1x8x128xf32> to vector<8x128xf32>
    %463 = vector.shape_cast %458 : vector<8x128xf32> to vector<1x8x128xf32>
    tpu.vector_store %arg15[%c2_283, %c0_284, %c0_285], %463 {strides = array<i32>} : memref<8x8x128xf32, #tpu.memory_space<vmem>>, vector<1x8x128xf32>,
    %c3_286 = arith.constant 3 : index
    %c0_287 = arith.constant 0 : index
    %c0_288 = arith.constant 0 : index
    %464 = vector.load %arg18[%c3_286, %c0_287, %c0_288] : memref<8x8x512xf32, #tpu.memory_space<vmem>>, vector<1x8x512xf32>
    %465 = vector.shape_cast %464 : vector<1x8x512xf32> to vector<8x512xf32>
    %c0_289 = arith.constant 0 : index
    %c0_290 = arith.constant 0 : index
    %466 = vector.load %arg16[%c0_289, %c0_290] : memref<8x128xf32, #tpu.memory_space<vmem>>, vector<8x128xf32>
    %c1_291 = arith.constant 1 : index
    %c0_292 = arith.constant 0 : index
    %c0_293 = arith.constant 0 : index
    %467 = vector.load %arg2[%c1_291, %c0_292, %c0_293] : memref<2x128x512xf32, #tpu.memory_space<vmem>>, vector<1x128x512xf32>
    %468 = vector.shape_cast %467 : vector<1x128x512xf32> to vector<128x512xf32>
    %cst_294 = arith.constant dense<0.000000e+00> : vector<8x512xf32>
    %469 = tpu.matmul %466, %468, %cst_294 {dimension_numbers = #tpu.dot_dimension_numbers<[1], [0], [0], [1], [0, 0, 1, 1], [], []>} : vector<8x128xf32>, vector<128x512xf32>, vector<8x512xf32> -> vector<8x512xf32>
    %470 = arith.addf %465, %469 : vector<8x512xf32>
    %471 = vector.extract_strided_slice %470 {offsets = [0, 0], sizes = [8, 128], strides = [1, 1]} : vector<8x512xf32> to vector<8x128xf32>
    %472 = arith.negf %471 : vector<8x128xf32>
    %473 = math.exp %472 : vector<8x128xf32>
    %cst_295 = arith.constant 1.000000e+00 : f32
    %474 = vector.broadcast %cst_295 : f32 to vector<8x128xf32>
    %475 = arith.addf %474, %473 : vector<8x128xf32>
    %476 = arith.divf %474, %475 : vector<8x128xf32>
    %477 = vector.extract_strided_slice %470 {offsets = [0, 128], sizes = [8, 128], strides = [1, 1]} : vector<8x512xf32> to vector<8x128xf32>
    %478 = arith.negf %477 : vector<8x128xf32>
    %479 = math.exp %478 : vector<8x128xf32>
    %cst_296 = arith.constant 1.000000e+00 : f32
    %480 = vector.broadcast %cst_296 : f32 to vector<8x128xf32>
    %481 = arith.addf %480, %479 : vector<8x128xf32>
    %482 = arith.divf %480, %481 : vector<8x128xf32>
    %483 = vector.extract_strided_slice %470 {offsets = [0, 256], sizes = [8, 128], strides = [1, 1]} : vector<8x512xf32> to vector<8x128xf32>
    %484 = math.tanh %483 : vector<8x128xf32>
    %485 = vector.extract_strided_slice %470 {offsets = [0, 384], sizes = [8, 128], strides = [1, 1]} : vector<8x512xf32> to vector<8x128xf32>
    %486 = arith.negf %485 : vector<8x128xf32>
    %487 = math.exp %486 : vector<8x128xf32>
    %cst_297 = arith.constant 1.000000e+00 : f32
    %488 = vector.broadcast %cst_297 : f32 to vector<8x128xf32>
    %489 = arith.addf %488, %487 : vector<8x128xf32>
    %490 = arith.divf %488, %489 : vector<8x128xf32>
    %c0_298 = arith.constant 0 : index
    %c0_299 = arith.constant 0 : index
    %491 = vector.load %arg17[%c0_298, %c0_299] : memref<8x128xf32, #tpu.memory_space<vmem>>, vector<8x128xf32>
    %492 = arith.mulf %482, %491 : vector<8x128xf32>
    %493 = arith.mulf %476, %484 : vector<8x128xf32>
    %494 = arith.addf %492, %493 : vector<8x128xf32>
    %495 = math.tanh %494 : vector<8x128xf32>
    %496 = arith.mulf %490, %495 : vector<8x128xf32>
    %c0_300 = arith.constant 0 : index
    %c0_301 = arith.constant 0 : index
    %497 = vector.load %arg17[%c0_300, %c0_301] : memref<8x128xf32, #tpu.memory_space<vmem>>, vector<8x128xf32>
    tpu.vector_store %arg17[%c0_300, %c0_301], %494 {strides = array<i32>} : memref<8x128xf32, #tpu.memory_space<vmem>>, vector<8x128xf32>,
    %c0_302 = arith.constant 0 : index
    %c0_303 = arith.constant 0 : index
    %498 = vector.load %arg16[%c0_302, %c0_303] : memref<8x128xf32, #tpu.memory_space<vmem>>, vector<8x128xf32>
    tpu.vector_store %arg16[%c0_302, %c0_303], %496 {strides = array<i32>} : memref<8x128xf32, #tpu.memory_space<vmem>>, vector<8x128xf32>,
    %c3_304 = arith.constant 3 : index
    %c0_305 = arith.constant 0 : index
    %c0_306 = arith.constant 0 : index
    %499 = vector.load %arg15[%c3_304, %c0_305, %c0_306] : memref<8x8x128xf32, #tpu.memory_space<vmem>>, vector<1x8x128xf32>
    %500 = vector.shape_cast %499 : vector<1x8x128xf32> to vector<8x128xf32>
    %501 = vector.shape_cast %496 : vector<8x128xf32> to vector<1x8x128xf32>
    tpu.vector_store %arg15[%c3_304, %c0_305, %c0_306], %501 {strides = array<i32>} : memref<8x8x128xf32, #tpu.memory_space<vmem>>, vector<1x8x128xf32>,
    %c4_307 = arith.constant 4 : index
    %c0_308 = arith.constant 0 : index
    %c0_309 = arith.constant 0 : index
    %502 = vector.load %arg18[%c4_307, %c0_308, %c0_309] : memref<8x8x512xf32, #tpu.memory_space<vmem>>, vector<1x8x512xf32>
    %503 = vector.shape_cast %502 : vector<1x8x512xf32> to vector<8x512xf32>
    %c0_310 = arith.constant 0 : index
    %c0_311 = arith.constant 0 : index
    %504 = vector.load %arg16[%c0_310, %c0_311] : memref<8x128xf32, #tpu.memory_space<vmem>>, vector<8x128xf32>
    %c1_312 = arith.constant 1 : index
    %c0_313 = arith.constant 0 : index
    %c0_314 = arith.constant 0 : index
    %505 = vector.load %arg2[%c1_312, %c0_313, %c0_314] : memref<2x128x512xf32, #tpu.memory_space<vmem>>, vector<1x128x512xf32>
    %506 = vector.shape_cast %505 : vector<1x128x512xf32> to vector<128x512xf32>
    %cst_315 = arith.constant dense<0.000000e+00> : vector<8x512xf32>
    %507 = tpu.matmul %504, %506, %cst_315 {dimension_numbers = #tpu.dot_dimension_numbers<[1], [0], [0], [1], [0, 0, 1, 1], [], []>} : vector<8x128xf32>, vector<128x512xf32>, vector<8x512xf32> -> vector<8x512xf32>
    %508 = arith.addf %503, %507 : vector<8x512xf32>
    %509 = vector.extract_strided_slice %508 {offsets = [0, 0], sizes = [8, 128], strides = [1, 1]} : vector<8x512xf32> to vector<8x128xf32>
    %510 = arith.negf %509 : vector<8x128xf32>
    %511 = math.exp %510 : vector<8x128xf32>
    %cst_316 = arith.constant 1.000000e+00 : f32
    %512 = vector.broadcast %cst_316 : f32 to vector<8x128xf32>
    %513 = arith.addf %512, %511 : vector<8x128xf32>
    %514 = arith.divf %512, %513 : vector<8x128xf32>
    %515 = vector.extract_strided_slice %508 {offsets = [0, 128], sizes = [8, 128], strides = [1, 1]} : vector<8x512xf32> to vector<8x128xf32>
    %516 = arith.negf %515 : vector<8x128xf32>
    %517 = math.exp %516 : vector<8x128xf32>
    %cst_317 = arith.constant 1.000000e+00 : f32
    %518 = vector.broadcast %cst_317 : f32 to vector<8x128xf32>
    %519 = arith.addf %518, %517 : vector<8x128xf32>
    %520 = arith.divf %518, %519 : vector<8x128xf32>
    %521 = vector.extract_strided_slice %508 {offsets = [0, 256], sizes = [8, 128], strides = [1, 1]} : vector<8x512xf32> to vector<8x128xf32>
    %522 = math.tanh %521 : vector<8x128xf32>
    %523 = vector.extract_strided_slice %508 {offsets = [0, 384], sizes = [8, 128], strides = [1, 1]} : vector<8x512xf32> to vector<8x128xf32>
    %524 = arith.negf %523 : vector<8x128xf32>
    %525 = math.exp %524 : vector<8x128xf32>
    %cst_318 = arith.constant 1.000000e+00 : f32
    %526 = vector.broadcast %cst_318 : f32 to vector<8x128xf32>
    %527 = arith.addf %526, %525 : vector<8x128xf32>
    %528 = arith.divf %526, %527 : vector<8x128xf32>
    %c0_319 = arith.constant 0 : index
    %c0_320 = arith.constant 0 : index
    %529 = vector.load %arg17[%c0_319, %c0_320] : memref<8x128xf32, #tpu.memory_space<vmem>>, vector<8x128xf32>
    %530 = arith.mulf %520, %529 : vector<8x128xf32>
    %531 = arith.mulf %514, %522 : vector<8x128xf32>
    %532 = arith.addf %530, %531 : vector<8x128xf32>
    %533 = math.tanh %532 : vector<8x128xf32>
    %534 = arith.mulf %528, %533 : vector<8x128xf32>
    %c0_321 = arith.constant 0 : index
    %c0_322 = arith.constant 0 : index
    %535 = vector.load %arg17[%c0_321, %c0_322] : memref<8x128xf32, #tpu.memory_space<vmem>>, vector<8x128xf32>
    tpu.vector_store %arg17[%c0_321, %c0_322], %532 {strides = array<i32>} : memref<8x128xf32, #tpu.memory_space<vmem>>, vector<8x128xf32>,
    %c0_323 = arith.constant 0 : index
    %c0_324 = arith.constant 0 : index
    %536 = vector.load %arg16[%c0_323, %c0_324] : memref<8x128xf32, #tpu.memory_space<vmem>>, vector<8x128xf32>
    tpu.vector_store %arg16[%c0_323, %c0_324], %534 {strides = array<i32>} : memref<8x128xf32, #tpu.memory_space<vmem>>, vector<8x128xf32>,
    %c4_325 = arith.constant 4 : index
    %c0_326 = arith.constant 0 : index
    %c0_327 = arith.constant 0 : index
    %537 = vector.load %arg15[%c4_325, %c0_326, %c0_327] : memref<8x8x128xf32, #tpu.memory_space<vmem>>, vector<1x8x128xf32>
    %538 = vector.shape_cast %537 : vector<1x8x128xf32> to vector<8x128xf32>
    %539 = vector.shape_cast %534 : vector<8x128xf32> to vector<1x8x128xf32>
    tpu.vector_store %arg15[%c4_325, %c0_326, %c0_327], %539 {strides = array<i32>} : memref<8x8x128xf32, #tpu.memory_space<vmem>>, vector<1x8x128xf32>,
    %c5_328 = arith.constant 5 : index
    %c0_329 = arith.constant 0 : index
    %c0_330 = arith.constant 0 : index
    %540 = vector.load %arg18[%c5_328, %c0_329, %c0_330] : memref<8x8x512xf32, #tpu.memory_space<vmem>>, vector<1x8x512xf32>
    %541 = vector.shape_cast %540 : vector<1x8x512xf32> to vector<8x512xf32>
    %c0_331 = arith.constant 0 : index
    %c0_332 = arith.constant 0 : index
    %542 = vector.load %arg16[%c0_331, %c0_332] : memref<8x128xf32, #tpu.memory_space<vmem>>, vector<8x128xf32>
    %c1_333 = arith.constant 1 : index
    %c0_334 = arith.constant 0 : index
    %c0_335 = arith.constant 0 : index
    %543 = vector.load %arg2[%c1_333, %c0_334, %c0_335] : memref<2x128x512xf32, #tpu.memory_space<vmem>>, vector<1x128x512xf32>
    %544 = vector.shape_cast %543 : vector<1x128x512xf32> to vector<128x512xf32>
    %cst_336 = arith.constant dense<0.000000e+00> : vector<8x512xf32>
    %545 = tpu.matmul %542, %544, %cst_336 {dimension_numbers = #tpu.dot_dimension_numbers<[1], [0], [0], [1], [0, 0, 1, 1], [], []>} : vector<8x128xf32>, vector<128x512xf32>, vector<8x512xf32> -> vector<8x512xf32>
    %546 = arith.addf %541, %545 : vector<8x512xf32>
    %547 = vector.extract_strided_slice %546 {offsets = [0, 0], sizes = [8, 128], strides = [1, 1]} : vector<8x512xf32> to vector<8x128xf32>
    %548 = arith.negf %547 : vector<8x128xf32>
    %549 = math.exp %548 : vector<8x128xf32>
    %cst_337 = arith.constant 1.000000e+00 : f32
    %550 = vector.broadcast %cst_337 : f32 to vector<8x128xf32>
    %551 = arith.addf %550, %549 : vector<8x128xf32>
    %552 = arith.divf %550, %551 : vector<8x128xf32>
    %553 = vector.extract_strided_slice %546 {offsets = [0, 128], sizes = [8, 128], strides = [1, 1]} : vector<8x512xf32> to vector<8x128xf32>
    %554 = arith.negf %553 : vector<8x128xf32>
    %555 = math.exp %554 : vector<8x128xf32>
    %cst_338 = arith.constant 1.000000e+00 : f32
    %556 = vector.broadcast %cst_338 : f32 to vector<8x128xf32>
    %557 = arith.addf %556, %555 : vector<8x128xf32>
    %558 = arith.divf %556, %557 : vector<8x128xf32>
    %559 = vector.extract_strided_slice %546 {offsets = [0, 256], sizes = [8, 128], strides = [1, 1]} : vector<8x512xf32> to vector<8x128xf32>
    %560 = math.tanh %559 : vector<8x128xf32>
    %561 = vector.extract_strided_slice %546 {offsets = [0, 384], sizes = [8, 128], strides = [1, 1]} : vector<8x512xf32> to vector<8x128xf32>
    %562 = arith.negf %561 : vector<8x128xf32>
    %563 = math.exp %562 : vector<8x128xf32>
    %cst_339 = arith.constant 1.000000e+00 : f32
    %564 = vector.broadcast %cst_339 : f32 to vector<8x128xf32>
    %565 = arith.addf %564, %563 : vector<8x128xf32>
    %566 = arith.divf %564, %565 : vector<8x128xf32>
    %c0_340 = arith.constant 0 : index
    %c0_341 = arith.constant 0 : index
    %567 = vector.load %arg17[%c0_340, %c0_341] : memref<8x128xf32, #tpu.memory_space<vmem>>, vector<8x128xf32>
    %568 = arith.mulf %558, %567 : vector<8x128xf32>
    %569 = arith.mulf %552, %560 : vector<8x128xf32>
    %570 = arith.addf %568, %569 : vector<8x128xf32>
    %571 = math.tanh %570 : vector<8x128xf32>
    %572 = arith.mulf %566, %571 : vector<8x128xf32>
    %c0_342 = arith.constant 0 : index
    %c0_343 = arith.constant 0 : index
    %573 = vector.load %arg17[%c0_342, %c0_343] : memref<8x128xf32, #tpu.memory_space<vmem>>, vector<8x128xf32>
    tpu.vector_store %arg17[%c0_342, %c0_343], %570 {strides = array<i32>} : memref<8x128xf32, #tpu.memory_space<vmem>>, vector<8x128xf32>,
    %c0_344 = arith.constant 0 : index
    %c0_345 = arith.constant 0 : index
    %574 = vector.load %arg16[%c0_344, %c0_345] : memref<8x128xf32, #tpu.memory_space<vmem>>, vector<8x128xf32>
    tpu.vector_store %arg16[%c0_344, %c0_345], %572 {strides = array<i32>} : memref<8x128xf32, #tpu.memory_space<vmem>>, vector<8x128xf32>,
    %c5_346 = arith.constant 5 : index
    %c0_347 = arith.constant 0 : index
    %c0_348 = arith.constant 0 : index
    %575 = vector.load %arg15[%c5_346, %c0_347, %c0_348] : memref<8x8x128xf32, #tpu.memory_space<vmem>>, vector<1x8x128xf32>
    %576 = vector.shape_cast %575 : vector<1x8x128xf32> to vector<8x128xf32>
    %577 = vector.shape_cast %572 : vector<8x128xf32> to vector<1x8x128xf32>
    tpu.vector_store %arg15[%c5_346, %c0_347, %c0_348], %577 {strides = array<i32>} : memref<8x8x128xf32, #tpu.memory_space<vmem>>, vector<1x8x128xf32>,
    %c6_349 = arith.constant 6 : index
    %c0_350 = arith.constant 0 : index
    %c0_351 = arith.constant 0 : index
    %578 = vector.load %arg18[%c6_349, %c0_350, %c0_351] : memref<8x8x512xf32, #tpu.memory_space<vmem>>, vector<1x8x512xf32>
    %579 = vector.shape_cast %578 : vector<1x8x512xf32> to vector<8x512xf32>
    %c0_352 = arith.constant 0 : index
    %c0_353 = arith.constant 0 : index
    %580 = vector.load %arg16[%c0_352, %c0_353] : memref<8x128xf32, #tpu.memory_space<vmem>>, vector<8x128xf32>
    %c1_354 = arith.constant 1 : index
    %c0_355 = arith.constant 0 : index
    %c0_356 = arith.constant 0 : index
    %581 = vector.load %arg2[%c1_354, %c0_355, %c0_356] : memref<2x128x512xf32, #tpu.memory_space<vmem>>, vector<1x128x512xf32>
    %582 = vector.shape_cast %581 : vector<1x128x512xf32> to vector<128x512xf32>
    %cst_357 = arith.constant dense<0.000000e+00> : vector<8x512xf32>
    %583 = tpu.matmul %580, %582, %cst_357 {dimension_numbers = #tpu.dot_dimension_numbers<[1], [0], [0], [1], [0, 0, 1, 1], [], []>} : vector<8x128xf32>, vector<128x512xf32>, vector<8x512xf32> -> vector<8x512xf32>
    %584 = arith.addf %579, %583 : vector<8x512xf32>
    %585 = vector.extract_strided_slice %584 {offsets = [0, 0], sizes = [8, 128], strides = [1, 1]} : vector<8x512xf32> to vector<8x128xf32>
    %586 = arith.negf %585 : vector<8x128xf32>
    %587 = math.exp %586 : vector<8x128xf32>
    %cst_358 = arith.constant 1.000000e+00 : f32
    %588 = vector.broadcast %cst_358 : f32 to vector<8x128xf32>
    %589 = arith.addf %588, %587 : vector<8x128xf32>
    %590 = arith.divf %588, %589 : vector<8x128xf32>
    %591 = vector.extract_strided_slice %584 {offsets = [0, 128], sizes = [8, 128], strides = [1, 1]} : vector<8x512xf32> to vector<8x128xf32>
    %592 = arith.negf %591 : vector<8x128xf32>
    %593 = math.exp %592 : vector<8x128xf32>
    %cst_359 = arith.constant 1.000000e+00 : f32
    %594 = vector.broadcast %cst_359 : f32 to vector<8x128xf32>
    %595 = arith.addf %594, %593 : vector<8x128xf32>
    %596 = arith.divf %594, %595 : vector<8x128xf32>
    %597 = vector.extract_strided_slice %584 {offsets = [0, 256], sizes = [8, 128], strides = [1, 1]} : vector<8x512xf32> to vector<8x128xf32>
    %598 = math.tanh %597 : vector<8x128xf32>
    %599 = vector.extract_strided_slice %584 {offsets = [0, 384], sizes = [8, 128], strides = [1, 1]} : vector<8x512xf32> to vector<8x128xf32>
    %600 = arith.negf %599 : vector<8x128xf32>
    %601 = math.exp %600 : vector<8x128xf32>
    %cst_360 = arith.constant 1.000000e+00 : f32
    %602 = vector.broadcast %cst_360 : f32 to vector<8x128xf32>
    %603 = arith.addf %602, %601 : vector<8x128xf32>
    %604 = arith.divf %602, %603 : vector<8x128xf32>
    %c0_361 = arith.constant 0 : index
    %c0_362 = arith.constant 0 : index
    %605 = vector.load %arg17[%c0_361, %c0_362] : memref<8x128xf32, #tpu.memory_space<vmem>>, vector<8x128xf32>
    %606 = arith.mulf %596, %605 : vector<8x128xf32>
    %607 = arith.mulf %590, %598 : vector<8x128xf32>
    %608 = arith.addf %606, %607 : vector<8x128xf32>
    %609 = math.tanh %608 : vector<8x128xf32>
    %610 = arith.mulf %604, %609 : vector<8x128xf32>
    %c0_363 = arith.constant 0 : index
    %c0_364 = arith.constant 0 : index
    %611 = vector.load %arg17[%c0_363, %c0_364] : memref<8x128xf32, #tpu.memory_space<vmem>>, vector<8x128xf32>
    tpu.vector_store %arg17[%c0_363, %c0_364], %608 {strides = array<i32>} : memref<8x128xf32, #tpu.memory_space<vmem>>, vector<8x128xf32>,
    %c0_365 = arith.constant 0 : index
    %c0_366 = arith.constant 0 : index
    %612 = vector.load %arg16[%c0_365, %c0_366] : memref<8x128xf32, #tpu.memory_space<vmem>>, vector<8x128xf32>
    tpu.vector_store %arg16[%c0_365, %c0_366], %610 {strides = array<i32>} : memref<8x128xf32, #tpu.memory_space<vmem>>, vector<8x128xf32>,
    %c6_367 = arith.constant 6 : index
    %c0_368 = arith.constant 0 : index
    %c0_369 = arith.constant 0 : index
    %613 = vector.load %arg15[%c6_367, %c0_368, %c0_369] : memref<8x8x128xf32, #tpu.memory_space<vmem>>, vector<1x8x128xf32>
    %614 = vector.shape_cast %613 : vector<1x8x128xf32> to vector<8x128xf32>
    %615 = vector.shape_cast %610 : vector<8x128xf32> to vector<1x8x128xf32>
    tpu.vector_store %arg15[%c6_367, %c0_368, %c0_369], %615 {strides = array<i32>} : memref<8x8x128xf32, #tpu.memory_space<vmem>>, vector<1x8x128xf32>,
    %c7_370 = arith.constant 7 : index
    %c0_371 = arith.constant 0 : index
    %c0_372 = arith.constant 0 : index
    %616 = vector.load %arg18[%c7_370, %c0_371, %c0_372] : memref<8x8x512xf32, #tpu.memory_space<vmem>>, vector<1x8x512xf32>
    %617 = vector.shape_cast %616 : vector<1x8x512xf32> to vector<8x512xf32>
    %c0_373 = arith.constant 0 : index
    %c0_374 = arith.constant 0 : index
    %618 = vector.load %arg16[%c0_373, %c0_374] : memref<8x128xf32, #tpu.memory_space<vmem>>, vector<8x128xf32>
    %c1_375 = arith.constant 1 : index
    %c0_376 = arith.constant 0 : index
    %c0_377 = arith.constant 0 : index
    %619 = vector.load %arg2[%c1_375, %c0_376, %c0_377] : memref<2x128x512xf32, #tpu.memory_space<vmem>>, vector<1x128x512xf32>
    %620 = vector.shape_cast %619 : vector<1x128x512xf32> to vector<128x512xf32>
    %cst_378 = arith.constant dense<0.000000e+00> : vector<8x512xf32>
    %621 = tpu.matmul %618, %620, %cst_378 {dimension_numbers = #tpu.dot_dimension_numbers<[1], [0], [0], [1], [0, 0, 1, 1], [], []>} : vector<8x128xf32>, vector<128x512xf32>, vector<8x512xf32> -> vector<8x512xf32>
    %622 = arith.addf %617, %621 : vector<8x512xf32>
    %623 = vector.extract_strided_slice %622 {offsets = [0, 0], sizes = [8, 128], strides = [1, 1]} : vector<8x512xf32> to vector<8x128xf32>
    %624 = arith.negf %623 : vector<8x128xf32>
    %625 = math.exp %624 : vector<8x128xf32>
    %cst_379 = arith.constant 1.000000e+00 : f32
    %626 = vector.broadcast %cst_379 : f32 to vector<8x128xf32>
    %627 = arith.addf %626, %625 : vector<8x128xf32>
    %628 = arith.divf %626, %627 : vector<8x128xf32>
    %629 = vector.extract_strided_slice %622 {offsets = [0, 128], sizes = [8, 128], strides = [1, 1]} : vector<8x512xf32> to vector<8x128xf32>
    %630 = arith.negf %629 : vector<8x128xf32>
    %631 = math.exp %630 : vector<8x128xf32>
    %cst_380 = arith.constant 1.000000e+00 : f32
    %632 = vector.broadcast %cst_380 : f32 to vector<8x128xf32>
    %633 = arith.addf %632, %631 : vector<8x128xf32>
    %634 = arith.divf %632, %633 : vector<8x128xf32>
    %635 = vector.extract_strided_slice %622 {offsets = [0, 256], sizes = [8, 128], strides = [1, 1]} : vector<8x512xf32> to vector<8x128xf32>
    %636 = math.tanh %635 : vector<8x128xf32>
    %637 = vector.extract_strided_slice %622 {offsets = [0, 384], sizes = [8, 128], strides = [1, 1]} : vector<8x512xf32> to vector<8x128xf32>
    %638 = arith.negf %637 : vector<8x128xf32>
    %639 = math.exp %638 : vector<8x128xf32>
    %cst_381 = arith.constant 1.000000e+00 : f32
    %640 = vector.broadcast %cst_381 : f32 to vector<8x128xf32>
    %641 = arith.addf %640, %639 : vector<8x128xf32>
    %642 = arith.divf %640, %641 : vector<8x128xf32>
    %c0_382 = arith.constant 0 : index
    %c0_383 = arith.constant 0 : index
    %643 = vector.load %arg17[%c0_382, %c0_383] : memref<8x128xf32, #tpu.memory_space<vmem>>, vector<8x128xf32>
    %644 = arith.mulf %634, %643 : vector<8x128xf32>
    %645 = arith.mulf %628, %636 : vector<8x128xf32>
    %646 = arith.addf %644, %645 : vector<8x128xf32>
    %647 = math.tanh %646 : vector<8x128xf32>
    %648 = arith.mulf %642, %647 : vector<8x128xf32>
    %c0_384 = arith.constant 0 : index
    %c0_385 = arith.constant 0 : index
    %649 = vector.load %arg17[%c0_384, %c0_385] : memref<8x128xf32, #tpu.memory_space<vmem>>, vector<8x128xf32>
    tpu.vector_store %arg17[%c0_384, %c0_385], %646 {strides = array<i32>} : memref<8x128xf32, #tpu.memory_space<vmem>>, vector<8x128xf32>,
    %c0_386 = arith.constant 0 : index
    %c0_387 = arith.constant 0 : index
    %650 = vector.load %arg16[%c0_386, %c0_387] : memref<8x128xf32, #tpu.memory_space<vmem>>, vector<8x128xf32>
    tpu.vector_store %arg16[%c0_386, %c0_387], %648 {strides = array<i32>} : memref<8x128xf32, #tpu.memory_space<vmem>>, vector<8x128xf32>,
    %c7_388 = arith.constant 7 : index
    %c0_389 = arith.constant 0 : index
    %c0_390 = arith.constant 0 : index
    %651 = vector.load %arg15[%c7_388, %c0_389, %c0_390] : memref<8x8x128xf32, #tpu.memory_space<vmem>>, vector<1x8x128xf32>
    %652 = vector.shape_cast %651 : vector<1x8x128xf32> to vector<8x128xf32>
    %653 = vector.shape_cast %648 : vector<8x128xf32> to vector<1x8x128xf32>
    tpu.vector_store %arg15[%c7_388, %c0_389, %c0_390], %653 {strides = array<i32>} : memref<8x8x128xf32, #tpu.memory_space<vmem>>, vector<1x8x128xf32>,
    %c0_391 = arith.constant 0 : index
    %c0_392 = arith.constant 0 : index
    %654 = vector.load %arg16[%c0_391, %c0_392] : memref<8x128xf32, #tpu.memory_space<vmem>>, vector<8x128xf32>
    %c1_393 = arith.constant 1 : index
    %c0_394 = arith.constant 0 : index
    %c0_395 = arith.constant 0 : index
    %655 = vector.load %arg13[%c1_393, %c0_394, %c0_395] : memref<2x8x128xf32, #tpu.memory_space<vmem>>, vector<1x8x128xf32>
    %656 = vector.shape_cast %655 : vector<1x8x128xf32> to vector<8x128xf32>
    %657 = vector.shape_cast %654 : vector<8x128xf32> to vector<1x8x128xf32>
    tpu.vector_store %arg13[%c1_393, %c0_394, %c0_395], %657 {strides = array<i32>} : memref<2x8x128xf32, #tpu.memory_space<vmem>>, vector<1x8x128xf32>,
    %c0_396 = arith.constant 0 : index
    %c0_397 = arith.constant 0 : index
    %658 = vector.load %arg17[%c0_396, %c0_397] : memref<8x128xf32, #tpu.memory_space<vmem>>, vector<8x128xf32>
    %c1_398 = arith.constant 1 : index
    %c0_399 = arith.constant 0 : index
    %c0_400 = arith.constant 0 : index
    %659 = vector.load %arg14[%c1_398, %c0_399, %c0_400] : memref<2x8x128xf32, #tpu.memory_space<vmem>>, vector<1x8x128xf32>
    %660 = vector.shape_cast %659 : vector<1x8x128xf32> to vector<8x128xf32>
    %661 = vector.shape_cast %658 : vector<8x128xf32> to vector<1x8x128xf32>
    tpu.vector_store %arg14[%c1_398, %c0_399, %c0_400], %661 {strides = array<i32>} : memref<2x8x128xf32, #tpu.memory_space<vmem>>, vector<1x8x128xf32>,
    %c0_401 = arith.constant 0 : index
    %c0_402 = arith.constant 0 : index
    %c0_403 = arith.constant 0 : index
    %662 = vector.load %arg15[%c0_401, %c0_402, %c0_403] : memref<8x8x128xf32, #tpu.memory_space<vmem>>, vector<8x8x128xf32>
    %663 = vector.shape_cast %662 : vector<8x8x128xf32> to vector<64x128xf32>
    %c0_404 = arith.constant 0 : index
    %c0_405 = arith.constant 0 : index
    %664 = vector.load %arg8[%c0_404, %c0_405] : memref<128x128xf32, #tpu.memory_space<vmem>>, vector<128x128xf32>
    %cst_406 = arith.constant dense<0.000000e+00> : vector<64x128xf32>
    %665 = tpu.matmul %663, %664, %cst_406 {dimension_numbers = #tpu.dot_dimension_numbers<[1], [0], [0], [1], [0, 0, 1, 1], [], []>} : vector<64x128xf32>, vector<128x128xf32>, vector<64x128xf32> -> vector<64x128xf32>
    %c0_407 = arith.constant 0 : index
    %c0_408 = arith.constant 0 : index
    %666 = vector.load %arg10[%c0_407, %c0_408] : memref<128x128xf32, #tpu.memory_space<vmem>>, vector<128x128xf32>
    %cst_409 = arith.constant dense<0.000000e+00> : vector<64x128xf32>
    %667 = tpu.matmul %663, %666, %cst_409 {dimension_numbers = #tpu.dot_dimension_numbers<[1], [0], [0], [1], [0, 0, 1, 1], [], []>} : vector<64x128xf32>, vector<128x128xf32>, vector<64x128xf32> -> vector<64x128xf32>
    %668 = tpu.iota {dimensions = array<i32: 0>} : vector<8x64xi32>
    %669 = tpu.iota {dimensions = array<i32: 1>} : vector<8x64xi32>
    %c8_i32 = arith.constant 8 : i32
    %670 = vector.broadcast %c8_i32 : i32 to vector<8x64xi32>
    %671 = arith.muli %668, %670 : vector<8x64xi32>
    %c0_i32 = arith.constant 0 : i32
    %672 = vector.broadcast %c0_i32 : i32 to vector<8x64xi32>
    %673 = arith.addi %671, %672 : vector<8x64xi32>
    %674 = arith.cmpi eq, %669, %673 : vector<8x64xi32>
    %675 = arith.extui %674 : vector<8x64xi1> to vector<8x64xi32>
    %676 = arith.sitofp %675 : vector<8x64xi32> to vector<8x64xf32>
    %cst_410 = arith.constant dense<0.000000e+00> : vector<8x128xf32>
    %677 = tpu.matmul %676, %665, %cst_410 {dimension_numbers = #tpu.dot_dimension_numbers<[1], [0], [0], [1], [0, 0, 1, 1], [], []>} : vector<8x64xf32>, vector<64x128xf32>, vector<8x128xf32> -> vector<8x128xf32>
    %cst_411 = arith.constant dense<0.000000e+00> : vector<8x128xf32>
    %678 = tpu.matmul %676, %667, %cst_411 {dimension_numbers = #tpu.dot_dimension_numbers<[1], [0], [0], [1], [0, 0, 1, 1], [], []>} : vector<8x64xf32>, vector<64x128xf32>, vector<8x128xf32> -> vector<8x128xf32>
    %c0_412 = arith.constant 0 : index
    %c0_413 = arith.constant 0 : index
    %c0_414 = arith.constant 0 : index
    %679 = vector.load %arg6[%c0_412, %c0_413, %c0_414] : memref<8x128x128xf32, #tpu.memory_space<vmem>>, vector<1x128x128xf32>
    %680 = vector.shape_cast %679 : vector<1x128x128xf32> to vector<128x128xf32>
    %c0_415 = arith.constant 0 : index
    %c0_416 = arith.constant 0 : index
    %c0_417 = arith.constant 0 : index
    %681 = vector.load %arg7[%c0_415, %c0_416, %c0_417] : memref<8x8x128xf32, #tpu.memory_space<vmem>>, vector<1x8x128xf32>
    %682 = vector.shape_cast %681 : vector<1x8x128xf32> to vector<8x128xf32>
    %cst_418 = arith.constant dense<0.000000e+00> : vector<8x128xf32>
    %683 = tpu.matmul %677, %680, %cst_418 {dimension_numbers = #tpu.dot_dimension_numbers<[1], [1], [0], [0], [0, 0, 1, 0], [], []>} : vector<8x128xf32>, vector<128x128xf32>, vector<8x128xf32> -> vector<8x128xf32>
    %cst_419 = arith.constant 5.000000e-01 : f32
    %684 = vector.broadcast %cst_419 : f32 to vector<8x128xf32>
    %685 = arith.cmpf ogt, %682, %684 : vector<8x128xf32>
    %cst_420 = arith.constant -1.000000e+30 : f32
    %686 = vector.broadcast %cst_420 : f32 to vector<8x128xf32>
    %687 = arith.select %685, %683, %686 : vector<8x128xi1>, vector<8x128xf32>
    %cst_421 = arith.constant dense<0xFF800000> : vector<8xf32>
    %688 = vector.multi_reduction <maximumf>, %687, %cst_421 [1] : vector<8x128xf32> to vector<8xf32>
    %689 = vector.shape_cast %688 : vector<8xf32> to vector<8x1xf32>
    %690 = vector.broadcast %689 : vector<8x1xf32> to vector<8x128xf32>
    %691 = arith.subf %687, %690 : vector<8x128xf32>
    %692 = math.exp %691 : vector<8x128xf32>
    %693 = arith.mulf %692, %682 : vector<8x128xf32>
    %cst_422 = arith.constant dense<0.000000e+00> : vector<8xf32>
    %694 = vector.multi_reduction <add>, %693, %cst_422 [1] : vector<8x128xf32> to vector<8xf32>
    %695 = vector.shape_cast %694 : vector<8xf32> to vector<8x1xf32>
    %696 = vector.broadcast %695 : vector<8x1xf32> to vector<8x128xf32>
    %697 = arith.divf %693, %696 : vector<8x128xf32>
    %cst_423 = arith.constant dense<0.000000e+00> : vector<8x128xf32>
    %698 = tpu.matmul %697, %680, %cst_423 {dimension_numbers = #tpu.dot_dimension_numbers<[1], [0], [0], [1], [0, 0, 1, 1], [], []>} : vector<8x128xf32>, vector<128x128xf32>, vector<8x128xf32> -> vector<8x128xf32>
    %c0_424 = arith.constant 0 : index
    %c0_425 = arith.constant 0 : index
    %699 = vector.load %arg9[%c0_424, %c0_425] : memref<128x128xf32, #tpu.memory_space<vmem>>, vector<128x128xf32>
    %cst_426 = arith.constant dense<0.000000e+00> : vector<8x128xf32>
    %700 = tpu.matmul %698, %699, %cst_426 {dimension_numbers = #tpu.dot_dimension_numbers<[1], [0], [0], [1], [0, 0, 1, 1], [], []>} : vector<8x128xf32>, vector<128x128xf32>, vector<8x128xf32> -> vector<8x128xf32>
    %701 = arith.addf %700, %678 : vector<8x128xf32>
    %702 = math.tanh %701 : vector<8x128xf32>
    %c0_427 = arith.constant 0 : index
    %c0_428 = arith.constant 0 : index
    %c0_429 = arith.constant 0 : index
    %703 = vector.load %arg11[%c0_427, %c0_428, %c0_429] : memref<8x8x128xf32, #tpu.memory_space<vmem>>, vector<1x8x128xf32>
    %704 = vector.shape_cast %703 : vector<1x8x128xf32> to vector<8x128xf32>
    %705 = vector.shape_cast %702 : vector<8x128xf32> to vector<1x8x128xf32>
    tpu.vector_store %arg11[%c0_427, %c0_428, %c0_429], %705 {strides = array<i32>} : memref<8x8x128xf32, #tpu.memory_space<vmem>>, vector<1x8x128xf32>,
    %c0_430 = arith.constant 0 : index
    %c0_431 = arith.constant 0 : index
    %c0_432 = arith.constant 0 : index
    %706 = vector.load %arg12[%c0_430, %c0_431, %c0_432] : memref<8x8x128xf32, #tpu.memory_space<vmem>>, vector<1x8x128xf32>
    %707 = vector.shape_cast %706 : vector<1x8x128xf32> to vector<8x128xf32>
    %708 = vector.shape_cast %697 : vector<8x128xf32> to vector<1x8x128xf32>
    tpu.vector_store %arg12[%c0_430, %c0_431, %c0_432], %708 {strides = array<i32>} : memref<8x8x128xf32, #tpu.memory_space<vmem>>, vector<1x8x128xf32>,
    %c8_i32_433 = arith.constant 8 : i32
    %709 = vector.broadcast %c8_i32_433 : i32 to vector<8x64xi32>
    %710 = arith.muli %668, %709 : vector<8x64xi32>
    %c1_i32 = arith.constant 1 : i32
    %711 = vector.broadcast %c1_i32 : i32 to vector<8x64xi32>
    %712 = arith.addi %710, %711 : vector<8x64xi32>
    %713 = arith.cmpi eq, %669, %712 : vector<8x64xi32>
    %714 = arith.extui %713 : vector<8x64xi1> to vector<8x64xi32>
    %715 = arith.sitofp %714 : vector<8x64xi32> to vector<8x64xf32>
    %cst_434 = arith.constant dense<0.000000e+00> : vector<8x128xf32>
    %716 = tpu.matmul %715, %665, %cst_434 {dimension_numbers = #tpu.dot_dimension_numbers<[1], [0], [0], [1], [0, 0, 1, 1], [], []>} : vector<8x64xf32>, vector<64x128xf32>, vector<8x128xf32> -> vector<8x128xf32>
    %cst_435 = arith.constant dense<0.000000e+00> : vector<8x128xf32>
    %717 = tpu.matmul %715, %667, %cst_435 {dimension_numbers = #tpu.dot_dimension_numbers<[1], [0], [0], [1], [0, 0, 1, 1], [], []>} : vector<8x64xf32>, vector<64x128xf32>, vector<8x128xf32> -> vector<8x128xf32>
    %c1_436 = arith.constant 1 : index
    %c0_437 = arith.constant 0 : index
    %c0_438 = arith.constant 0 : index
    %718 = vector.load %arg6[%c1_436, %c0_437, %c0_438] : memref<8x128x128xf32, #tpu.memory_space<vmem>>, vector<1x128x128xf32>
    %719 = vector.shape_cast %718 : vector<1x128x128xf32> to vector<128x128xf32>
    %c1_439 = arith.constant 1 : index
    %c0_440 = arith.constant 0 : index
    %c0_441 = arith.constant 0 : index
    %720 = vector.load %arg7[%c1_439, %c0_440, %c0_441] : memref<8x8x128xf32, #tpu.memory_space<vmem>>, vector<1x8x128xf32>
    %721 = vector.shape_cast %720 : vector<1x8x128xf32> to vector<8x128xf32>
    %cst_442 = arith.constant dense<0.000000e+00> : vector<8x128xf32>
    %722 = tpu.matmul %716, %719, %cst_442 {dimension_numbers = #tpu.dot_dimension_numbers<[1], [1], [0], [0], [0, 0, 1, 0], [], []>} : vector<8x128xf32>, vector<128x128xf32>, vector<8x128xf32> -> vector<8x128xf32>
    %cst_443 = arith.constant 5.000000e-01 : f32
    %723 = vector.broadcast %cst_443 : f32 to vector<8x128xf32>
    %724 = arith.cmpf ogt, %721, %723 : vector<8x128xf32>
    %cst_444 = arith.constant -1.000000e+30 : f32
    %725 = vector.broadcast %cst_444 : f32 to vector<8x128xf32>
    %726 = arith.select %724, %722, %725 : vector<8x128xi1>, vector<8x128xf32>
    %cst_445 = arith.constant dense<0xFF800000> : vector<8xf32>
    %727 = vector.multi_reduction <maximumf>, %726, %cst_445 [1] : vector<8x128xf32> to vector<8xf32>
    %728 = vector.shape_cast %727 : vector<8xf32> to vector<8x1xf32>
    %729 = vector.broadcast %728 : vector<8x1xf32> to vector<8x128xf32>
    %730 = arith.subf %726, %729 : vector<8x128xf32>
    %731 = math.exp %730 : vector<8x128xf32>
    %732 = arith.mulf %731, %721 : vector<8x128xf32>
    %cst_446 = arith.constant dense<0.000000e+00> : vector<8xf32>
    %733 = vector.multi_reduction <add>, %732, %cst_446 [1] : vector<8x128xf32> to vector<8xf32>
    %734 = vector.shape_cast %733 : vector<8xf32> to vector<8x1xf32>
    %735 = vector.broadcast %734 : vector<8x1xf32> to vector<8x128xf32>
    %736 = arith.divf %732, %735 : vector<8x128xf32>
    %cst_447 = arith.constant dense<0.000000e+00> : vector<8x128xf32>
    %737 = tpu.matmul %736, %719, %cst_447 {dimension_numbers = #tpu.dot_dimension_numbers<[1], [0], [0], [1], [0, 0, 1, 1], [], []>} : vector<8x128xf32>, vector<128x128xf32>, vector<8x128xf32> -> vector<8x128xf32>
    %c0_448 = arith.constant 0 : index
    %c0_449 = arith.constant 0 : index
    %738 = vector.load %arg9[%c0_448, %c0_449] : memref<128x128xf32, #tpu.memory_space<vmem>>, vector<128x128xf32>
    %cst_450 = arith.constant dense<0.000000e+00> : vector<8x128xf32>
    %739 = tpu.matmul %737, %738, %cst_450 {dimension_numbers = #tpu.dot_dimension_numbers<[1], [0], [0], [1], [0, 0, 1, 1], [], []>} : vector<8x128xf32>, vector<128x128xf32>, vector<8x128xf32> -> vector<8x128xf32>
    %740 = arith.addf %739, %717 : vector<8x128xf32>
    %741 = math.tanh %740 : vector<8x128xf32>
    %c1_451 = arith.constant 1 : index
    %c0_452 = arith.constant 0 : index
    %c0_453 = arith.constant 0 : index
    %742 = vector.load %arg11[%c1_451, %c0_452, %c0_453] : memref<8x8x128xf32, #tpu.memory_space<vmem>>, vector<1x8x128xf32>
    %743 = vector.shape_cast %742 : vector<1x8x128xf32> to vector<8x128xf32>
    %744 = vector.shape_cast %741 : vector<8x128xf32> to vector<1x8x128xf32>
    tpu.vector_store %arg11[%c1_451, %c0_452, %c0_453], %744 {strides = array<i32>} : memref<8x8x128xf32, #tpu.memory_space<vmem>>, vector<1x8x128xf32>,
    %c1_454 = arith.constant 1 : index
    %c0_455 = arith.constant 0 : index
    %c0_456 = arith.constant 0 : index
    %745 = vector.load %arg12[%c1_454, %c0_455, %c0_456] : memref<8x8x128xf32, #tpu.memory_space<vmem>>, vector<1x8x128xf32>
    %746 = vector.shape_cast %745 : vector<1x8x128xf32> to vector<8x128xf32>
    %747 = vector.shape_cast %736 : vector<8x128xf32> to vector<1x8x128xf32>
    tpu.vector_store %arg12[%c1_454, %c0_455, %c0_456], %747 {strides = array<i32>} : memref<8x8x128xf32, #tpu.memory_space<vmem>>, vector<1x8x128xf32>,
    return
  }
}

</mosaic_0001>

<bundles_post_ra>
// kernel: tpu_custom_call.1
= control target key start
LH: loop header
LB: loop body
LE: loop exit
PB: predicated region body
PF: predicated region fallthrough
CT: control target
= control target key end

     0   :  { %20 = vsyncpa [#allocation7], 0  ;;  %s10362_s0 = inlined_call_operand.hbm [shape: f32[8,8,128], index: 0, kind: input, shape index: {}]   ;;  %s10363_s1 = inlined_call_operand.hbm [shape: f32[2,128,512], index: 1, kind: input, shape index: {}]   ;;  %s10364_s2 = inlined_call_operand.hbm [shape: f32[2,128,512], index: 2, kind: input, shape index: {}]   ;;  %s10365_s3 = inlined_call_operand.hbm [shape: f32[2,1,512], index: 3, kind: input, shape index: {}]   ;;  %s10366_s4 = inlined_call_operand.hbm [shape: f32[2,8,128], index: 4, kind: input, shape index: {}]   ;;  %s10367_s5 = inlined_call_operand.vmem [shape: f32[2,8,128], index: 5, kind: input, shape index: {}]   ;;  %s10368_s6 = inlined_call_operand.hbm [shape: f32[8,128,128], index: 6, kind: input, shape index: {}]   ;;  %s10369_s7 = inlined_call_operand.hbm [shape: f32[8,8,128], index: 7, kind: input, shape index: {}]   ;;  %s10370_s8 = inlined_call_operand.hbm [shape: f32[128,128], index: 8, kind: input, shape index: {}]   ;;  %s10371_s9 = inlined_call_operand.hbm [shape: f32[128,128], index: 9, kind: input, shape index: {}]   ;;  %s10372_s10 = inlined_call_operand.hbm [shape: f32[128,128], index: 10, kind: input, shape index: {}]   ;;  %s10373_s11 = inlined_call_operand.hbm [shape: f32[8,8,128], index: 11, kind: output, shape index: {0}]   ;;  %s10374_s12 = inlined_call_operand.hbm [shape: f32[8,8,128], index: 12, kind: output, shape index: {1}]   ;;  %s10375_s13 = inlined_call_operand.hbm [shape: f32[2,8,128], index: 13, kind: output, shape index: {2}]   ;;  %s10376_s14 = inlined_call_operand.hbm [shape: f32[2,8,128], index: 14, kind: output, shape index: {3}]  }
   0x1   :  { %21 = vsyncpa [#allocation10], 0 }
   0x2   :  { %22 = vsyncpa [#allocation13], 0 }
   0x3   :  { %23 = vsyncpa [#allocation16], 0 }
   0x4   :  { %24 = vsyncpa [#allocation19], 0 }
   0x5   :  { %25 = vsyncpa [#allocation22], 0 }
   0x6   :  { %26 = vsyncpa [#allocation8], 0 }
   0x7   :  { %27 = vsyncpa [#allocation25], 0 }
   0x8   :  { %28 = vsyncpa [#allocation28], 0  ;;  %s8740_s29 = smov [#allocation9]   ;;  %s8414_s17 = scalar_lea.hbm %s10363_s1, 16384 }
   0x9   :  { %s46_s30 = sshll.u32 %s8740_s29, 4  ;;  %p8415_p0 = scmp.ne.s32.totalorder %s10363_s1, %s8414_s17  ;;  %s47_s30 = int_to_ptr.vmem [resolvable:$true] %s46_s30 }
   0xa   :  { %p8418_p1 = scmp.lt.u32.totalorder %s8414_s17, %s10363_s1 }
   0xc   :  { %p8420_p2 = pnand %p8418_p1, %p8415_p0 }
   0xe   :  { %8423 = shalt.err (!%p8420_p2)
}
   0xf   :  { %s8424_s22 = scalar_lea.vmem %s47_s30, 16384  ;;  %p8429_p4 = scmp.lt.s32.totalorder %s47_s30, %s47_s30 }
  0x10   :  { %p8425_p3 = scmp.ne.s32.totalorder %s47_s30, %s8424_s22  ;;  %p8430_p5 = scmp.lt.s32.totalorder %s8424_s22, %s8424_s22 }
  0x12   :  { %p8431_p6 = por %p8430_p5, %p8429_p4 }
  0x14   :  { %p8432_p7 = pnand %p8431_p6, %p8425_p3 }
  0x16   :  { %8435 = shalt.err (!%p8432_p7)
}
  0x17   :  { %s10377_s23 = smov 512   ;;  %s8742_s24 = smov 32  }
  0x18   :  { %52 = dma.hbm_to_vmem [thread:$0]  %s10363_s1, 16384, %s47_s30, [#allocation10], %s10377_s23, %s10377_s23, %s8742_s24  }
  0x19   :  { %s8743_s27 = smov [#allocation12]   ;;  %s8436_s16 = scalar_lea.hbm %s10365_s3, 128 }
  0x1a   :  { %s70_s28 = sshll.u32 %s8743_s27, 4  ;;  %p8437_p8 = scmp.ne.s32.totalorder %s10365_s3, %s8436_s16  ;;  %s71_s28 = int_to_ptr.vmem [resolvable:$true] %s70_s28 }
  0x1b   :  { %p8440_p9 = scmp.lt.u32.totalorder %s8436_s16, %s10365_s3 }
  0x1d   :  { %p8442_p10 = pnand %p8440_p9, %p8437_p8 }
  0x1f   :  { %8445 = shalt.err (!%p8442_p10)
}
  0x20   :  { %s8446_s21 = scalar_lea.vmem %s71_s28, 128  ;;  %p8451_p12 = scmp.lt.s32.totalorder %s71_s28, %s71_s28 }
  0x21   :  { %p8447_p11 = scmp.ne.s32.totalorder %s71_s28, %s8446_s21  ;;  %p8452_p13 = scmp.lt.s32.totalorder %s8446_s21, %s8446_s21 }
  0x23   :  { %p8453_p0 = por %p8452_p13, %p8451_p12 }
  0x25   :  { %p8454_p1 = pnand %p8453_p0, %p8447_p11 }
  0x27   :  { %8457 = shalt.err (!%p8454_p1)
}
  0x28   :  { %s8744_s1 = smov 64   ;;  %s8745_s30 = smov 4  }
  0x29   :  { %76 = dma.hbm_to_vmem [thread:$0]  %s10365_s3, 128, %s71_s28, [#allocation13], %s8744_s1, %s8744_s1, %s8745_s30  }
  0x2a   :  { %s8746_s26 = smov [#allocation15]   ;;  %s8747_s29 = smov [#allocation18]  }
  0x2b   :  { %s96_s27 = sshll.u32 %s8746_s26, 4  ;;  %s120_s15 = sshll.u32 %s8747_s29, 4  ;;  %s97_s27 = int_to_ptr.vmem [resolvable:$true] %s96_s27  ;;  %s8865_s15 = int_to_ptr.vmem [resolvable:$true] %s120_s15 }
  0x2c   :  { %s8458_s18 = scalar_lea.hbm %s10368_s6, 16384 }
  0x2d   :  { %p8459_p2 = scmp.ne.s32.totalorder %s10368_s6, %s8458_s18  ;;  %p8462_p3 = scmp.lt.u32.totalorder %s8458_s18, %s10368_s6 }
  0x2f   :  { %p8464_p4 = pnand %p8462_p3, %p8459_p2 }
  0x31   :  { %8467 = shalt.err (!%p8464_p4)
}
  0x32   :  { %s8468_s3 = scalar_lea.vmem %s97_s27, 16384  ;;  %p8473_p6 = scmp.lt.s32.totalorder %s97_s27, %s97_s27 }
  0x33   :  { %p8469_p5 = scmp.ne.s32.totalorder %s97_s27, %s8468_s3  ;;  %p8474_p7 = scmp.lt.s32.totalorder %s8468_s3, %s8468_s3 }
  0x35   :  { %p8475_p8 = por %p8474_p7, %p8473_p6 }
  0x37   :  { %p8476_p9 = pnand %p8475_p8, %p8469_p5 }
  0x39   :  { %8479 = shalt.err (!%p8476_p9)
}
  0x3a   :  { %s8748_s28 = smov 128   ;;  %s8749_s1 = smov 8  }
  0x3b   :  { %102 = dma.hbm_to_vmem [thread:$0]  %s10368_s6, 16384, %s97_s27, [#allocation16], %s8748_s28, %s8748_s28, %s8749_s1  }
  0x3c   :  { %s8480_s26 = scalar_lea.hbm %s10370_s8, 2048 }
  0x3d   :  { %p8481_p10 = scmp.ne.s32.totalorder %s10370_s8, %s8480_s26  ;;  %p8484_p11 = scmp.lt.u32.totalorder %s8480_s26, %s10370_s8 }
  0x3f   :  { %p8486_p12 = pnand %p8484_p11, %p8481_p10 }
  0x41   :  { %8489 = shalt.err (!%p8486_p12)
}
  0x42   :  { %s8490_s19 = scalar_lea.vmem %s8865_s15, 2048  ;;  %p8495_p0 = scmp.lt.s32.totalorder %s8865_s15, %s8865_s15 }
  0x43   :  { %p8491_p13 = scmp.ne.s32.totalorder %s8865_s15, %s8490_s19  ;;  %p8496_p1 = scmp.lt.s32.totalorder %s8490_s19, %s8490_s19 }
  0x45   :  { %p8497_p2 = por %p8496_p1, %p8495_p0 }
  0x47   :  { %p8498_p3 = pnand %p8497_p2, %p8491_p13 }
  0x49   :  { %8501 = shalt.err (!%p8498_p3)
}
  0x4a   :  { %126 = dma.hbm_to_vmem [thread:$0]  %s10370_s8, 2048, %s8865_s15, [#allocation19], %s8748_s28, %s8748_s28, %s8749_s1  }
  0x4b   :  { %s8750_s20 = smov [#allocation6]   ;;  %s8751_s3 = smov [#allocation11]  }
  0x4c   :  { %s34_s21 = sshll.u32 %s8750_s20, 4  ;;  %s58_s30 = sshll.u32 %s8751_s3, 4  ;;  %s35_s21 = int_to_ptr.vmem [resolvable:$true] %s34_s21  ;;  %s8902_s30 = int_to_ptr.vmem [resolvable:$true] %s58_s30 }
  0x4d   :  { %s8502_s25 = scalar_lea.hbm %s10362_s0, 1024 }
  0x4e   :  { %p8503_p4 = scmp.ne.s32.totalorder %s10362_s0, %s8502_s25  ;;  %p8506_p5 = scmp.lt.u32.totalorder %s8502_s25, %s10362_s0 }
  0x50   :  { %p8508_p6 = pnand %p8506_p5, %p8503_p4 }
  0x52   :  { %8511 = shalt.err (!%p8508_p6)
}
  0x53   :  { %s8512_s8 = scalar_lea.vmem %s35_s21, 1024  ;;  %p8517_p8 = scmp.lt.s32.totalorder %s35_s21, %s35_s21 }
  0x54   :  { %p8513_p7 = scmp.ne.s32.totalorder %s35_s21, %s8512_s8  ;;  %p8518_p9 = scmp.lt.s32.totalorder %s8512_s8, %s8512_s8 }
  0x56   :  { %p8519_p10 = por %p8518_p9, %p8517_p8 }
  0x58   :  { %p8520_p11 = pnand %p8519_p10, %p8513_p7 }
  0x5a   :  { %8523 = shalt.err (!%p8520_p11)
}
  0x5b   :  { %40 = dma.hbm_to_vmem [thread:$0]  %s10362_s0, 1024, %s35_s21, [#allocation7], %s8748_s28, %s8748_s28, %s8749_s1  }
  0x5c   :  { %s8524_s27 = scalar_lea.hbm %s10364_s2, 16384 }
  0x5d   :  { %p8525_p12 = scmp.ne.s32.totalorder %s10364_s2, %s8524_s27  ;;  %p8528_p13 = scmp.lt.u32.totalorder %s8524_s27, %s10364_s2 }
  0x5f   :  { %p8530_p0 = pnand %p8528_p13, %p8525_p12 }
  0x61   :  { %8533 = shalt.err (!%p8530_p0)
}
  0x62   :  { %s8534_s25 = scalar_lea.vmem %s8902_s30, 16384  ;;  %p8539_p2 = scmp.lt.s32.totalorder %s8902_s30, %s8902_s30 }
  0x63   :  { %p8535_p1 = scmp.ne.s32.totalorder %s8902_s30, %s8534_s25  ;;  %p8540_p3 = scmp.lt.s32.totalorder %s8534_s25, %s8534_s25 }
  0x65   :  { %p8541_p4 = por %p8540_p3, %p8539_p2 }
  0x67   :  { %p8542_p5 = pnand %p8541_p4, %p8535_p1 }
  0x69   :  { %8545 = shalt.err (!%p8542_p5)
}
  0x6a   :  { %s10378_s0 = smov 512   ;;  %s8752_s29 = smov [#allocation14]  }
  0x6b   :  { %64 = dma.hbm_to_vmem [thread:$0]  %s10364_s2, 16384, %s8902_s30, [#allocation10], %s10378_s0, %s10378_s0, %s8742_s24  }
  0x6c   :  { %s82_s16 = sshll.u32 %s8752_s29, 4  ;;  %s8753_s17 = smov [#allocation17]   ;;  %s83_s16 = int_to_ptr.vmem [resolvable:$true] %s82_s16 }
  0x6d   :  { %s108_s8 = sshll.u32 %s8753_s17, 4  ;;  %s8546_s19 = scalar_lea.hbm %s10366_s4, 256  ;;  %s8939_s8 = int_to_ptr.vmem [resolvable:$true] %s108_s8 }
  0x6e   :  { %p8547_p6 = scmp.ne.s32.totalorder %s10366_s4, %s8546_s19  ;;  %p8550_p7 = scmp.lt.u32.totalorder %s8546_s19, %s10366_s4 }
  0x70   :  { %p8552_p8 = pnand %p8550_p7, %p8547_p6 }
  0x72   :  { %8555 = shalt.err (!%p8552_p8)
}
  0x73   :  { %s8556_s2 = scalar_lea.vmem %s83_s16, 256  ;;  %p8561_p10 = scmp.lt.s32.totalorder %s83_s16, %s83_s16 }
  0x74   :  { %p8557_p9 = scmp.ne.s32.totalorder %s83_s16, %s8556_s2  ;;  %p8562_p11 = scmp.lt.s32.totalorder %s8556_s2, %s8556_s2 }
  0x76   :  { %p8563_p12 = por %p8562_p11, %p8561_p10 }
  0x78   :  { %p8564_p13 = pnand %p8563_p12, %p8557_p9 }
  0x7a   :  { %8567 = shalt.err (!%p8564_p13)
}
  0x7b   :  { %88 = dma.hbm_to_vmem [thread:$0]  %s10366_s4, 256, %s83_s16, [#allocation13], %s8748_s28, %s8748_s28, %s8749_s1  }
  0x7c   :  { %s8568_s25 = scalar_lea.hbm %s10369_s7, 1024 }
  0x7d   :  { %p8569_p0 = scmp.ne.s32.totalorder %s10369_s7, %s8568_s25  ;;  %p8572_p1 = scmp.lt.u32.totalorder %s8568_s25, %s10369_s7 }
  0x7f   :  { %p8574_p2 = pnand %p8572_p1, %p8569_p0 }
  0x81   :  { %8577 = shalt.err (!%p8574_p2)
}
  0x82   :  { %s8578_s17 = scalar_lea.vmem %s8939_s8, 1024  ;;  %p8583_p4 = scmp.lt.s32.totalorder %s8939_s8, %s8939_s8 }
  0x83   :  { %p8579_p3 = scmp.ne.s32.totalorder %s8939_s8, %s8578_s17  ;;  %p8584_p5 = scmp.lt.s32.totalorder %s8578_s17, %s8578_s17 }
  0x85   :  { %p8585_p6 = por %p8584_p5, %p8583_p4 }
  0x87   :  { %p8586_p7 = pnand %p8585_p6, %p8579_p3 }
  0x89   :  { %8589 = shalt.err (!%p8586_p7)
}
  0x8a   :  { %114 = dma.hbm_to_vmem [thread:$0]  %s10369_s7, 1024, %s8939_s8, [#allocation16], %s8748_s28, %s8748_s28, %s8749_s1  }
  0x8b   :  { %s8754_s15 = smov [#allocation20]   ;;  %s8755_s19 = smov [#allocation21]  }
  0x8c   :  { %s132_s18 = sshll.u32 %s8754_s15, 4  ;;  %s144_s6 = sshll.u32 %s8755_s19, 4  ;;  %s133_s18 = int_to_ptr.vmem [resolvable:$true] %s132_s18  ;;  %s8976_s6 = int_to_ptr.vmem [resolvable:$true] %s144_s6 }
  0x8d   :  { %s8590_s3 = scalar_lea.hbm %s10371_s9, 2048 }
  0x8e   :  { %p8591_p8 = scmp.ne.s32.totalorder %s10371_s9, %s8590_s3  ;;  %p8594_p9 = scmp.lt.u32.totalorder %s8590_s3, %s10371_s9 }
  0x90   :  { %p8596_p10 = pnand %p8594_p9, %p8591_p8 }
  0x92   :  { %8599 = shalt.err (!%p8596_p10)
}
  0x93   :  { %s8600_s7 = scalar_lea.vmem %s133_s18, 2048  ;;  %p8605_p12 = scmp.lt.s32.totalorder %s133_s18, %s133_s18 }
  0x94   :  { %p8601_p11 = scmp.ne.s32.totalorder %s133_s18, %s8600_s7  ;;  %p8606_p13 = scmp.lt.s32.totalorder %s8600_s7, %s8600_s7 }
  0x96   :  { %p8607_p0 = por %p8606_p13, %p8605_p12 }
  0x98   :  { %p8608_p1 = pnand %p8607_p0, %p8601_p11 }
  0x9a   :  { %8611 = shalt.err (!%p8608_p1)
}
  0x9b   :  { %138 = dma.hbm_to_vmem [thread:$0]  %s10371_s9, 2048, %s133_s18, [#allocation19], %s8748_s28, %s8748_s28, %s8749_s1  }
  0x9c   :  { %s8612_s21 = scalar_lea.hbm %s10372_s10, 2048 }
  0x9d   :  { %p8613_p2 = scmp.ne.s32.totalorder %s10372_s10, %s8612_s21  ;;  %p8616_p3 = scmp.lt.u32.totalorder %s8612_s21, %s10372_s10 }
  0x9f   :  { %p8618_p4 = pnand %p8616_p3, %p8613_p2 }
  0xa1   :  { %8621 = shalt.err (!%p8618_p4)
}
  0xa2   :  { %s8622_s16 = scalar_lea.vmem %s8976_s6, 2048  ;;  %p8627_p6 = scmp.lt.s32.totalorder %s8976_s6, %s8976_s6 }
  0xa3   :  { %p8623_p5 = scmp.ne.s32.totalorder %s8976_s6, %s8622_s16  ;;  %p8628_p7 = scmp.lt.s32.totalorder %s8622_s16, %s8622_s16 }
  0xa5   :  { %p8629_p8 = por %p8628_p7, %p8627_p6 }
  0xa7   :  { %p8630_p9 = pnand %p8629_p8, %p8623_p5 }
  0xa9   :  { %8633 = shalt.err (!%p8630_p9)
}
  0xaa   :  { %150 = dma.hbm_to_vmem [thread:$0]  %s10372_s10, 2048, %s8976_s6, [#allocation22], %s8748_s28, %s8748_s28, %s8749_s1  }
  0xab   :  { %8722 = dma.done.wait [#allocation7], 1024  }
  0xac   :  { %8723 = vsyncadd [#allocation7], 4294966272 }
  0xad   :  { %8724 = dma.done.wait [#allocation10], 32768  }
  0xae   :  { %8725 = vsyncadd [#allocation10], 4294934528 }
  0xaf   :  { %8726 = dma.done.wait [#allocation13], 384  }
  0xb0   :  { %8727 = vsyncadd [#allocation13], 4294966912 }
  0xb1   :  { %8728 = dma.done.wait [#allocation16], 17408  }
  0xb2   :  { %8729 = vsyncadd [#allocation16], 4294949888 }
  0xb3   :  { %8730 = dma.done.wait [#allocation19], 4096  }
  0xb4   :  { %8731 = vsyncadd [#allocation19], 4294963200 }
  0xb5   :  { %8732 = dma.done.wait [#allocation22], 2048  }
  0xb6   :  { %8733 = vsyncadd [#allocation22], 4294965248  ;;  %v8756_v0 = vmov 0.0   ;;  %v206_v1 = vld [vmem:[#allocation9 + $0x8] sm:$0xff]  ;;  %v208_v3 = vld [vmem:[#allocation9 + $0x18] sm:$0xff]  ;;  %vm8758_vm0 = vmmov 0  }
  0xb7   :  { %355 = vmatprep.mubr.f32.mxu0 %v8756_v0  ;;  %183 = vst [vmem:[#allocation23 + $0x10] sm:$0xff] %v8756_v0  ;;  %184 = vst [vmem:[#allocation23 + $0x18] sm:$0xff] %v8756_v0  ;;  %468 = vmatprep.mubr.f32.mxu1 %v8756_v0  ;;  %v210_v2 = vld [vmem:[#allocation9 + $0x28] sm:$0xff]  ;;  %v212_v5 = vld [vmem:[#allocation9 + $0x38] sm:$0xff]  ;;  %vm5084_vm2 = vcmask 523264  }
  0xb8   :  { %185 = vst [vmem:[#allocation23 + $0x20] sm:$0xff] %v8756_v0  ;;  %186 = vst [vmem:[#allocation23 + $0x28] sm:$0xff] %v8756_v0  ;;  %v6579_v4 = vpack.c.bf16 %v210_v2, %v206_v1  ;;  %v205_v6 = vld [vmem:[#allocation9] sm:$0xff]  ;;  %v6611_v8 = vpack.c.bf16 %v212_v5, %v208_v3  ;;  %v207_v10 = vld [vmem:[#allocation9 + $0x10] sm:$0xff] }
  0xb9   :  { %187 = vst [vmem:[#allocation23 + $0x30] sm:$0xff] %v8756_v0  ;;  %188 = vst [vmem:[#allocation23 + $0x38] sm:$0xff] %v8756_v0  ;;  %v209_v7 = vld [vmem:[#allocation9 + $0x20] sm:$0xff]  ;;  %v211_v11 = vld [vmem:[#allocation9 + $0x30] sm:$0xff] }
  0xba   :  { %191 = vst [vmem:[#allocation24 + $0x10] sm:$0xff] %v8756_v0  ;;  %192 = vst [vmem:[#allocation24 + $0x18] sm:$0xff] %v8756_v0  ;;  %v6581_v9 = vpack.c.bf16 %v209_v7, %v205_v6  ;;  %v214_v12 = vld [vmem:[#allocation9 + $0x48] sm:$0xff]  ;;  %6580 = vmatprep.subr.bf16.mxu0 %v6579_v4  ;;  %v6613_v13 = vpack.c.bf16 %v211_v11, %v207_v10  ;;  %v216_v15 = vld [vmem:[#allocation9 + $0x58] sm:$0xff]  ;;  %6612 = vmatprep.subr.bf16.mxu1 %v6611_v8 }
  0xbb   :  { %193 = vst [vmem:[#allocation24 + $0x20] sm:$0xff] %v8756_v0  ;;  %194 = vst [vmem:[#allocation24 + $0x28] sm:$0xff] %v8756_v0  ;;  %v218_v14 = vld [vmem:[#allocation9 + $0x68] sm:$0xff]  ;;  %v220_v16 = vld [vmem:[#allocation9 + $0x78] sm:$0xff] }
  0xbc   :  { %195 = vst [vmem:[#allocation24 + $0x30] sm:$0xff] %v8756_v0  ;;  %196 = vst [vmem:[#allocation24 + $0x38] sm:$0xff] %v8756_v0  ;;  %6582 = vmatpush1.bf16.msra.mxu0 %v6581_v9  ;;  %v6583_v17 = vpack.c.bf16 %v218_v14, %v214_v12  ;;  %v6615_v18 = vpack.c.bf16 %v220_v16, %v216_v15  ;;  %v213_v19 = vld [vmem:[#allocation9 + $0x40] sm:$0xff]  ;;  %v215_v21 = vld [vmem:[#allocation9 + $0x50] sm:$0xff]  ;;  %6614 = vmatpush1.bf16.msra.mxu1 %v6613_v13 }
  0xbd   :  { %v217_v20 = vld [vmem:[#allocation9 + $0x60] sm:$0xff]  ;;  %v219_v23 = vld [vmem:[#allocation9 + $0x70] sm:$0xff]  ;;  %v222_v24 = vld [vmem:[#allocation9 + $0x88] sm:$0xff] }
  0xbe   :  { %v6585_v22 = vpack.c.bf16 %v217_v20, %v213_v19  ;;  %v226_v25 = vld [vmem:[#allocation9 + $0xa8] sm:$0xff]  ;;  %6584 = vmatprep.subr.bf16.mxu0 %v6583_v17  ;;  %6616 = vmatprep.subr.bf16.mxu1 %v6615_v18  ;;  %v6617_v26 = vpack.c.bf16 %v219_v23, %v215_v21  ;;  %v224_v28 = vld [vmem:[#allocation9 + $0x98] sm:$0xff]  ;;  %v221_v30 = vld [vmem:[#allocation9 + $0x80] sm:$0xff] }
  0xbf   :  { %v6587_v27 = vpack.c.bf16 %v226_v25, %v222_v24  ;;  %v228_v29 = vld [vmem:[#allocation9 + $0xb8] sm:$0xff]  ;;  %v225_v32 = vld [vmem:[#allocation9 + $0xa0] sm:$0xff]  ;;  %v223_v33 = vld [vmem:[#allocation9 + $0x90] sm:$0xff] }
  0xc0   :  { %v6619_v31 = vpack.c.bf16 %v228_v29, %v224_v28  ;;  %v227_v34 = vld [vmem:[#allocation9 + $0xb0] sm:$0xff]  ;;  %6586 = vmatpush1.bf16.msra.mxu0 %v6585_v22  ;;  %v6589_v35 = vpack.c.bf16 %v225_v32, %v221_v30  ;;  %v230_v36 = vld [vmem:[#allocation9 + $0xc8] sm:$0xff]  ;;  %v232_v38 = vld [vmem:[#allocation9 + $0xd8] sm:$0xff]  ;;  %6618 = vmatpush1.bf16.msra.mxu1 %v6617_v26 }
  0xc1   :  { %v234_v37 = vld [vmem:[#allocation9 + $0xe8] sm:$0xff]  ;;  %6588 = vmatprep.subr.bf16.mxu0 %v6587_v27  ;;  %v6621_v39 = vpack.c.bf16 %v227_v34, %v223_v33  ;;  %v236_v41 = vld [vmem:[#allocation9 + $0xf8] sm:$0xff]  ;;  %v229_v42 = vld [vmem:[#allocation9 + $0xc0] sm:$0xff] }
  0xc2   :  { %v6591_v40 = vpack.c.bf16 %v234_v37, %v230_v36  ;;  %v233_v43 = vld [vmem:[#allocation9 + $0xe0] sm:$0xff]  ;;  %6620 = vmatprep.subr.bf16.mxu1 %v6619_v31  ;;  %v6623_v44 = vpack.c.bf16 %v236_v41, %v232_v38  ;;  %v231_v45 = vld [vmem:[#allocation9 + $0xd0] sm:$0xff]  ;;  %v238_v47 = vld [vmem:[#allocation9 + $0x108] sm:$0xff] }
  0xc3   :  { %v235_v46 = vld [vmem:[#allocation9 + $0xf0] sm:$0xff]  ;;  %v242_v48 = vld [vmem:[#allocation9 + $0x128] sm:$0xff]  ;;  %v240_v49 = vld [vmem:[#allocation9 + $0x118] sm:$0xff]  ;;  %v6593_v51 = vpack.c.bf16 %v233_v43, %v229_v42 }
  0xc4   :  { %v244_v50 = vld [vmem:[#allocation9 + $0x138] sm:$0xff]  ;;  %6590 = vmatpush1.bf16.msra.mxu0 %v6589_v35  ;;  %6622 = vmatpush1.bf16.msra.mxu1 %v6621_v39  ;;  %v6625_v52 = vpack.c.bf16 %v235_v46, %v231_v45  ;;  %v6595_v53 = vpack.c.bf16 %v242_v48, %v238_v47  ;;  %v237_v54 = vld [vmem:[#allocation9 + $0x100] sm:$0xff]  ;;  %v239_v56 = vld [vmem:[#allocation9 + $0x110] sm:$0xff] }
  0xc5   :  { %6592 = vmatprep.subr.bf16.mxu0 %v6591_v40  ;;  %v241_v55 = vld [vmem:[#allocation9 + $0x120] sm:$0xff]  ;;  %6624 = vmatprep.subr.bf16.mxu1 %v6623_v44  ;;  %v6627_v57 = vpack.c.bf16 %v244_v50, %v240_v49  ;;  %v243_v58 = vld [vmem:[#allocation9 + $0x130] sm:$0xff]  ;;  %v246_v59 = vld [vmem:[#allocation9 + $0x148] sm:$0xff] }
  0xc6   :  { %v250_v60 = vld [vmem:[#allocation9 + $0x168] sm:$0xff]  ;;  %v248_v61 = vld [vmem:[#allocation9 + $0x158] sm:$0xff]  ;;  %v6597_v63 = vpack.c.bf16 %v241_v55, %v237_v54  ;;  %v6629_v1 = vpack.c.bf16 %v243_v58, %v239_v56  ;;  %v245_v3 = vld [vmem:[#allocation9 + $0x140] sm:$0xff] }
  0xc7   :  { %v252_v62 = vld [vmem:[#allocation9 + $0x178] sm:$0xff]  ;;  %v6599_v2 = vpack.c.bf16 %v250_v60, %v246_v59  ;;  %v249_v4 = vld [vmem:[#allocation9 + $0x160] sm:$0xff]  ;;  %v247_v5 = vld [vmem:[#allocation9 + $0x150] sm:$0xff] }
  0xc8   :  { %6594 = vmatpush1.bf16.msra.mxu0 %v6593_v51  ;;  %6626 = vmatpush1.bf16.msra.mxu1 %v6625_v52  ;;  %v6631_v6 = vpack.c.bf16 %v252_v62, %v248_v61  ;;  %v251_v7 = vld [vmem:[#allocation9 + $0x170] sm:$0xff]  ;;  %v254_v8 = vld [vmem:[#allocation9 + $0x188] sm:$0xff]  ;;  %v256_v10 = vld [vmem:[#allocation9 + $0x198] sm:$0xff]  ;;  %v6601_v12 = vpack.c.bf16 %v249_v4, %v245_v3 }
  0xc9   :  { %6596 = vmatprep.subr.bf16.mxu0 %v6595_v53  ;;  %6628 = vmatprep.subr.bf16.mxu1 %v6627_v57  ;;  %v258_v9 = vld [vmem:[#allocation9 + $0x1a8] sm:$0xff]  ;;  %v260_v11 = vld [vmem:[#allocation9 + $0x1b8] sm:$0xff]  ;;  %v6633_v13 = vpack.c.bf16 %v251_v7, %v247_v5  ;;  %v253_v15 = vld [vmem:[#allocation9 + $0x180] sm:$0xff] }
  0xca   :  { %v6603_v14 = vpack.c.bf16 %v258_v9, %v254_v8  ;;  %v257_v16 = vld [vmem:[#allocation9 + $0x1a0] sm:$0xff]  ;;  %v255_v17 = vld [vmem:[#allocation9 + $0x190] sm:$0xff]  ;;  %v6635_v18 = vpack.c.bf16 %v260_v11, %v256_v10  ;;  %v262_v20 = vld [vmem:[#allocation9 + $0x1c8] sm:$0xff] }
  0xcb   :  { %v259_v19 = vld [vmem:[#allocation9 + $0x1b0] sm:$0xff]  ;;  %v266_v21 = vld [vmem:[#allocation9 + $0x1e8] sm:$0xff]  ;;  %v264_v22 = vld [vmem:[#allocation9 + $0x1d8] sm:$0xff]  ;;  %v6605_v24 = vpack.c.bf16 %v257_v16, %v253_v15 }
  0xcc   :  { %6598 = vmatpush1.bf16.msra.mxu0 %v6597_v63  ;;  %6630 = vmatpush1.bf16.msra.mxu1 %v6629_v1  ;;  %v268_v23 = vld [vmem:[#allocation9 + $0x1f8] sm:$0xff]  ;;  %v6637_v25 = vpack.c.bf16 %v259_v19, %v255_v17  ;;  %v6607_v26 = vpack.c.bf16 %v266_v21, %v262_v20  ;;  %v261_v27 = vld [vmem:[#allocation9 + $0x1c0] sm:$0xff]  ;;  %v263_v29 = vld [vmem:[#allocation9 + $0x1d0] sm:$0xff] }
  0xcd   :  { %6600 = vmatprep.subr.bf16.mxu0 %v6599_v2  ;;  %6632 = vmatprep.subr.bf16.mxu1 %v6631_v6  ;;  %v265_v28 = vld [vmem:[#allocation9 + $0x1e0] sm:$0xff]  ;;  %v6639_v30 = vpack.c.bf16 %v268_v23, %v264_v22  ;;  %v267_v31 = vld [vmem:[#allocation9 + $0x1f0] sm:$0xff]  ;;  %v559_v32 = vld [vmem:[#allocation11 + $0x8] sm:$0xff] }
  0xce   :  { %v563_v33 = vld [vmem:[#allocation11 + $0x28] sm:$0xff]  ;;  %v561_v34 = vld [vmem:[#allocation11 + $0x18] sm:$0xff]  ;;  %v6609_v36 = vpack.c.bf16 %v265_v28, %v261_v27  ;;  %v6641_v37 = vpack.c.bf16 %v267_v31, %v263_v29  ;;  %v558_v39 = vld [vmem:[#allocation11] sm:$0xff] }
  0xcf   :  { %v565_v35 = vld [vmem:[#allocation11 + $0x38] sm:$0xff]  ;;  %v9027_v38 = vpack.c.bf16 %v563_v33, %v559_v32  ;;  %v562_v40 = vld [vmem:[#allocation11 + $0x20] sm:$0xff]  ;;  %v560_v42 = vld [vmem:[#allocation11 + $0x10] sm:$0xff] }
  0xd0   :  { %6602 = vmatpush1.bf16.msra.mxu0 %v6601_v12  ;;  %6634 = vmatpush1.bf16.msra.mxu1 %v6633_v13  ;;  %v9029_v41 = vpack.c.bf16 %v565_v35, %v561_v34  ;;  %v564_v43 = vld [vmem:[#allocation11 + $0x30] sm:$0xff]  ;;  %v567_v44 = vld [vmem:[#allocation11 + $0x48] sm:$0xff]  ;;  %v197_v46 = vld [vmem:[#allocation6] sm:$0xff]  ;;  %v9031_v47 = vpack.c.bf16 %v562_v40, %v558_v39 }
  0xd1   :  { %6604 = vmatprep.subr.bf16.mxu0 %v6603_v14  ;;  %6636 = vmatprep.subr.bf16.mxu1 %v6635_v18  ;;  %v571_v45 = vld [vmem:[#allocation11 + $0x68] sm:$0xff]  ;;  %v569_v48 = vld [vmem:[#allocation11 + $0x58] sm:$0xff]  ;;  %v9034_v50 = vpack.c.bf16 %v564_v43, %v560_v42  ;;  %v566_v51 = vld [vmem:[#allocation11 + $0x40] sm:$0xff] }
  0xd2   :  { %v573_v49 = vld [vmem:[#allocation11 + $0x78] sm:$0xff]  ;;  %v570_v52 = vld [vmem:[#allocation11 + $0x60] sm:$0xff]  ;;  %v9037_v53 = vpack.c.bf16 %v571_v45, %v567_v44  ;;  %v568_v54 = vld [vmem:[#allocation11 + $0x50] sm:$0xff] }
  0xd3   :  { %v572_v55 = vld [vmem:[#allocation11 + $0x70] sm:$0xff]  ;;  %v9039_v56 = vpack.c.bf16 %v573_v49, %v569_v48  ;;  %v575_v57 = vld [vmem:[#allocation11 + $0x88] sm:$0xff]  ;;  %v9042_v60 = vpack.c.bf16 %v570_v52, %v566_v51  ;;  %v577_v61 = vld [vmem:[#allocation11 + $0x98] sm:$0xff] }
  0xd4   :  { %6606 = vmatpush1.bf16.msra.mxu0 %v6605_v24  ;;  %6638 = vmatpush1.bf16.msra.mxu1 %v6637_v25  ;;  %v579_v58 = vld [vmem:[#allocation11 + $0xa8] sm:$0xff]  ;;  %v581_v62 = vld [vmem:[#allocation11 + $0xb8] sm:$0xff]  ;;  %v9046_v63 = vpack.c.bf16 %v572_v55, %v568_v54  ;;  %v574_v1 = vld [vmem:[#allocation11 + $0x80] sm:$0xff] }
  0xd5   :  { %6608 = vmatprep.subr.bf16.mxu0 %v6607_v26  ;;  %6640 = vmatprep.subr.bf16.mxu1 %v6639_v30  ;;  %v198_v59 = vld [vmem:[#allocation6 + $0x8] sm:$0xff]  ;;  %v578_v2 = vld [vmem:[#allocation11 + $0xa0] sm:$0xff]  ;;  %v9050_v3 = vpack.c.bf16 %v579_v58, %v575_v57  ;;  %v576_v4 = vld [vmem:[#allocation11 + $0x90] sm:$0xff]  ;;  %v9053_v6 = vpack.c.bf16 %v581_v62, %v577_v61 }
  0xd6   :  { %v580_v5 = vld [vmem:[#allocation11 + $0xb0] sm:$0xff]  ;;  %v583_v7 = vld [vmem:[#allocation11 + $0xc8] sm:$0xff]  ;;  %v9056_v10 = vpack.c.bf16 %v578_v2, %v574_v1  ;;  %v585_v11 = vld [vmem:[#allocation11 + $0xd8] sm:$0xff] }
  0xd7   :  { %v587_v8 = vld [vmem:[#allocation11 + $0xe8] sm:$0xff]  ;;  %v199_v9 = vld [vmem:[#allocation6 + $0x10] sm:$0xff]  ;;  %v589_v12 = vld [vmem:[#allocation11 + $0xf8] sm:$0xff]  ;;  %v9060_v13 = vpack.c.bf16 %v580_v5, %v576_v4 }
  0xd8   :  { %6610 = vmatpush1.bf16.msra.mxu0 %v6609_v36  ;;  %6642 = vmatpush1.bf16.msra.mxu1 %v6641_v37  ;;  %v582_v14 = vld [vmem:[#allocation11 + $0xc0] sm:$0xff]  ;;  %v9064_v16 = vpack.c.bf16 %v587_v8, %v583_v7  ;;  %v584_v17 = vld [vmem:[#allocation11 + $0xd0] sm:$0xff]  ;;  %v9067_v19 = vpack.c.bf16 %v589_v12, %v585_v11  ;;  %v591_v20 = vld [vmem:[#allocation11 + $0x108] sm:$0xff] }
  0xd9   :  { %6644 = vmatprep.subr.bf16.mxu0 %v9027_v38  ;;  %6676 = vmatprep.subr.bf16.mxu1 %v9029_v41  ;;  %v586_v15 = vld [vmem:[#allocation11 + $0xe0] sm:$0xff]  ;;  %v588_v18 = vld [vmem:[#allocation11 + $0xf0] sm:$0xff]  ;;  %v595_v21 = vld [vmem:[#allocation11 + $0x128] sm:$0xff] }
  0xda   :  { %v200_v22 = vld [vmem:[#allocation6 + $0x18] sm:$0xff]  ;;  %v9070_v23 = vpack.c.bf16 %v586_v15, %v582_v14  ;;  %v9074_v26 = vpack.c.bf16 %v588_v18, %v584_v17  ;;  %v590_v27 = vld [vmem:[#allocation11 + $0x100] sm:$0xff]  ;;  %v9078_v29 = vpack.c.bf16 %v595_v21, %v591_v20  ;;  %v592_v30 = vld [vmem:[#allocation11 + $0x110] sm:$0xff] }
  0xdb   :  { %356 = vmatmul.mubr.f32.vlgmr.msra.gmra.mrb[0].mxu0 %v197_v46  ;;  %469 = vmatmul.mubr.f32.vlgmr.msra.gmra.mrb[0].mxu1 %v197_v46  ;;  %v593_v24 = vld [vmem:[#allocation11 + $0x118] sm:$0xff]  ;;  %v594_v28 = vld [vmem:[#allocation11 + $0x120] sm:$0xff]  ;;  %v596_v31 = vld [vmem:[#allocation11 + $0x130] sm:$0xff] }
  0xdc   :  { %6646 = vmatpush1.bf16.msra.mxu0 %v9031_v47  ;;  %6678 = vmatpush1.bf16.msra.mxu1 %v9034_v50  ;;  %v597_v25 = vld [vmem:[#allocation11 + $0x138] sm:$0xff]  ;;  %v599_v33 = vld [vmem:[#allocation11 + $0x148] sm:$0xff]  ;;  %v201_v35 = vld [vmem:[#allocation6 + $0x20] sm:$0xff]  ;;  %v9084_v36 = vpack.c.bf16 %v594_v28, %v590_v27  ;;  %v9088_v40 = vpack.c.bf16 %v596_v31, %v592_v30  ;;  %v271_v30 = vlaneseq }
  0xdd   :  { %361 = vmatprep.mubr.f32.mxu0 %v8756_v0  ;;  %474 = vmatprep.mubr.f32.mxu1 %v8756_v0  ;;  %v9081_v32 = vpack.c.bf16 %v597_v25, %v593_v24  ;;  %v603_v34 = vld [vmem:[#allocation11 + $0x168] sm:$0xff]  ;;  %v601_v37 = vld [vmem:[#allocation11 + $0x158] sm:$0xff]  ;;  %v598_v42 = vld [vmem:[#allocation11 + $0x140] sm:$0xff] }
  0xde   :  { %6648 = vmatprep.subr.bf16.mxu0 %v9037_v53  ;;  %6680 = vmatprep.subr.bf16.mxu1 %v9039_v56  ;;  %v605_v39 = vld [vmem:[#allocation11 + $0x178] sm:$0xff]  ;;  %v602_v43 = vld [vmem:[#allocation11 + $0x160] sm:$0xff]  ;;  %v9092_v44 = vpack.c.bf16 %v603_v34, %v599_v33  ;;  %v600_v45 = vld [vmem:[#allocation11 + $0x150] sm:$0xff]  ;;  %v9176_v31 = vshrl.u32 %v271_v30, 7 }
  0xdf   :  { %362 = vmatmul.mubr.f32.gmra.mrb[2].mxu0 %v198_v59  ;;  %475 = vmatmul.mubr.f32.gmra.mrb[2].mxu1 %v198_v59  ;;  %v604_v46 = vld [vmem:[#allocation11 + $0x170] sm:$0xff]  ;;  %v9095_v48 = vpack.c.bf16 %v605_v39, %v601_v37  ;;  %v607_v49 = vld [vmem:[#allocation11 + $0x188] sm:$0xff]  ;;  %v9098_v54 = vpack.c.bf16 %v602_v43, %v598_v42  ;;  %v609_v55 = vld [vmem:[#allocation11 + $0x198] sm:$0xff] }
  0xe0   :  { %6650 = vmatpush1.bf16.msra.mxu0 %v9042_v60  ;;  %6682 = vmatpush1.bf16.msra.mxu1 %v9046_v63  ;;  %v611_v51 = vld [vmem:[#allocation11 + $0x1a8] sm:$0xff]  ;;  %v613_v57 = vld [vmem:[#allocation11 + $0x1b8] sm:$0xff]  ;;  %v9102_v58 = vpack.c.bf16 %v604_v46, %v600_v45  ;;  %v606_v59 = vld [vmem:[#allocation11 + $0x180] sm:$0xff]  ;;  %v273_v33 = vsub.s32 0, %v9176_v31 }
  0xe1   :  { %367 = vmatprep.mubr.f32.mxu0 %v8756_v0  ;;  %480 = vmatprep.mubr.f32.mxu1 %v8756_v0  ;;  %v202_v52 = vld [vmem:[#allocation6 + $0x28] sm:$0xff]  ;;  %v610_v61 = vld [vmem:[#allocation11 + $0x1a0] sm:$0xff]  ;;  %v9106_v62 = vpack.c.bf16 %v611_v51, %v607_v49  ;;  %v608_v1 = vld [vmem:[#allocation11 + $0x190] sm:$0xff]  ;;  %v9109_v4 = vpack.c.bf16 %v613_v57, %v609_v55  ;;  %v281_v57 = vsub.s32 2, %v9176_v31 }
  0xe2   :  { %6652 = vmatprep.subr.bf16.mxu0 %v9050_v3  ;;  %6684 = vmatprep.subr.bf16.mxu1 %v9053_v6  ;;  %v612_v2 = vld [vmem:[#allocation11 + $0x1b0] sm:$0xff]  ;;  %v615_v5 = vld [vmem:[#allocation11 + $0x1c8] sm:$0xff]  ;;  %v617_v11 = vld [vmem:[#allocation11 + $0x1d8] sm:$0xff] }
  0xe3   :  { %368 = vmatmul.mubr.f32.gmra.mrb[4].mxu0 %v199_v9  ;;  %481 = vmatmul.mubr.f32.gmra.mrb[4].mxu1 %v199_v9  ;;  %v619_v7 = vld [vmem:[#allocation11 + $0x1e8] sm:$0xff]  ;;  %v203_v8 = vld [vmem:[#allocation6 + $0x30] sm:$0xff]  ;;  %v9112_v9 = vpack.c.bf16 %v610_v61, %v606_v59  ;;  %v621_v12 = vld [vmem:[#allocation11 + $0x1f8] sm:$0xff]  ;;  %v9116_v14 = vpack.c.bf16 %v612_v2, %v608_v1 }
  0xe4   :  { %6654 = vmatpush1.bf16.msra.mxu0 %v9056_v10  ;;  %6686 = vmatpush1.bf16.msra.mxu1 %v9060_v13  ;;  %v614_v15 = vld [vmem:[#allocation11 + $0x1c0] sm:$0xff]  ;;  %v9120_v18 = vpack.c.bf16 %v619_v7, %v615_v5  ;;  %v616_v20 = vld [vmem:[#allocation11 + $0x1d0] sm:$0xff]  ;;  %v204_v24 = vld [vmem:[#allocation6 + $0x38] sm:$0xff] }
  0xe5   :  { %373 = vmatprep.mubr.f32.mxu0 %v8756_v0  ;;  %486 = vmatprep.mubr.f32.mxu1 %v8756_v0  ;;  %v618_v17 = vld [vmem:[#allocation11 + $0x1e0] sm:$0xff]  ;;  %v620_v21 = vld [vmem:[#allocation11 + $0x1f0] sm:$0xff]  ;;  %v549_v28 = vld [vmem:[#allocation14] sm:$0xff] }
  0xe6   :  { %6656 = vmatprep.subr.bf16.mxu0 %v9064_v16  ;;  %6688 = vmatprep.subr.bf16.mxu1 %v9067_v19  ;;  %v9126_v25 = vpack.c.bf16 %v618_v17, %v614_v15  ;;  %v9130_v27 = vpack.c.bf16 %v620_v21, %v616_v20  ;;  %v269_v34 = vld [vmem:[#allocation12] sm:$0xf] }
  0xe7   :  { %374 = vmatmul.mubr.f32.gmra.mrb[6].mxu0 %v200_v22  ;;  %487 = vmatmul.mubr.f32.gmra.mrb[6].mxu1 %v200_v22  ;;  %v9123_v22 = vpack.c.bf16 %v621_v12, %v617_v11  ;;  %v9182_v37 = vrot.slane %v269_v34, %v273_v33  ;;  %v9199_v61 = vrot.slane %v269_v34, %v281_v57  ;;  %v551_v17 = vld [vmem:[%s10367_s5] sm:$0xff] }
  0xe8   :  { %6658 = vmatpush1.bf16.msra.mxu0 %v9070_v23  ;;  %6690 = vmatpush1.bf16.msra.mxu1 %v9074_v26 }
  0xe9   :  { %379 = vmatprep.mubr.f32.mxu0 %v8756_v0  ;;  %492 = vmatprep.mubr.f32.mxu1 %v8756_v0 }
  0xea   :  { %6660 = vmatprep.subr.bf16.mxu0 %v9078_v29  ;;  %6692 = vmatprep.subr.bf16.mxu1 %v9081_v32 }
  0xeb   :  { %380 = vmatmul.mubr.f32.gmra.mrb[8].mxu0 %v201_v35  ;;  %493 = vmatmul.mubr.f32.gmra.mrb[8].mxu1 %v201_v35  ;;  %v277_v35 = vsub.s32 1, %v9176_v31 }
  0xec   :  { %6662 = vmatpush1.bf16.msra.mxu0 %v9084_v36  ;;  %6694 = vmatpush1.bf16.msra.mxu1 %v9088_v40 }
  0xed   :  { %385 = vmatprep.mubr.f32.mxu0 %v8756_v0  ;;  %498 = vmatprep.mubr.f32.mxu1 %v8756_v0  ;;  %v9186_v39 = vrot.slane %v269_v34, %v277_v35 }
  0xee   :  { %6664 = vmatprep.subr.bf16.mxu0 %v9092_v44  ;;  %6696 = vmatprep.subr.bf16.mxu1 %v9095_v48 }
  0xef   :  { %386 = vmatmul.mubr.f32.gmra.mrb[10].mxu0 %v202_v52  ;;  %499 = vmatmul.mubr.f32.gmra.mrb[10].mxu1 %v202_v52 }
  0xf0   :  { %6666 = vmatpush1.bf16.msra.mxu0 %v9098_v54  ;;  %6698 = vmatpush1.bf16.msra.mxu1 %v9102_v58 }
  0xf1   :  { %391 = vmatprep.mubr.f32.mxu0 %v8756_v0  ;;  %504 = vmatprep.mubr.f32.mxu1 %v8756_v0 }
  0xf2   :  { %6668 = vmatprep.subr.bf16.mxu0 %v9106_v62  ;;  %6700 = vmatprep.subr.bf16.mxu1 %v9109_v4 }
  0xf3   :  { %392 = vmatmul.mubr.f32.gmra.mrb[12].mxu0 %v203_v8  ;;  %505 = vmatmul.mubr.f32.gmra.mrb[12].mxu1 %v203_v8 }
  0xf4   :  { %6670 = vmatpush1.bf16.msra.mxu0 %v9112_v9  ;;  %6702 = vmatpush1.bf16.msra.mxu1 %v9116_v14 }
  0xf5   :  { %397 = vmatprep.mubr.f32.mxu0 %v8756_v0  ;;  %510 = vmatprep.mubr.f32.mxu1 %v8756_v0 }
  0xf6   :  { %6672 = vmatprep.subr.bf16.mxu0 %v9120_v18  ;;  %6704 = vmatprep.subr.bf16.mxu1 %v9123_v22 }
  0xf7   :  { %398 = vmatmul.mubr.f32.gmra.mrb[14].mxu0 %v204_v24  ;;  %511 = vmatmul.mubr.f32.gmra.mrb[14].mxu1 %v204_v24 }
  0xf8   :  { %6674 = vmatpush1.bf16.msra.mxu0 %v9126_v25  ;;  %6706 = vmatpush1.bf16.msra.mxu1 %v9130_v27 }
  0xf9   :  { %686 = vmatprep.mubr.f32.mxu0 %v8756_v0  ;;  %757 = vmatprep.mubr.f32.mxu1 %v8756_v0 }
  0xfa   :  { %6708 = vmatprep.subr.bf16.mxu0 %v9027_v38  ;;  %6740 = vmatprep.subr.bf16.mxu1 %v9029_v41 }
  0xfb   :  { %687 = vmatmul.mubr.f32.vlgmr.msra.gmra.mrb[0].mxu0 %v549_v28  ;;  %758 = vmatmul.mubr.f32.vlgmr.msra.gmra.mrb[0].mxu1 %v549_v28 }
  0xfc   :  { %6710 = vmatpush1.bf16.msra.mxu0 %v9031_v47  ;;  %6742 = vmatpush1.bf16.msra.mxu1 %v9034_v50 }
  0xfd   :  { %6712 = vmatprep.subr.bf16.mxu0 %v9037_v53  ;;  %6744 = vmatprep.subr.bf16.mxu1 %v9039_v56 }
  0xfe   :  { %930 = vmatprep.mubr.f32.mxu0 %v8756_v0  ;;  %1001 = vmatprep.mubr.f32.mxu1 %v8756_v0 }
 0x100   :  { %6714 = vmatpush1.bf16.msra.mxu0 %v9042_v60  ;;  %6746 = vmatpush1.bf16.msra.mxu1 %v9046_v63 }
 0x101   :  { %6716 = vmatprep.subr.bf16.mxu0 %v9050_v3  ;;  %6748 = vmatprep.subr.bf16.mxu1 %v9053_v6 }
 0x104   :  { %6718 = vmatpush1.bf16.msra.mxu0 %v9056_v10  ;;  %6750 = vmatpush1.bf16.msra.mxu1 %v9060_v13 }
 0x105   :  { %6720 = vmatprep.subr.bf16.mxu0 %v9064_v16  ;;  %6752 = vmatprep.subr.bf16.mxu1 %v9067_v19 }
 0x108   :  { %6722 = vmatpush1.bf16.msra.mxu0 %v9070_v23  ;;  %6754 = vmatpush1.bf16.msra.mxu1 %v9074_v26 }
 0x109   :  { %6724 = vmatprep.subr.bf16.mxu0 %v9078_v29  ;;  %6756 = vmatprep.subr.bf16.mxu1 %v9081_v32 }
 0x10c   :  { %6726 = vmatpush1.bf16.msra.mxu0 %v9084_v36  ;;  %6758 = vmatpush1.bf16.msra.mxu1 %v9088_v40 }
 0x10d   :  { %6728 = vmatprep.subr.bf16.mxu0 %v9092_v44  ;;  %6760 = vmatprep.subr.bf16.mxu1 %v9095_v48 }
 0x110   :  { %6730 = vmatpush1.bf16.msra.mxu0 %v9098_v54  ;;  %6762 = vmatpush1.bf16.msra.mxu1 %v9102_v58 }
 0x111   :  { %6732 = vmatprep.subr.bf16.mxu0 %v9106_v62  ;;  %6764 = vmatprep.subr.bf16.mxu1 %v9109_v4 }
 0x114   :  { %6734 = vmatpush1.bf16.msra.mxu0 %v9112_v9  ;;  %6766 = vmatpush1.bf16.msra.mxu1 %v9116_v14 }
 0x115   :  { %6736 = vmatprep.subr.bf16.mxu0 %v9120_v18  ;;  %6768 = vmatprep.subr.bf16.mxu1 %v9123_v22 }
 0x118   :  { %6738 = vmatpush1.bf16.msra.mxu0 %v9126_v25  ;;  %6770 = vmatpush1.bf16.msra.mxu1 %v9130_v27 }
 0x119   :  { %6772 = vmatprep.subr.bf16.mxu0 %v9027_v38  ;;  %6804 = vmatprep.subr.bf16.mxu1 %v9029_v41  ;;  %v285_v41 = vsub.s32 3, %v9176_v31 }
 0x11b   :  { %v9193_v55 = vrot.slane %v269_v34, %v285_v41 }
 0x1ce   :  { %v688_v38 = vpop.f32.mrb[0].mxu0  ;;  %v759_v43 = vpop.f32.mrb[0].mxu1 }
 0x1cf   :  { %v7987_v42 = vadd.f32 %v688_v38, %v9182_v37  ;;  %v690_v45 = vpop.f32.mrb[1].mxu0  ;;  %v761_v49 = vpop.f32.mrb[1].mxu1  ;;  %v8003_v2 = vadd.f32 %v759_v43, %v9199_v61 }
 0x1d0   :  { %v7988_v46 = vadd.f32 %v690_v45, %v9186_v39  ;;  %v8004_v59 = vadd.f32 %v761_v49, %v9193_v55 }
 0x1d1   :  { %v5964_v51 = vmul.f32 -1.442695, %v7987_v42 }
 0x1d2   :  { %v5965_v52 = vmul.f32 -1.442695, %v7988_v46  ;;  %v5966_v1 = vmul.f32 -1.442695, %v8004_v59 }
 0x1d3   :  { %8142 = vpow2.f32 %v5964_v51 }
 0x1d4   :  { %8144 = vpow2.f32 %v5965_v52 }
 0x1d5   :  { %8146 = vpow2.f32 %v5966_v1 }
 0x1d6   :  { %8148 = vtanh.f32 %v8003_v2 }
 0x1dd   :  { %v8143_v5 = vpop.eup %8142 }
 0x1de   :  { %v8145_v7 = vpop.eup %8144  ;;  %v771_v8 = vadd.f32 1.0, %v8143_v5 }
 0x1df   :  { %v777_v11 = vadd.f32 1.0, %v8145_v7  ;;  %v8147_v12 = vpop.eup %8146 }
 0x1e0   :  { %8150 = vrcp.f32 %v771_v8  ;;  %v8149_v15 = vpop.eup %8148  ;;  %v784_v28 = vadd.f32 1.0, %v8147_v12 }
 0x1e1   :  { %8152 = vrcp.f32 %v777_v11 }
 0x1e2   :  { %8154 = vrcp.f32 %v784_v28 }
 0x1ea   :  { %v8151_v20 = vpop.eup %8150 }
 0x1eb   :  { %v8153_v21 = vpop.eup %8152  ;;  %v789_v24 = vmul.f32 %v8151_v20, %v8149_v15 }
 0x1ec   :  { %v788_v34 = vmul.f32 %v8153_v21, %v551_v17  ;;  %v8155_v42 = vpop.eup %8154 }
 0x1ee   :  { %v9205_v38 = vadd.f32 %v789_v24, %v788_v34 }
 0x1f0   :  { %8156 = vtanh.f32 %v9205_v38 }
 0x1fa   :  { %v8157_v43 = vpop.eup %8156 }
 0x1fb   :  { %v9208_v45 = vmul.f32 %v8157_v43, %v8155_v42  ;;  %v1293_v43 = vld [vmem:[#allocation11 + $0x8] sm:$0xff] }
 0x1fd   :  { %931 = vmatmul.mubr.f32.vlgmr.msra.gmra.mrb[2].mxu0 %v9208_v45  ;;  %1002 = vmatmul.mubr.f32.vlgmr.msra.gmra.mrb[2].mxu1 %v9208_v45 }
 0x1fe   :  { %6774 = vmatpush1.bf16.msra.mxu0 %v9031_v47  ;;  %6806 = vmatpush1.bf16.msra.mxu1 %v9034_v50 }
 0x1ff   :  { %6776 = vmatprep.subr.bf16.mxu0 %v9037_v53  ;;  %6808 = vmatprep.subr.bf16.mxu1 %v9039_v56 }
 0x200   :  { %1175 = vmatprep.mubr.f32.mxu0 %v8756_v0  ;;  %1246 = vmatprep.mubr.f32.mxu1 %v8756_v0 }
 0x202   :  { %6778 = vmatpush1.bf16.msra.mxu0 %v9042_v60  ;;  %6810 = vmatpush1.bf16.msra.mxu1 %v9046_v63 }
 0x203   :  { %6780 = vmatprep.subr.bf16.mxu0 %v9050_v3  ;;  %6812 = vmatprep.subr.bf16.mxu1 %v9053_v6 }
 0x206   :  { %6782 = vmatpush1.bf16.msra.mxu0 %v9056_v10  ;;  %6814 = vmatpush1.bf16.msra.mxu1 %v9060_v13 }
 0x207   :  { %6784 = vmatprep.subr.bf16.mxu0 %v9064_v16  ;;  %6816 = vmatprep.subr.bf16.mxu1 %v9067_v19 }
 0x20a   :  { %6786 = vmatpush1.bf16.msra.mxu0 %v9070_v23  ;;  %6818 = vmatpush1.bf16.msra.mxu1 %v9074_v26 }
 0x20b   :  { %6788 = vmatprep.subr.bf16.mxu0 %v9078_v29  ;;  %6820 = vmatprep.subr.bf16.mxu1 %v9081_v32 }
 0x20e   :  { %6790 = vmatpush1.bf16.msra.mxu0 %v9084_v36  ;;  %6822 = vmatpush1.bf16.msra.mxu1 %v9088_v40 }
 0x20f   :  { %6792 = vmatprep.subr.bf16.mxu0 %v9092_v44  ;;  %6824 = vmatprep.subr.bf16.mxu1 %v9095_v48 }
 0x212   :  { %6794 = vmatpush1.bf16.msra.mxu0 %v9098_v54  ;;  %6826 = vmatpush1.bf16.msra.mxu1 %v9102_v58 }
 0x213   :  { %6796 = vmatprep.subr.bf16.mxu0 %v9106_v62  ;;  %6828 = vmatprep.subr.bf16.mxu1 %v9109_v4 }
 0x216   :  { %6798 = vmatpush1.bf16.msra.mxu0 %v9112_v9  ;;  %6830 = vmatpush1.bf16.msra.mxu1 %v9116_v14 }
 0x217   :  { %6800 = vmatprep.subr.bf16.mxu0 %v9120_v18  ;;  %6832 = vmatprep.subr.bf16.mxu1 %v9123_v22 }
 0x21a   :  { %6802 = vmatpush1.bf16.msra.mxu0 %v9126_v25  ;;  %6834 = vmatpush1.bf16.msra.mxu1 %v9130_v27 }
 0x2d0   :  { %v932_v47 = vpop.f32.mrb[2].mxu0  ;;  %v1003_v50 = vpop.f32.mrb[2].mxu1 }
 0x2d1   :  { %v7989_v53 = vadd.f32 %v932_v47, %v9182_v37  ;;  %v934_v56 = vpop.f32.mrb[3].mxu0  ;;  %v1005_v60 = vpop.f32.mrb[3].mxu1  ;;  %v8005_v59 = vadd.f32 %v1003_v50, %v9199_v61  ;;  %v1297_v47 = vld [vmem:[#allocation11 + $0x28] sm:$0xff] }
 0x2d2   :  { %v7990_v63 = vadd.f32 %v934_v56, %v9186_v39  ;;  %v8006_v51 = vadd.f32 %v1005_v60, %v9193_v55  ;;  %v9258_v50 = vpack.c.bf16 %v1297_v47, %v1293_v43  ;;  %v1292_v56 = vld [vmem:[#allocation11] sm:$0xff]  ;;  %v1558_v43 = vld [vmem:[#allocation11 + $0xa8] sm:$0xff]  ;;  %v1556_v47 = vld [vmem:[#allocation11 + $0x98] sm:$0xff] }
 0x2d3   :  { %v5967_v46 = vmul.f32 -1.442695, %v7989_v53  ;;  %v1299_v53 = vld [vmem:[#allocation11 + $0x38] sm:$0xff]  ;;  %v1296_v60 = vld [vmem:[#allocation11 + $0x20] sm:$0xff] }
 0x2d4   :  { %v5968_v49 = vmul.f32 -1.442695, %v7990_v63  ;;  %v5969_v52 = vmul.f32 -1.442695, %v8006_v51  ;;  %v1298_v51 = vld [vmem:[#allocation11 + $0x30] sm:$0xff]  ;;  %6836 = vmatprep.subr.bf16.mxu0 %v9258_v50 }
 0x2d5   :  { %8158 = vpow2.f32 %v5967_v46  ;;  %v9262_v46 = vpack.c.bf16 %v1296_v60, %v1292_v56  ;;  %v1553_v56 = vld [vmem:[#allocation11 + $0x80] sm:$0xff] }
 0x2d6   :  { %8160 = vpow2.f32 %v5968_v49  ;;  %v1294_v49 = vld [vmem:[#allocation11 + $0x10] sm:$0xff]  ;;  %v1557_v60 = vld [vmem:[#allocation11 + $0xa0] sm:$0xff] }
 0x2d7   :  { %8162 = vpow2.f32 %v5969_v52  ;;  %v9265_v52 = vpack.c.bf16 %v1298_v51, %v1294_v49  ;;  %v9334_v51 = vpack.c.bf16 %v1557_v60, %v1553_v56  ;;  %v1579_v56 = vld [vmem:[#allocation11 + $0x150] sm:$0xff] }
 0x2d8   :  { %8164 = vtanh.f32 %v8005_v59  ;;  %v1305_v59 = vld [vmem:[#allocation11 + $0x68] sm:$0xff]  ;;  %v1583_v60 = vld [vmem:[#allocation11 + $0x170] sm:$0xff] }
 0x2df   :  { %v8159_v1 = vpop.eup %8158 }
 0x2e0   :  { %v8161_v2 = vpop.eup %8160  ;;  %v1015_v5 = vadd.f32 1.0, %v8159_v1  ;;  %v1303_v1 = vld [vmem:[#allocation11 + $0x58] sm:$0xff] }
 0x2e1   :  { %v1021_v7 = vadd.f32 1.0, %v8161_v2  ;;  %v8163_v8 = vpop.eup %8162 }
 0x2e2   :  { %8166 = vrcp.f32 %v1015_v5  ;;  %v8165_v11 = vpop.eup %8164  ;;  %v1028_v20 = vadd.f32 1.0, %v8163_v8  ;;  %v1307_v5 = vld [vmem:[#allocation11 + $0x78] sm:$0xff]  ;;  %v1304_v8 = vld [vmem:[#allocation11 + $0x60] sm:$0xff] }
 0x2e3   :  { %8168 = vrcp.f32 %v1021_v7  ;;  %v1300_v7 = vld [vmem:[#allocation11 + $0x40] sm:$0xff] }
 0x2e4   :  { %8170 = vrcp.f32 %v1028_v20 }
 0x2ec   :  { %v8167_v12 = vpop.eup %8166 }
 0x2ed   :  { %v8169_v15 = vpop.eup %8168  ;;  %v1033_v17 = vmul.f32 %v8167_v12, %v8165_v11  ;;  %v9272_v11 = vpack.c.bf16 %v1307_v5, %v1303_v1  ;;  %v9274_v12 = vpack.c.bf16 %v1304_v8, %v1300_v7  ;;  %v1562_v5 = vld [vmem:[#allocation11 + $0xc8] sm:$0xff]  ;;  %v1564_v8 = vld [vmem:[#allocation11 + $0xd8] sm:$0xff] }
 0x2ee   :  { %v1032_v21 = vmul.f32 %v8169_v15, %v9205_v38  ;;  %v8171_v28 = vpop.eup %8170  ;;  %v1295_v38 = vld [vmem:[#allocation11 + $0x18] sm:$0xff]  ;;  %v1302_v15 = vld [vmem:[#allocation11 + $0x50] sm:$0xff]  ;;  %v1566_v7 = vld [vmem:[#allocation11 + $0xe8] sm:$0xff] }
 0x2ef   :  { %v9260_v63 = vpack.c.bf16 %v1299_v53, %v1295_v38  ;;  %v1560_v53 = vld [vmem:[#allocation11 + $0xb8] sm:$0xff] }
 0x2f0   :  { %v9249_v24 = vadd.f32 %v1033_v17, %v1032_v21  ;;  %v1306_v17 = vld [vmem:[#allocation11 + $0x70] sm:$0xff]  ;;  %v9332_v49 = vpack.c.bf16 %v1560_v53, %v1556_v47 }
 0x2f1   :  { %6868 = vmatprep.subr.bf16.mxu1 %v9260_v63  ;;  %v9277_v20 = vpack.c.bf16 %v1306_v17, %v1302_v15  ;;  %v9342_v15 = vpack.c.bf16 %v1566_v7, %v1562_v5  ;;  %v1568_v17 = vld [vmem:[#allocation11 + $0xf8] sm:$0xff]  ;;  %v1590_v5 = vld [vmem:[#allocation11 + $0x1a8] sm:$0xff] }
 0x2f2   :  { %8172 = vtanh.f32 %v9249_v24  ;;  %v1588_v7 = vld [vmem:[#allocation11 + $0x198] sm:$0xff] }
 0x2fc   :  { %v8173_v34 = vpop.eup %8172 }
 0x2fd   :  { %v9252_v42 = vmul.f32 %v8173_v34, %v8171_v28  ;;  %v1554_v34 = vld [vmem:[#allocation11 + $0x88] sm:$0xff] }
 0x2fe   :  { %v9330_v38 = vpack.c.bf16 %v1558_v43, %v1554_v34  ;;  %v1577_v34 = vld [vmem:[#allocation11 + $0x140] sm:$0xff] }
 0x2ff   :  { %1176 = vmatmul.mubr.f32.vlgmr.msra.gmra.mrb[4].mxu0 %v9252_v42  ;;  %1247 = vmatmul.mubr.f32.vlgmr.msra.gmra.mrb[4].mxu1 %v9252_v42  ;;  %v1581_v43 = vld [vmem:[#allocation11 + $0x160] sm:$0xff] }
 0x300   :  { %1420 = vmatprep.mubr.f32.mxu0 %v8756_v0  ;;  %1491 = vmatprep.mubr.f32.mxu1 %v8756_v0  ;;  %v1301_v0 = vld [vmem:[#allocation11 + $0x48] sm:$0xff]  ;;  %v9370_v53 = vpack.c.bf16 %v1581_v43, %v1577_v34  ;;  %v1599_v34 = vld [vmem:[#allocation11 + $0x1f0] sm:$0xff] }
 0x301   :  { %6838 = vmatpush1.bf16.msra.mxu0 %v9262_v46  ;;  %6870 = vmatpush1.bf16.msra.mxu1 %v9265_v52  ;;  %v9270_v2 = vpack.c.bf16 %v1305_v59, %v1301_v0  ;;  %v1555_v0 = vld [vmem:[#allocation11 + $0x90] sm:$0xff] }
 0x302   :  { %6872 = vmatprep.subr.bf16.mxu1 %v9272_v11  ;;  %v1559_v59 = vld [vmem:[#allocation11 + $0xb0] sm:$0xff] }
 0x303   :  { %6840 = vmatprep.subr.bf16.mxu0 %v9270_v2  ;;  %v9337_v1 = vpack.c.bf16 %v1559_v59, %v1555_v0  ;;  %v1586_v0 = vld [vmem:[#allocation11 + $0x188] sm:$0xff]  ;;  %v9373_v59 = vpack.c.bf16 %v1583_v60, %v1579_v56 }
 0x305   :  { %6842 = vmatpush1.bf16.msra.mxu0 %v9274_v12  ;;  %6874 = vmatpush1.bf16.msra.mxu1 %v9277_v20 }
 0x306   :  { %6844 = vmatprep.subr.bf16.mxu0 %v9050_v3  ;;  %6876 = vmatprep.subr.bf16.mxu1 %v9053_v6 }
 0x309   :  { %6846 = vmatpush1.bf16.msra.mxu0 %v9056_v10  ;;  %6878 = vmatpush1.bf16.msra.mxu1 %v9060_v13 }
 0x30a   :  { %6848 = vmatprep.subr.bf16.mxu0 %v9064_v16  ;;  %6880 = vmatprep.subr.bf16.mxu1 %v9067_v19 }
 0x30d   :  { %6850 = vmatpush1.bf16.msra.mxu0 %v9070_v23  ;;  %6882 = vmatpush1.bf16.msra.mxu1 %v9074_v26 }
 0x30e   :  { %6852 = vmatprep.subr.bf16.mxu0 %v9078_v29  ;;  %6884 = vmatprep.subr.bf16.mxu1 %v9081_v32 }
 0x311   :  { %6854 = vmatpush1.bf16.msra.mxu0 %v9084_v36  ;;  %6886 = vmatpush1.bf16.msra.mxu1 %v9088_v40 }
 0x312   :  { %6856 = vmatprep.subr.bf16.mxu0 %v9092_v44  ;;  %6888 = vmatprep.subr.bf16.mxu1 %v9095_v48 }
 0x315   :  { %6858 = vmatpush1.bf16.msra.mxu0 %v9098_v54  ;;  %6890 = vmatpush1.bf16.msra.mxu1 %v9102_v58 }
 0x316   :  { %6860 = vmatprep.subr.bf16.mxu0 %v9106_v62  ;;  %6892 = vmatprep.subr.bf16.mxu1 %v9109_v4 }
 0x319   :  { %6862 = vmatpush1.bf16.msra.mxu0 %v9112_v9  ;;  %6894 = vmatpush1.bf16.msra.mxu1 %v9116_v14 }
 0x31a   :  { %6864 = vmatprep.subr.bf16.mxu0 %v9120_v18  ;;  %6896 = vmatprep.subr.bf16.mxu1 %v9123_v22 }
 0x31d   :  { %6866 = vmatpush1.bf16.msra.mxu0 %v9126_v25  ;;  %6898 = vmatpush1.bf16.msra.mxu1 %v9130_v27 }
 0x31e   :  { %6900 = vmatprep.subr.bf16.mxu0 %v9258_v50  ;;  %6932 = vmatprep.subr.bf16.mxu1 %v9260_v63 }
 0x3d2   :  { %v1177_v3 = vpop.f32.mrb[4].mxu0  ;;  %v1248_v6 = vpop.f32.mrb[4].mxu1 }
 0x3d3   :  { %v7991_v10 = vadd.f32 %v1177_v3, %v9182_v37  ;;  %v1179_v13 = vpop.f32.mrb[5].mxu0  ;;  %v1250_v16 = vpop.f32.mrb[5].mxu1  ;;  %v8007_v36 = vadd.f32 %v1248_v6, %v9199_v61  ;;  %v1561_v3 = vld [vmem:[#allocation11 + $0xc0] sm:$0xff] }
 0x3d4   :  { %v7992_v19 = vadd.f32 %v1179_v13, %v9186_v39  ;;  %v8008_v29 = vadd.f32 %v1250_v16, %v9193_v55  ;;  %v1565_v6 = vld [vmem:[#allocation11 + $0xe0] sm:$0xff]  ;;  %v1563_v16 = vld [vmem:[#allocation11 + $0xd0] sm:$0xff] }
 0x3d5   :  { %v5970_v23 = vmul.f32 -1.442695, %v7991_v10  ;;  %v9344_v10 = vpack.c.bf16 %v1568_v17, %v1564_v8  ;;  %v9346_v13 = vpack.c.bf16 %v1565_v6, %v1561_v3  ;;  %v1592_v8 = vld [vmem:[#allocation11 + $0x1b8] sm:$0xff]  ;;  %v9376_v17 = vpack.c.bf16 %v1590_v5, %v1586_v0  ;;  %v1585_v6 = vld [vmem:[#allocation11 + $0x180] sm:$0xff] }
 0x3d6   :  { %v5971_v26 = vmul.f32 -1.442695, %v7992_v19  ;;  %v5972_v32 = vmul.f32 -1.442695, %v8008_v29  ;;  %v1567_v19 = vld [vmem:[#allocation11 + $0xf0] sm:$0xff]  ;;  %v1574_v29 = vld [vmem:[#allocation11 + $0x128] sm:$0xff]  ;;  %v9378_v3 = vpack.c.bf16 %v1592_v8, %v1588_v7 }
 0x3d7   :  { %8174 = vpow2.f32 %v5970_v23  ;;  %v9349_v23 = vpack.c.bf16 %v1567_v19, %v1563_v16  ;;  %v1589_v16 = vld [vmem:[#allocation11 + $0x1a0] sm:$0xff]  ;;  %v1587_v19 = vld [vmem:[#allocation11 + $0x190] sm:$0xff] }
 0x3d8   :  { %8176 = vpow2.f32 %v5971_v26  ;;  %v1570_v26 = vld [vmem:[#allocation11 + $0x108] sm:$0xff] }
 0x3d9   :  { %8178 = vpow2.f32 %v5972_v32  ;;  %v1572_v32 = vld [vmem:[#allocation11 + $0x118] sm:$0xff] }
 0x3da   :  { %8180 = vtanh.f32 %v8007_v36  ;;  %v9354_v36 = vpack.c.bf16 %v1574_v29, %v1570_v26  ;;  %v9381_v26 = vpack.c.bf16 %v1589_v16, %v1585_v6  ;;  %v1591_v29 = vld [vmem:[#allocation11 + $0x1b0] sm:$0xff] }
 0x3e1   :  { %v8175_v40 = vpop.eup %8174 }
 0x3e2   :  { %v8177_v44 = vpop.eup %8176  ;;  %v1260_v48 = vadd.f32 1.0, %v8175_v40  ;;  %v1576_v40 = vld [vmem:[#allocation11 + $0x138] sm:$0xff] }
 0x3e3   :  { %v1266_v54 = vadd.f32 1.0, %v8177_v44  ;;  %v8179_v58 = vpop.eup %8178  ;;  %v1569_v44 = vld [vmem:[#allocation11 + $0x100] sm:$0xff] }
 0x3e4   :  { %8182 = vrcp.f32 %v1260_v48  ;;  %v8181_v62 = vpop.eup %8180  ;;  %v1273_v18 = vadd.f32 1.0, %v8179_v58  ;;  %v1573_v48 = vld [vmem:[#allocation11 + $0x120] sm:$0xff] }
 0x3e5   :  { %8184 = vrcp.f32 %v1266_v54  ;;  %v9356_v54 = vpack.c.bf16 %v1576_v40, %v1572_v32  ;;  %v9358_v58 = vpack.c.bf16 %v1573_v48, %v1569_v44  ;;  %v1594_v32 = vld [vmem:[#allocation11 + $0x1c8] sm:$0xff]  ;;  %v9385_v44 = vpack.c.bf16 %v1591_v29, %v1587_v19 }
 0x3e6   :  { %8186 = vrcp.f32 %v1273_v18  ;;  %v1582_v18 = vld [vmem:[#allocation11 + $0x168] sm:$0xff] }
 0x3e7   :  { %v1598_v40 = vld [vmem:[#allocation11 + $0x1e8] sm:$0xff] }
 0x3e8   :  { %v9387_v48 = vpack.c.bf16 %v1598_v40, %v1594_v32 }
 0x3ee   :  { %v8183_v4 = vpop.eup %8182 }
 0x3ef   :  { %v8185_v9 = vpop.eup %8184  ;;  %v1278_v14 = vmul.f32 %v8183_v4, %v8181_v62  ;;  %v1571_v62 = vld [vmem:[#allocation11 + $0x110] sm:$0xff] }
 0x3f0   :  { %v1277_v22 = vmul.f32 %v8185_v9, %v9249_v24  ;;  %v8187_v27 = vpop.eup %8186  ;;  %v9324_v24 = vld [vmem:[#allocation23 + $0x10] sm:$0xff]  ;;  %v1575_v4 = vld [vmem:[#allocation11 + $0x130] sm:$0xff] }
 0x3f1   :  { %v9361_v9 = vpack.c.bf16 %v1575_v4, %v1571_v62  ;;  %v1596_v62 = vld [vmem:[#allocation11 + $0x1d8] sm:$0xff] }
 0x3f2   :  { %v9313_v25 = vadd.f32 %v1278_v14, %v1277_v22  ;;  %v1578_v14 = vld [vmem:[#allocation11 + $0x148] sm:$0xff]  ;;  %v1580_v22 = vld [vmem:[#allocation11 + $0x158] sm:$0xff] }
 0x3f3   :  { %v1600_v4 = vld [vmem:[#allocation11 + $0x1f8] sm:$0xff] }
 0x3f4   :  { %8188 = vtanh.f32 %v9313_v25 }
 0x3fe   :  { %v8189_v21 = vpop.eup %8188 }
 0x3ff   :  { %v9316_v28 = vmul.f32 %v8189_v21, %v8187_v27  ;;  %v9365_v27 = vpack.c.bf16 %v1582_v18, %v1578_v14  ;;  %v1584_v21 = vld [vmem:[#allocation11 + $0x178] sm:$0xff]  ;;  %v1593_v14 = vld [vmem:[#allocation11 + $0x1c0] sm:$0xff]  ;;  %v9390_v18 = vpack.c.bf16 %v1600_v4, %v1596_v62 }
 0x400   :  { %v9368_v47 = vpack.c.bf16 %v1584_v21, %v1580_v22  ;;  %v1597_v22 = vld [vmem:[#allocation11 + $0x1e0] sm:$0xff]  ;;  %v1595_v21 = vld [vmem:[#allocation11 + $0x1d0] sm:$0xff] }
 0x401   :  { %1421 = vmatmul.mubr.f32.vlgmr.msra.gmra.mrb[6].mxu0 %v9316_v28  ;;  %1492 = vmatmul.mubr.f32.vlgmr.msra.gmra.mrb[6].mxu1 %v9316_v28  ;;  %v9393_v43 = vpack.c.bf16 %v1597_v22, %v1593_v14  ;;  %v9397_v56 = vpack.c.bf16 %v1599_v34, %v1595_v21 }
 0x402   :  { %6902 = vmatpush1.bf16.msra.mxu0 %v9262_v46  ;;  %6934 = vmatpush1.bf16.msra.mxu1 %v9265_v52 }
 0x403   :  { %6904 = vmatprep.subr.bf16.mxu0 %v9270_v2  ;;  %6936 = vmatprep.subr.bf16.mxu1 %v9272_v11 }
 0x404   :  { %1665 = vmatprep.mubr.f32.mxu0 %v9324_v24  ;;  %1736 = vmatprep.mubr.f32.mxu1 %v9324_v24 }
 0x406   :  { %6906 = vmatpush1.bf16.msra.mxu0 %v9274_v12  ;;  %6938 = vmatpush1.bf16.msra.mxu1 %v9277_v20 }
 0x407   :  { %6908 = vmatprep.subr.bf16.mxu0 %v9330_v38  ;;  %6940 = vmatprep.subr.bf16.mxu1 %v9332_v49 }
 0x40a   :  { %6910 = vmatpush1.bf16.msra.mxu0 %v9334_v51  ;;  %6942 = vmatpush1.bf16.msra.mxu1 %v9337_v1 }
 0x40b   :  { %6912 = vmatprep.subr.bf16.mxu0 %v9342_v15  ;;  %6944 = vmatprep.subr.bf16.mxu1 %v9344_v10 }
 0x40e   :  { %6914 = vmatpush1.bf16.msra.mxu0 %v9346_v13  ;;  %6946 = vmatpush1.bf16.msra.mxu1 %v9349_v23 }
 0x40f   :  { %6916 = vmatprep.subr.bf16.mxu0 %v9354_v36  ;;  %6948 = vmatprep.subr.bf16.mxu1 %v9356_v54 }
 0x412   :  { %6918 = vmatpush1.bf16.msra.mxu0 %v9358_v58  ;;  %6950 = vmatpush1.bf16.msra.mxu1 %v9361_v9 }
 0x413   :  { %6920 = vmatprep.subr.bf16.mxu0 %v9365_v27  ;;  %6952 = vmatprep.subr.bf16.mxu1 %v9368_v47 }
 0x416   :  { %6922 = vmatpush1.bf16.msra.mxu0 %v9370_v53  ;;  %6954 = vmatpush1.bf16.msra.mxu1 %v9373_v59 }
 0x417   :  { %6924 = vmatprep.subr.bf16.mxu0 %v9376_v17  ;;  %6956 = vmatprep.subr.bf16.mxu1 %v9378_v3 }
 0x41a   :  { %6926 = vmatpush1.bf16.msra.mxu0 %v9381_v26  ;;  %6958 = vmatpush1.bf16.msra.mxu1 %v9385_v44 }
 0x41b   :  { %6928 = vmatprep.subr.bf16.mxu0 %v9387_v48  ;;  %6960 = vmatprep.subr.bf16.mxu1 %v9390_v18 }
 0x41e   :  { %6930 = vmatpush1.bf16.msra.mxu0 %v9393_v43  ;;  %6962 = vmatpush1.bf16.msra.mxu1 %v9397_v56 }
 0x41f   :  { %6964 = vmatprep.subr.bf16.mxu0 %v9258_v50  ;;  %6996 = vmatprep.subr.bf16.mxu1 %v9260_v63 }
 0x4d4   :  { %v1422_v60 = vpop.f32.mrb[6].mxu0  ;;  %v1493_v0 = vpop.f32.mrb[6].mxu1 }
 0x4d5   :  { %v7993_v5 = vadd.f32 %v1422_v60, %v9182_v37  ;;  %v1424_v7 = vpop.f32.mrb[7].mxu0  ;;  %v1495_v8 = vpop.f32.mrb[7].mxu1  ;;  %v8009_v40 = vadd.f32 %v1493_v0, %v9199_v61 }
 0x4d6   :  { %v7994_v6 = vadd.f32 %v1424_v7, %v9186_v39  ;;  %v8010_v29 = vadd.f32 %v1495_v8, %v9193_v55 }
 0x4d7   :  { %v5973_v16 = vmul.f32 -1.442695, %v7993_v5 }
 0x4d8   :  { %v5974_v19 = vmul.f32 -1.442695, %v7994_v6  ;;  %v5975_v32 = vmul.f32 -1.442695, %v8010_v29 }
 0x4d9   :  { %8190 = vpow2.f32 %v5973_v16 }
 0x4da   :  { %8192 = vpow2.f32 %v5974_v19 }
 0x4db   :  { %8194 = vpow2.f32 %v5975_v32 }
 0x4dc   :  { %8196 = vtanh.f32 %v8009_v40 }
 0x4e3   :  { %v8191_v62 = vpop.eup %8190 }
 0x4e4   :  { %v8193_v4 = vpop.eup %8192  ;;  %v1505_v14 = vadd.f32 1.0, %v8191_v62 }
 0x4e5   :  { %v1511_v22 = vadd.f32 1.0, %v8193_v4  ;;  %v8195_v21 = vpop.eup %8194 }
 0x4e6   :  { %8198 = vrcp.f32 %v1505_v14  ;;  %v8197_v34 = vpop.eup %8196  ;;  %v1518_v6 = vadd.f32 1.0, %v8195_v21 }
 0x4e7   :  { %8200 = vrcp.f32 %v1511_v22 }
 0x4e8   :  { %8202 = vrcp.f32 %v1518_v6 }
 0x4f0   :  { %v8199_v60 = vpop.eup %8198 }
 0x4f1   :  { %v8201_v5 = vpop.eup %8200  ;;  %v1523_v7 = vmul.f32 %v8199_v60, %v8197_v34 }
 0x4f2   :  { %v1522_v16 = vmul.f32 %v8201_v5, %v9313_v25  ;;  %v8203_v0 = vpop.eup %8202 }
 0x4f4   :  { %v9409_v8 = vadd.f32 %v1523_v7, %v1522_v16 }
 0x4f6   :  { %8204 = vtanh.f32 %v9409_v8 }
 0x500   :  { %v8205_v19 = vpop.eup %8204 }
 0x501   :  { %v9412_v29 = vmul.f32 %v8205_v19, %v8203_v0 }
 0x503   :  { %1666 = vmatmul.mubr.f32.vlgmr.msra.gmra.mrb[8].mxu0 %v9412_v29  ;;  %1737 = vmatmul.mubr.f32.vlgmr.msra.gmra.mrb[8].mxu1 %v9412_v29 }
 0x504   :  { %6966 = vmatpush1.bf16.msra.mxu0 %v9262_v46  ;;  %6998 = vmatpush1.bf16.msra.mxu1 %v9265_v52 }
 0x505   :  { %6968 = vmatprep.subr.bf16.mxu0 %v9270_v2  ;;  %7000 = vmatprep.subr.bf16.mxu1 %v9272_v11 }
 0x506   :  { %1910 = vmatprep.mubr.f32.mxu0 %v9324_v24  ;;  %1981 = vmatprep.mubr.f32.mxu1 %v9324_v24 }
 0x508   :  { %6970 = vmatpush1.bf16.msra.mxu0 %v9274_v12  ;;  %7002 = vmatpush1.bf16.msra.mxu1 %v9277_v20 }
 0x509   :  { %6972 = vmatprep.subr.bf16.mxu0 %v9330_v38  ;;  %7004 = vmatprep.subr.bf16.mxu1 %v9332_v49 }
 0x50c   :  { %6974 = vmatpush1.bf16.msra.mxu0 %v9334_v51  ;;  %7006 = vmatpush1.bf16.msra.mxu1 %v9337_v1 }
 0x50d   :  { %6976 = vmatprep.subr.bf16.mxu0 %v9342_v15  ;;  %7008 = vmatprep.subr.bf16.mxu1 %v9344_v10 }
 0x510   :  { %6978 = vmatpush1.bf16.msra.mxu0 %v9346_v13  ;;  %7010 = vmatpush1.bf16.msra.mxu1 %v9349_v23 }
 0x511   :  { %6980 = vmatprep.subr.bf16.mxu0 %v9354_v36  ;;  %7012 = vmatprep.subr.bf16.mxu1 %v9356_v54 }
 0x514   :  { %6982 = vmatpush1.bf16.msra.mxu0 %v9358_v58  ;;  %7014 = vmatpush1.bf16.msra.mxu1 %v9361_v9 }
 0x515   :  { %6984 = vmatprep.subr.bf16.mxu0 %v9365_v27  ;;  %7016 = vmatprep.subr.bf16.mxu1 %v9368_v47 }
 0x518   :  { %6986 = vmatpush1.bf16.msra.mxu0 %v9370_v53  ;;  %7018 = vmatpush1.bf16.msra.mxu1 %v9373_v59 }
 0x519   :  { %6988 = vmatprep.subr.bf16.mxu0 %v9376_v17  ;;  %7020 = vmatprep.subr.bf16.mxu1 %v9378_v3 }
 0x51c   :  { %6990 = vmatpush1.bf16.msra.mxu0 %v9381_v26  ;;  %7022 = vmatpush1.bf16.msra.mxu1 %v9385_v44 }
 0x51d   :  { %6992 = vmatprep.subr.bf16.mxu0 %v9387_v48  ;;  %7024 = vmatprep.subr.bf16.mxu1 %v9390_v18 }
 0x520   :  { %6994 = vmatpush1.bf16.msra.mxu0 %v9393_v43  ;;  %7026 = vmatpush1.bf16.msra.mxu1 %v9397_v56 }
 0x521   :  { %7028 = vmatprep.subr.bf16.mxu0 %v9258_v50  ;;  %7060 = vmatprep.subr.bf16.mxu1 %v9260_v63 }
 0x5d6   :  { %v1667_v25 = vpop.f32.mrb[8].mxu0  ;;  %v1738_v32 = vpop.f32.mrb[8].mxu1 }
 0x5d7   :  { %v7995_v40 = vadd.f32 %v1667_v25, %v9182_v37  ;;  %v1669_v62 = vpop.f32.mrb[9].mxu0  ;;  %v1740_v4 = vpop.f32.mrb[9].mxu1  ;;  %v8011_v5 = vadd.f32 %v1738_v32, %v9199_v61 }
 0x5d8   :  { %v7996_v14 = vadd.f32 %v1669_v62, %v9186_v39  ;;  %v8012_v34 = vadd.f32 %v1740_v4, %v9193_v55 }
 0x5d9   :  { %v5976_v22 = vmul.f32 -1.442695, %v7995_v40 }
 0x5da   :  { %v5977_v21 = vmul.f32 -1.442695, %v7996_v14  ;;  %v5978_v60 = vmul.f32 -1.442695, %v8012_v34 }
 0x5db   :  { %8206 = vpow2.f32 %v5976_v22 }
 0x5dc   :  { %8208 = vpow2.f32 %v5977_v21 }
 0x5dd   :  { %8210 = vpow2.f32 %v5978_v60 }
 0x5de   :  { %8212 = vtanh.f32 %v8011_v5 }
 0x5e5   :  { %v8207_v50 = vpop.eup %8206 }
 0x5e6   :  { %v8209_v7 = vpop.eup %8208  ;;  %v1750_v63 = vadd.f32 1.0, %v8207_v50 }
 0x5e7   :  { %v1756_v6 = vadd.f32 1.0, %v8209_v7  ;;  %v8211_v16 = vpop.eup %8210 }
 0x5e8   :  { %8214 = vrcp.f32 %v1750_v63  ;;  %v8213_v0 = vpop.eup %8212  ;;  %v1763_v62 = vadd.f32 1.0, %v8211_v16 }
 0x5e9   :  { %8216 = vrcp.f32 %v1756_v6 }
 0x5ea   :  { %8218 = vrcp.f32 %v1763_v62 }
 0x5f2   :  { %v8215_v19 = vpop.eup %8214 }
 0x5f3   :  { %v8217_v25 = vpop.eup %8216  ;;  %v1768_v40 = vmul.f32 %v8215_v19, %v8213_v0 }
 0x5f4   :  { %v1767_v14 = vmul.f32 %v8217_v25, %v9409_v8  ;;  %v8219_v32 = vpop.eup %8218 }
 0x5f6   :  { %v9455_v4 = vadd.f32 %v1768_v40, %v1767_v14 }
 0x5f8   :  { %8220 = vtanh.f32 %v9455_v4 }
 0x602   :  { %v8221_v22 = vpop.eup %8220 }
 0x603   :  { %v9458_v21 = vmul.f32 %v8221_v22, %v8219_v32 }
 0x605   :  { %1911 = vmatmul.mubr.f32.vlgmr.msra.gmra.mrb[10].mxu0 %v9458_v21  ;;  %1982 = vmatmul.mubr.f32.vlgmr.msra.gmra.mrb[10].mxu1 %v9458_v21 }
 0x606   :  { %7030 = vmatpush1.bf16.msra.mxu0 %v9262_v46  ;;  %7062 = vmatpush1.bf16.msra.mxu1 %v9265_v52 }
 0x607   :  { %7032 = vmatprep.subr.bf16.mxu0 %v9270_v2  ;;  %7064 = vmatprep.subr.bf16.mxu1 %v9272_v11 }
 0x608   :  { %2155 = vmatprep.mubr.f32.mxu0 %v9324_v24  ;;  %2226 = vmatprep.mubr.f32.mxu1 %v9324_v24 }
 0x60a   :  { %7034 = vmatpush1.bf16.msra.mxu0 %v9274_v12  ;;  %7066 = vmatpush1.bf16.msra.mxu1 %v9277_v20 }
 0x60b   :  { %7036 = vmatprep.subr.bf16.mxu0 %v9330_v38  ;;  %7068 = vmatprep.subr.bf16.mxu1 %v9332_v49 }
 0x60e   :  { %7038 = vmatpush1.bf16.msra.mxu0 %v9334_v51  ;;  %7070 = vmatpush1.bf16.msra.mxu1 %v9337_v1 }
 0x60f   :  { %7040 = vmatprep.subr.bf16.mxu0 %v9342_v15  ;;  %7072 = vmatprep.subr.bf16.mxu1 %v9344_v10 }
 0x612   :  { %7042 = vmatpush1.bf16.msra.mxu0 %v9346_v13  ;;  %7074 = vmatpush1.bf16.msra.mxu1 %v9349_v23 }
 0x613   :  { %7044 = vmatprep.subr.bf16.mxu0 %v9354_v36  ;;  %7076 = vmatprep.subr.bf16.mxu1 %v9356_v54 }
 0x616   :  { %7046 = vmatpush1.bf16.msra.mxu0 %v9358_v58  ;;  %7078 = vmatpush1.bf16.msra.mxu1 %v9361_v9 }
 0x617   :  { %7048 = vmatprep.subr.bf16.mxu0 %v9365_v27  ;;  %7080 = vmatprep.subr.bf16.mxu1 %v9368_v47 }
 0x61a   :  { %7050 = vmatpush1.bf16.msra.mxu0 %v9370_v53  ;;  %7082 = vmatpush1.bf16.msra.mxu1 %v9373_v59 }
 0x61b   :  { %7052 = vmatprep.subr.bf16.mxu0 %v9376_v17  ;;  %7084 = vmatprep.subr.bf16.mxu1 %v9378_v3 }
 0x61e   :  { %7054 = vmatpush1.bf16.msra.mxu0 %v9381_v26  ;;  %7086 = vmatpush1.bf16.msra.mxu1 %v9385_v44 }
 0x61f   :  { %7056 = vmatprep.subr.bf16.mxu0 %v9387_v48  ;;  %7088 = vmatprep.subr.bf16.mxu1 %v9390_v18 }
 0x622   :  { %7058 = vmatpush1.bf16.msra.mxu0 %v9393_v43  ;;  %7090 = vmatpush1.bf16.msra.mxu1 %v9397_v56 }
 0x6d8   :  { %v1912_v46 = vpop.f32.mrb[10].mxu0  ;;  %v1983_v52 = vpop.f32.mrb[10].mxu1 }
 0x6d9   :  { %v7997_v2 = vadd.f32 %v1912_v46, %v9182_v37  ;;  %v1914_v11 = vpop.f32.mrb[11].mxu0  ;;  %v1985_v12 = vpop.f32.mrb[11].mxu1  ;;  %v8013_v50 = vadd.f32 %v1983_v52, %v9199_v61 }
 0x6da   :  { %v7998_v20 = vadd.f32 %v1914_v11, %v9186_v39  ;;  %v8014_v60 = vadd.f32 %v1985_v12, %v9193_v55  ;;  %v2273_v11 = vld [vmem:[#allocation11 + $0x8] sm:$0xff] }
 0x6db   :  { %v5979_v8 = vmul.f32 -1.442695, %v7997_v2  ;;  %v2277_v12 = vld [vmem:[#allocation11 + $0x28] sm:$0xff] }
 0x6dc   :  { %v5980_v34 = vmul.f32 -1.442695, %v7998_v20  ;;  %v5981_v5 = vmul.f32 -1.442695, %v8014_v60  ;;  %v7091_v20 = vpack.c.bf16 %v2277_v12, %v2273_v11  ;;  %v2276_v60 = vld [vmem:[#allocation11 + $0x20] sm:$0xff]  ;;  %v2286_v11 = vld [vmem:[#allocation11 + $0x70] sm:$0xff] }
 0x6dd   :  { %8222 = vpow2.f32 %v5979_v8  ;;  %v2279_v8 = vld [vmem:[#allocation11 + $0x38] sm:$0xff] }
 0x6de   :  { %8224 = vpow2.f32 %v5980_v34  ;;  %v2272_v34 = vld [vmem:[#allocation11] sm:$0xff]  ;;  %7092 = vmatprep.subr.bf16.mxu0 %v7091_v20 }
 0x6df   :  { %8226 = vpow2.f32 %v5981_v5 }
 0x6e0   :  { %8228 = vtanh.f32 %v8013_v50  ;;  %v7093_v50 = vpack.c.bf16 %v2276_v60, %v2272_v34 }
 0x6e7   :  { %v8223_v7 = vpop.eup %8222 }
 0x6e8   :  { %v8225_v63 = vpop.eup %8224  ;;  %v1995_v6 = vadd.f32 1.0, %v8223_v7  ;;  %v2274_v7 = vld [vmem:[#allocation11 + $0x10] sm:$0xff] }
 0x6e9   :  { %v2001_v16 = vadd.f32 1.0, %v8225_v63  ;;  %v8227_v0 = vpop.eup %8226  ;;  %v2278_v63 = vld [vmem:[#allocation11 + $0x30] sm:$0xff] }
 0x6ea   :  { %8230 = vrcp.f32 %v1995_v6  ;;  %v8229_v19 = vpop.eup %8228  ;;  %v2008_v14 = vadd.f32 1.0, %v8227_v0  ;;  %v7125_v6 = vpack.c.bf16 %v2278_v63, %v2274_v7  ;;  %v2285_v0 = vld [vmem:[#allocation11 + $0x68] sm:$0xff]  ;;  %v2526_v7 = vld [vmem:[#allocation9 + $0x210] sm:$0xff] }
 0x6eb   :  { %8232 = vrcp.f32 %v2001_v16  ;;  %v2281_v16 = vld [vmem:[#allocation11 + $0x48] sm:$0xff]  ;;  %v2530_v63 = vld [vmem:[#allocation9 + $0x230] sm:$0xff] }
 0x6ec   :  { %8234 = vrcp.f32 %v2008_v14  ;;  %v2284_v14 = vld [vmem:[#allocation11 + $0x60] sm:$0xff] }
 0x6f4   :  { %v8231_v25 = vpop.eup %8230 }
 0x6f5   :  { %v8233_v40 = vpop.eup %8232  ;;  %v2013_v62 = vmul.f32 %v8231_v25, %v8229_v19  ;;  %v2283_v19 = vld [vmem:[#allocation11 + $0x58] sm:$0xff]  ;;  %v7095_v25 = vpack.c.bf16 %v2285_v0, %v2281_v16  ;;  %v2537_v16 = vld [vmem:[#allocation9 + $0x268] sm:$0xff] }
 0x6f6   :  { %v2012_v32 = vmul.f32 %v8233_v40, %v9455_v4  ;;  %v8235_v46 = vpop.eup %8234  ;;  %v2275_v4 = vld [vmem:[#allocation11 + $0x18] sm:$0xff] }
 0x6f7   :  { %v7123_v5 = vpack.c.bf16 %v2279_v8, %v2275_v4  ;;  %v2287_v40 = vld [vmem:[#allocation11 + $0x78] sm:$0xff] }
 0x6f8   :  { %v9499_v22 = vadd.f32 %v2013_v62, %v2012_v32  ;;  %v2280_v62 = vld [vmem:[#allocation11 + $0x40] sm:$0xff]  ;;  %v7127_v32 = vpack.c.bf16 %v2287_v40, %v2283_v19  ;;  %v2535_v0 = vld [vmem:[#allocation9 + $0x258] sm:$0xff] }
 0x6f9   :  { %7124 = vmatprep.subr.bf16.mxu1 %v7123_v5  ;;  %v2524_v5 = vld [vmem:[#allocation9 + $0x200] sm:$0xff]  ;;  %v2539_v19 = vld [vmem:[#allocation9 + $0x278] sm:$0xff] }
 0x6fa   :  { %8236 = vtanh.f32 %v9499_v22 }
 0x704   :  { %v8237_v52 = vpop.eup %8236 }
 0x705   :  { %v9502_v2 = vmul.f32 %v8237_v52, %v8235_v46  ;;  %v7097_v46 = vpack.c.bf16 %v2284_v14, %v2280_v62  ;;  %v2282_v52 = vld [vmem:[#allocation11 + $0x50] sm:$0xff]  ;;  %v7189_v14 = vpack.c.bf16 %v2530_v63, %v2526_v7  ;;  %v2556_v63 = vld [vmem:[#allocation9 + $0x300] sm:$0xff] }
 0x706   :  { %v7129_v12 = vpack.c.bf16 %v2286_v11, %v2282_v52  ;;  %v7191_v11 = vpack.c.bf16 %v2539_v19, %v2535_v0  ;;  %v2558_v19 = vld [vmem:[#allocation9 + $0x310] sm:$0xff] }
 0x707   :  { %2156 = vmatmul.mubr.f32.vlgmr.msra.gmra.mrb[12].mxu0 %v9502_v2  ;;  %2227 = vmatmul.mubr.f32.vlgmr.msra.gmra.mrb[12].mxu1 %v9502_v2 }
 0x708   :  { %2400 = vmatprep.mubr.f32.mxu0 %v9324_v24  ;;  %2471 = vmatprep.mubr.f32.mxu1 %v9324_v24 }
 0x709   :  { %7094 = vmatpush1.bf16.msra.mxu0 %v7093_v50  ;;  %7126 = vmatpush1.bf16.msra.mxu1 %v7125_v6  ;;  %v2528_v50 = vld [vmem:[#allocation9 + $0x220] sm:$0xff]  ;;  %v2533_v6 = vld [vmem:[#allocation9 + $0x248] sm:$0xff] }
 0x70a   :  { %7096 = vmatprep.subr.bf16.mxu0 %v7095_v25  ;;  %7128 = vmatprep.subr.bf16.mxu1 %v7127_v32  ;;  %v7157_v62 = vpack.c.bf16 %v2528_v50, %v2524_v5  ;;  %v2532_v32 = vld [vmem:[#allocation9 + $0x240] sm:$0xff]  ;;  %v7159_v52 = vpack.c.bf16 %v2537_v16, %v2533_v6  ;;  %v2563_v5 = vld [vmem:[#allocation9 + $0x338] sm:$0xff] }
 0x70b   :  { %v2560_v6 = vld [vmem:[#allocation9 + $0x320] sm:$0xff] }
 0x70d   :  { %7098 = vmatpush1.bf16.msra.mxu0 %v7097_v46  ;;  %7130 = vmatpush1.bf16.msra.mxu1 %v7129_v12  ;;  %v2536_v46 = vld [vmem:[#allocation9 + $0x260] sm:$0xff]  ;;  %v2534_v12 = vld [vmem:[#allocation9 + $0x250] sm:$0xff] }
 0x70e   :  { %7100 = vmatprep.subr.bf16.mxu0 %v9330_v38  ;;  %7132 = vmatprep.subr.bf16.mxu1 %v9332_v49  ;;  %v2525_v38 = vld [vmem:[#allocation9 + $0x208] sm:$0xff] }
 0x70f   :  { %v2529_v49 = vld [vmem:[#allocation9 + $0x228] sm:$0xff] }
 0x711   :  { %7102 = vmatpush1.bf16.msra.mxu0 %v9334_v51  ;;  %7134 = vmatpush1.bf16.msra.mxu1 %v9337_v1  ;;  %v2527_v51 = vld [vmem:[#allocation9 + $0x218] sm:$0xff] }
 0x712   :  { %7104 = vmatprep.subr.bf16.mxu0 %v9342_v15  ;;  %7136 = vmatprep.subr.bf16.mxu1 %v9344_v10  ;;  %v2531_v1 = vld [vmem:[#allocation9 + $0x238] sm:$0xff]  ;;  %v7155_v15 = vpack.c.bf16 %v2529_v49, %v2525_v38  ;;  %v2538_v38 = vld [vmem:[#allocation9 + $0x270] sm:$0xff]  ;;  %v2541_v49 = vld [vmem:[#allocation9 + $0x288] sm:$0xff] }
 0x713   :  { %v7187_v10 = vpack.c.bf16 %v2531_v1, %v2527_v51  ;;  %v2545_v51 = vld [vmem:[#allocation9 + $0x2a8] sm:$0xff]  ;;  %v2543_v1 = vld [vmem:[#allocation9 + $0x298] sm:$0xff] }
 0x715   :  { %7106 = vmatpush1.bf16.msra.mxu0 %v9346_v13  ;;  %7138 = vmatpush1.bf16.msra.mxu1 %v9349_v23 }
 0x716   :  { %7108 = vmatprep.subr.bf16.mxu0 %v9354_v36  ;;  %7140 = vmatprep.subr.bf16.mxu1 %v9356_v54 }
 0x719   :  { %7110 = vmatpush1.bf16.msra.mxu0 %v9358_v58  ;;  %7142 = vmatpush1.bf16.msra.mxu1 %v9361_v9 }
 0x71a   :  { %7112 = vmatprep.subr.bf16.mxu0 %v9365_v27  ;;  %7144 = vmatprep.subr.bf16.mxu1 %v9368_v47 }
 0x71d   :  { %7114 = vmatpush1.bf16.msra.mxu0 %v9370_v53  ;;  %7146 = vmatpush1.bf16.msra.mxu1 %v9373_v59 }
 0x71e   :  { %7116 = vmatprep.subr.bf16.mxu0 %v9376_v17  ;;  %7148 = vmatprep.subr.bf16.mxu1 %v9378_v3 }
 0x721   :  { %7118 = vmatpush1.bf16.msra.mxu0 %v9381_v26  ;;  %7150 = vmatpush1.bf16.msra.mxu1 %v9385_v44 }
 0x722   :  { %7120 = vmatprep.subr.bf16.mxu0 %v9387_v48  ;;  %7152 = vmatprep.subr.bf16.mxu1 %v9390_v18 }
 0x725   :  { %7122 = vmatpush1.bf16.msra.mxu0 %v9393_v43  ;;  %7154 = vmatpush1.bf16.msra.mxu1 %v9397_v56 }
 0x726   :  { %7156 = vmatprep.subr.bf16.mxu0 %v7155_v15  ;;  %7188 = vmatprep.subr.bf16.mxu1 %v7187_v10  ;;  %v2547_v15 = vld [vmem:[#allocation9 + $0x2b8] sm:$0xff]  ;;  %v7161_v10 = vpack.c.bf16 %v2536_v46, %v2532_v32  ;;  %v7173_v46 = vpack.c.bf16 %v2560_v6, %v2556_v63 }
 0x727   :  { %v2571_v32 = vld [vmem:[#allocation9 + $0x378] sm:$0xff] }
 0x7da   :  { %v2157_v13 = vpop.f32.mrb[12].mxu0  ;;  %v2228_v23 = vpop.f32.mrb[12].mxu1 }
 0x7db   :  { %v7999_v36 = vadd.f32 %v2157_v13, %v9182_v37  ;;  %v2159_v54 = vpop.f32.mrb[13].mxu0  ;;  %v2230_v58 = vpop.f32.mrb[13].mxu1  ;;  %v8015_v17 = vadd.f32 %v2228_v23, %v9199_v61  ;;  %v7193_v13 = vpack.c.bf16 %v2538_v38, %v2534_v12  ;;  %v2540_v23 = vld [vmem:[#allocation9 + $0x280] sm:$0xff] }
 0x7dc   :  { %v8000_v9 = vadd.f32 %v2159_v54, %v9186_v39  ;;  %v8016_v53 = vadd.f32 %v2230_v58, %v9193_v55  ;;  %v7163_v54 = vpack.c.bf16 %v2545_v51, %v2541_v49  ;;  %v7195_v58 = vpack.c.bf16 %v2547_v15, %v2543_v1  ;;  %v2568_v12 = vld [vmem:[#allocation9 + $0x360] sm:$0xff]  ;;  %v2566_v51 = vld [vmem:[#allocation9 + $0x350] sm:$0xff]  ;;  %v2573_v15 = vld [vmem:[#allocation9 + $0x388] sm:$0xff] }
 0x7dd   :  { %v5982_v27 = vmul.f32 -1.442695, %v7999_v36  ;;  %v2544_v36 = vld [vmem:[#allocation9 + $0x2a0] sm:$0xff]  ;;  %v2570_v1 = vld [vmem:[#allocation9 + $0x370] sm:$0xff] }
 0x7de   :  { %v5983_v47 = vmul.f32 -1.442695, %v8000_v9  ;;  %v5984_v59 = vmul.f32 -1.442695, %v8016_v53  ;;  %v2542_v9 = vld [vmem:[#allocation9 + $0x290] sm:$0xff]  ;;  %v2553_v53 = vld [vmem:[#allocation9 + $0x2e8] sm:$0xff] }
 0x7df   :  { %8238 = vpow2.f32 %v5982_v27  ;;  %v2546_v27 = vld [vmem:[#allocation9 + $0x2b0] sm:$0xff] }
 0x7e0   :  { %8240 = vpow2.f32 %v5983_v47  ;;  %v2549_v47 = vld [vmem:[#allocation9 + $0x2c8] sm:$0xff] }
 0x7e1   :  { %8242 = vpow2.f32 %v5984_v59  ;;  %v2551_v59 = vld [vmem:[#allocation9 + $0x2d8] sm:$0xff] }
 0x7e2   :  { %8244 = vtanh.f32 %v8015_v17  ;;  %v2555_v17 = vld [vmem:[#allocation9 + $0x2f8] sm:$0xff] }
 0x7e9   :  { %v8239_v3 = vpop.eup %8238 }
 0x7ea   :  { %v8241_v26 = vpop.eup %8240  ;;  %v2240_v44 = vadd.f32 1.0, %v8239_v3  ;;  %v7165_v3 = vpack.c.bf16 %v2544_v36, %v2540_v23  ;;  %v2579_v23 = vld [vmem:[#allocation9 + $0x3b8] sm:$0xff] }
 0x7eb   :  { %v2246_v48 = vadd.f32 1.0, %v8241_v26  ;;  %v8243_v18 = vpop.eup %8242  ;;  %v7197_v26 = vpack.c.bf16 %v2546_v27, %v2542_v9  ;;  %v2576_v9 = vld [vmem:[#allocation9 + $0x3a0] sm:$0xff] }
 0x7ec   :  { %8246 = vrcp.f32 %v2240_v44  ;;  %v8245_v43 = vpop.eup %8244  ;;  %v2253_v8 = vadd.f32 1.0, %v8243_v18  ;;  %v2548_v44 = vld [vmem:[#allocation9 + $0x2c0] sm:$0xff]  ;;  %v7167_v18 = vpack.c.bf16 %v2553_v53, %v2549_v47  ;;  %v2574_v53 = vld [vmem:[#allocation9 + $0x390] sm:$0xff] }
 0x7ed   :  { %8248 = vrcp.f32 %v2246_v48  ;;  %v2552_v48 = vld [vmem:[#allocation9 + $0x2e0] sm:$0xff] }
 0x7ee   :  { %8250 = vrcp.f32 %v2253_v8  ;;  %v2561_v8 = vld [vmem:[#allocation9 + $0x328] sm:$0xff]  ;;  %v7169_v50 = vpack.c.bf16 %v2552_v48, %v2548_v44  ;;  %v2587_v44 = vld [vmem:[#allocation9 + $0x3f8] sm:$0xff] }
 0x7f6   :  { %v8247_v56 = vpop.eup %8246 }
 0x7f7   :  { %v8249_v4 = vpop.eup %8248  ;;  %v2258_v20 = vmul.f32 %v8247_v56, %v8245_v43  ;;  %v7199_v43 = vpack.c.bf16 %v2555_v17, %v2551_v59  ;;  %v2550_v56 = vld [vmem:[#allocation9 + $0x2d0] sm:$0xff]  ;;  %v2581_v17 = vld [vmem:[#allocation9 + $0x3c8] sm:$0xff] }
 0x7f8   :  { %v2257_v34 = vmul.f32 %v8249_v4, %v9499_v22  ;;  %v8251_v25 = vpop.eup %8250  ;;  %v2554_v4 = vld [vmem:[#allocation9 + $0x2f0] sm:$0xff] }
 0x7f9   :  { %v7201_v7 = vpack.c.bf16 %v2554_v4, %v2550_v56  ;;  %v2578_v59 = vld [vmem:[#allocation9 + $0x3b0] sm:$0xff] }
 0x7fa   :  { %v9537_v60 = vadd.f32 %v2258_v20, %v2257_v34  ;;  %v2557_v20 = vld [vmem:[#allocation9 + $0x308] sm:$0xff]  ;;  %v2559_v34 = vld [vmem:[#allocation9 + $0x318] sm:$0xff] }
 0x7fb   :  { %v7171_v16 = vpack.c.bf16 %v2561_v8, %v2557_v20  ;;  %v7203_v0 = vpack.c.bf16 %v2563_v5, %v2559_v34  ;;  %v2584_v20 = vld [vmem:[#allocation9 + $0x3e0] sm:$0xff]  ;;  %v2582_v8 = vld [vmem:[#allocation9 + $0x3d0] sm:$0xff] }
 0x7fc   :  { %8252 = vtanh.f32 %v9537_v60  ;;  %v2586_v34 = vld [vmem:[#allocation9 + $0x3f0] sm:$0xff] }
 0x806   :  { %v8253_v40 = vpop.eup %8252 }
 0x807   :  { %v9540_v22 = vmul.f32 %v8253_v40, %v8251_v25  ;;  %v2562_v25 = vld [vmem:[#allocation9 + $0x330] sm:$0xff]  ;;  %v2565_v40 = vld [vmem:[#allocation9 + $0x348] sm:$0xff] }
 0x809   :  { %2401 = vmatmul.mubr.f32.vlgmr.msra.gmra.mrb[14].mxu0 %v9540_v22  ;;  %2472 = vmatmul.mubr.f32.vlgmr.msra.gmra.mrb[14].mxu1 %v9540_v22 }
 0x80a   :  { %7158 = vmatpush1.bf16.msra.mxu0 %v7157_v62  ;;  %7190 = vmatpush1.bf16.msra.mxu1 %v7189_v14  ;;  %v2569_v62 = vld [vmem:[#allocation9 + $0x368] sm:$0xff]  ;;  %v2567_v14 = vld [vmem:[#allocation9 + $0x358] sm:$0xff] }
 0x80b   :  { %7160 = vmatprep.subr.bf16.mxu0 %v7159_v52  ;;  %7192 = vmatprep.subr.bf16.mxu1 %v7191_v11  ;;  %v7205_v52 = vpack.c.bf16 %v2562_v25, %v2558_v19  ;;  %v2564_v11 = vld [vmem:[#allocation9 + $0x340] sm:$0xff]  ;;  %v7175_v38 = vpack.c.bf16 %v2569_v62, %v2565_v40  ;;  %v7207_v49 = vpack.c.bf16 %v2571_v32, %v2567_v14  ;;  %v2890_v19 = vld [vmem:[#allocation11 + $0x248] sm:$0xff]  ;;  %v2892_v40 = vld [vmem:[#allocation11 + $0x258] sm:$0xff] }
 0x80c   :  { %2675 = vmatprep.mubr.f32.mxu0 %v9324_v24  ;;  %2788 = vmatprep.mubr.f32.mxu1 %v9324_v24  ;;  %v7177_v36 = vpack.c.bf16 %v2568_v12, %v2564_v11  ;;  %v2894_v25 = vld [vmem:[#allocation11 + $0x268] sm:$0xff]  ;;  %v2896_v14 = vld [vmem:[#allocation11 + $0x278] sm:$0xff]  ;;  %v2889_v32 = vld [vmem:[#allocation11 + $0x240] sm:$0xff] }
 0x80d   :  { %v9588_v62 = vpack.c.bf16 %v2894_v25, %v2890_v19  ;;  %v2891_v12 = vld [vmem:[#allocation11 + $0x250] sm:$0xff]  ;;  %v2926_v19 = vld [vmem:[#allocation11 + $0x368] sm:$0xff] }
 0x80e   :  { %7162 = vmatpush1.bf16.msra.mxu0 %v7161_v10  ;;  %7194 = vmatpush1.bf16.msra.mxu1 %v7193_v13  ;;  %v2577_v10 = vld [vmem:[#allocation9 + $0x3a8] sm:$0xff]  ;;  %v2575_v13 = vld [vmem:[#allocation9 + $0x398] sm:$0xff] }
 0x80f   :  { %7164 = vmatprep.subr.bf16.mxu0 %v7163_v54  ;;  %7196 = vmatprep.subr.bf16.mxu1 %v7195_v58  ;;  %v7209_v54 = vpack.c.bf16 %v2570_v1, %v2566_v51  ;;  %v2572_v58 = vld [vmem:[#allocation9 + $0x380] sm:$0xff]  ;;  %v7179_v27 = vpack.c.bf16 %v2577_v10, %v2573_v15  ;;  %v7211_v47 = vpack.c.bf16 %v2579_v23, %v2575_v13  ;;  %v2898_v51 = vld [vmem:[#allocation11 + $0x288] sm:$0xff]  ;;  %v2900_v15 = vld [vmem:[#allocation11 + $0x298] sm:$0xff] }
 0x810   :  { %v7181_v48 = vpack.c.bf16 %v2576_v9, %v2572_v58  ;;  %v2902_v1 = vld [vmem:[#allocation11 + $0x2a8] sm:$0xff]  ;;  %v2904_v13 = vld [vmem:[#allocation11 + $0x2b8] sm:$0xff]  ;;  %v2897_v23 = vld [vmem:[#allocation11 + $0x280] sm:$0xff] }
 0x811   :  { %v9600_v10 = vpack.c.bf16 %v2902_v1, %v2898_v51  ;;  %v2899_v9 = vld [vmem:[#allocation11 + $0x290] sm:$0xff] }
 0x812   :  { %7166 = vmatpush1.bf16.msra.mxu0 %v7165_v3  ;;  %7198 = vmatpush1.bf16.msra.mxu1 %v7197_v26  ;;  %v2585_v3 = vld [vmem:[#allocation9 + $0x3e8] sm:$0xff]  ;;  %v2583_v26 = vld [vmem:[#allocation9 + $0x3d8] sm:$0xff]  ;;  %v2923_v51 = vld [vmem:[#allocation11 + $0x350] sm:$0xff] }
 0x813   :  { %7168 = vmatprep.subr.bf16.mxu0 %v7167_v18  ;;  %7200 = vmatprep.subr.bf16.mxu1 %v7199_v43  ;;  %v7213_v18 = vpack.c.bf16 %v2578_v59, %v2574_v53  ;;  %v2580_v43 = vld [vmem:[#allocation9 + $0x3c0] sm:$0xff]  ;;  %v7183_v56 = vpack.c.bf16 %v2585_v3, %v2581_v17  ;;  %v7215_v4 = vpack.c.bf16 %v2587_v44, %v2583_v26  ;;  %v2906_v53 = vld [vmem:[#allocation11 + $0x2c8] sm:$0xff]  ;;  %v2908_v17 = vld [vmem:[#allocation11 + $0x2d8] sm:$0xff] }
 0x814   :  { %v7185_v5 = vpack.c.bf16 %v2584_v20, %v2580_v43  ;;  %v2910_v59 = vld [vmem:[#allocation11 + $0x2e8] sm:$0xff]  ;;  %v2912_v26 = vld [vmem:[#allocation11 + $0x2f8] sm:$0xff]  ;;  %v2905_v44 = vld [vmem:[#allocation11 + $0x2c0] sm:$0xff] }
 0x815   :  { %v9612_v3 = vpack.c.bf16 %v2910_v59, %v2906_v53  ;;  %v2914_v20 = vld [vmem:[#allocation11 + $0x308] sm:$0xff]  ;;  %v2927_v1 = vld [vmem:[#allocation11 + $0x370] sm:$0xff]  ;;  %v2936_v53 = vld [vmem:[#allocation11 + $0x3b8] sm:$0xff] }
 0x816   :  { %7170 = vmatpush1.bf16.msra.mxu0 %v7169_v50  ;;  %7202 = vmatpush1.bf16.msra.mxu1 %v7201_v7  ;;  %v7217_v50 = vpack.c.bf16 %v2586_v34, %v2582_v8  ;;  %v2881_v7 = vld [vmem:[#allocation11 + $0x200] sm:$0xff]  ;;  %v2918_v34 = vld [vmem:[#allocation11 + $0x328] sm:$0xff] }
 0x817   :  { %7172 = vmatprep.subr.bf16.mxu0 %v7171_v16  ;;  %7204 = vmatprep.subr.bf16.mxu1 %v7203_v0  ;;  %v2883_v16 = vld [vmem:[#allocation11 + $0x210] sm:$0xff]  ;;  %v2929_v59 = vld [vmem:[#allocation11 + $0x380] sm:$0xff] }
 0x818   :  { %v2887_v0 = vld [vmem:[#allocation11 + $0x230] sm:$0xff] }
 0x81a   :  { %7174 = vmatpush1.bf16.msra.mxu0 %v7173_v46  ;;  %7206 = vmatpush1.bf16.msra.mxu1 %v7205_v52  ;;  %v2893_v46 = vld [vmem:[#allocation11 + $0x260] sm:$0xff]  ;;  %v9590_v52 = vpack.c.bf16 %v2896_v14, %v2892_v40  ;;  %v2924_v14 = vld [vmem:[#allocation11 + $0x358] sm:$0xff] }
 0x81b   :  { %7176 = vmatprep.subr.bf16.mxu0 %v7175_v38  ;;  %7208 = vmatprep.subr.bf16.mxu1 %v7207_v49  ;;  %v9592_v11 = vpack.c.bf16 %v2893_v46, %v2889_v32  ;;  %v2895_v38 = vld [vmem:[#allocation11 + $0x270] sm:$0xff]  ;;  %v2928_v32 = vld [vmem:[#allocation11 + $0x378] sm:$0xff]  ;;  %v2921_v46 = vld [vmem:[#allocation11 + $0x340] sm:$0xff] }
 0x81c   :  { %v9595_v49 = vpack.c.bf16 %v2895_v38, %v2891_v12  ;;  %v9636_v12 = vpack.c.bf16 %v2928_v32, %v2924_v14  ;;  %v2925_v38 = vld [vmem:[#allocation11 + $0x360] sm:$0xff]  ;;  %v2943_v14 = vld [vmem:[#allocation11 + $0x3f0] sm:$0xff] }
 0x81e   :  { %7178 = vmatpush1.bf16.msra.mxu0 %v7177_v36  ;;  %7210 = vmatpush1.bf16.msra.mxu1 %v7209_v54  ;;  %v2901_v36 = vld [vmem:[#allocation11 + $0x2a0] sm:$0xff]  ;;  %v9602_v54 = vpack.c.bf16 %v2904_v13, %v2900_v15  ;;  %v9639_v15 = vpack.c.bf16 %v2925_v38, %v2921_v46  ;;  %v2930_v13 = vld [vmem:[#allocation11 + $0x388] sm:$0xff] }
 0x81f   :  { %7180 = vmatprep.subr.bf16.mxu0 %v7179_v27  ;;  %7212 = vmatprep.subr.bf16.mxu1 %v7211_v47  ;;  %v9604_v58 = vpack.c.bf16 %v2901_v36, %v2897_v23  ;;  %v2903_v27 = vld [vmem:[#allocation11 + $0x2b0] sm:$0xff]  ;;  %v2934_v23 = vld [vmem:[#allocation11 + $0x3a8] sm:$0xff]  ;;  %v2932_v36 = vld [vmem:[#allocation11 + $0x398] sm:$0xff] }
 0x820   :  { %v9607_v47 = vpack.c.bf16 %v2903_v27, %v2899_v9  ;;  %v9643_v9 = vpack.c.bf16 %v2927_v1, %v2923_v51  ;;  %v9645_v27 = vpack.c.bf16 %v2934_v23, %v2930_v13 }
 0x822   :  { %7182 = vmatpush1.bf16.msra.mxu0 %v7181_v48  ;;  %7214 = vmatpush1.bf16.msra.mxu1 %v7213_v18  ;;  %v2909_v48 = vld [vmem:[#allocation11 + $0x2e0] sm:$0xff]  ;;  %v9614_v18 = vpack.c.bf16 %v2912_v26, %v2908_v17  ;;  %v9648_v26 = vpack.c.bf16 %v2936_v53, %v2932_v36 }
 0x823   :  { %7184 = vmatprep.subr.bf16.mxu0 %v7183_v56  ;;  %7216 = vmatprep.subr.bf16.mxu1 %v7215_v4  ;;  %v9616_v43 = vpack.c.bf16 %v2909_v48, %v2905_v44  ;;  %v2907_v56 = vld [vmem:[#allocation11 + $0x2d0] sm:$0xff]  ;;  %v2933_v17 = vld [vmem:[#allocation11 + $0x3a0] sm:$0xff] }
 0x824   :  { %v2911_v4 = vld [vmem:[#allocation11 + $0x2f0] sm:$0xff] }
 0x825   :  { %v9619_v8 = vpack.c.bf16 %v2911_v4, %v2907_v56  ;;  %v2931_v44 = vld [vmem:[#allocation11 + $0x390] sm:$0xff]  ;;  %v9651_v56 = vpack.c.bf16 %v2933_v17, %v2929_v59 }
 0x826   :  { %7186 = vmatpush1.bf16.msra.mxu0 %v7185_v5  ;;  %7218 = vmatpush1.bf16.msra.mxu1 %v7217_v50  ;;  %v2916_v5 = vld [vmem:[#allocation11 + $0x318] sm:$0xff]  ;;  %v2935_v48 = vld [vmem:[#allocation11 + $0x3b0] sm:$0xff] }
 0x827   :  { %v2920_v50 = vld [vmem:[#allocation11 + $0x338] sm:$0xff]  ;;  %v9655_v4 = vpack.c.bf16 %v2935_v48, %v2931_v44 }
 0x829   :  { %2676 = vmatmul.mubr.f32.vlgmr.msra.gmra.mrb[16].mxu0 %v9208_v45  ;;  %2789 = vmatmul.mubr.f32.vlgmr.msra.gmra.mrb[16].mxu1 %v9208_v45  ;;  %v9560_v45 = vld [vmem:[#allocation23 + $0x10] sm:$0xff] }
 0x82a   :  { %2681 = vmatprep.mubr.f32.mxu0 %v9324_v24  ;;  %2794 = vmatprep.mubr.f32.mxu1 %v9324_v24 }
 0x82d   :  { %2682 = vmatmul.mubr.f32.gmra.mrb[18].mxu0 %v9252_v42  ;;  %2795 = vmatmul.mubr.f32.gmra.mrb[18].mxu1 %v9252_v42  ;;  %v2882_v42 = vld [vmem:[#allocation11 + $0x208] sm:$0xff] }
 0x82e   :  { %2687 = vmatprep.mubr.f32.mxu0 %v9324_v24  ;;  %2800 = vmatprep.mubr.f32.mxu1 %v9324_v24 }
 0x831   :  { %2688 = vmatmul.mubr.f32.gmra.mrb[20].mxu0 %v9316_v28  ;;  %2801 = vmatmul.mubr.f32.gmra.mrb[20].mxu1 %v9316_v28  ;;  %v2886_v28 = vld [vmem:[#allocation11 + $0x228] sm:$0xff] }
 0x832   :  { %2693 = vmatprep.mubr.f32.mxu0 %v9324_v24  ;;  %2806 = vmatprep.mubr.f32.mxu1 %v9324_v24  ;;  %v2884_v24 = vld [vmem:[#allocation11 + $0x218] sm:$0xff] }
 0x835   :  { %2694 = vmatmul.mubr.f32.gmra.mrb[22].mxu0 %v9412_v29  ;;  %2807 = vmatmul.mubr.f32.gmra.mrb[22].mxu1 %v9412_v29  ;;  %v9576_v29 = vpack.c.bf16 %v2886_v28, %v2882_v42  ;;  %v9623_v42 = vpack.c.bf16 %v2918_v34, %v2914_v20  ;;  %v9625_v28 = vpack.c.bf16 %v2920_v50, %v2916_v5  ;;  %v2938_v20 = vld [vmem:[#allocation11 + $0x3c8] sm:$0xff]  ;;  %v2940_v5 = vld [vmem:[#allocation11 + $0x3d8] sm:$0xff] }
 0x836   :  { %2699 = vmatprep.mubr.f32.mxu0 %v9560_v45  ;;  %2812 = vmatprep.mubr.f32.mxu1 %v9560_v45  ;;  %v2942_v34 = vld [vmem:[#allocation11 + $0x3e8] sm:$0xff] }
 0x837   :  { %7220 = vmatprep.subr.bf16.mxu0 %v9576_v29  ;;  %v9660_v50 = vpack.c.bf16 %v2942_v34, %v2938_v20 }
 0x839   :  { %2700 = vmatmul.mubr.f32.gmra.mrb[24].mxu0 %v9458_v21  ;;  %2813 = vmatmul.mubr.f32.gmra.mrb[24].mxu1 %v9458_v21  ;;  %v2888_v21 = vld [vmem:[#allocation11 + $0x238] sm:$0xff] }
 0x83a   :  { %2705 = vmatprep.mubr.f32.mxu0 %v9560_v45  ;;  %2818 = vmatprep.mubr.f32.mxu1 %v9560_v45  ;;  %v9578_v63 = vpack.c.bf16 %v2888_v21, %v2884_v24  ;;  %v2913_v24 = vld [vmem:[#allocation11 + $0x300] sm:$0xff] }
 0x83b   :  { %v2917_v21 = vld [vmem:[#allocation11 + $0x320] sm:$0xff] }
 0x83c   :  { %7252 = vmatprep.subr.bf16.mxu1 %v9578_v63 }
 0x83d   :  { %2706 = vmatmul.mubr.f32.gmra.mrb[26].mxu0 %v9502_v2  ;;  %2819 = vmatmul.mubr.f32.gmra.mrb[26].mxu1 %v9502_v2  ;;  %v2885_v2 = vld [vmem:[#allocation11 + $0x220] sm:$0xff] }
 0x83e   :  { %2711 = vmatprep.mubr.f32.mxu0 %v9560_v45  ;;  %2824 = vmatprep.mubr.f32.mxu1 %v9560_v45  ;;  %v9580_v6 = vpack.c.bf16 %v2885_v2, %v2881_v7  ;;  %v2915_v7 = vld [vmem:[#allocation11 + $0x310] sm:$0xff]  ;;  %v9628_v2 = vpack.c.bf16 %v2917_v21, %v2913_v24  ;;  %v2944_v24 = vld [vmem:[#allocation11 + $0x3f8] sm:$0xff]  ;;  %v2937_v21 = vld [vmem:[#allocation11 + $0x3c0] sm:$0xff] }
 0x840   :  { %7222 = vmatpush1.bf16.msra.mxu0 %v9580_v6 }
 0x841   :  { %2712 = vmatmul.mubr.f32.gmra.mrb[28].mxu0 %v9540_v22  ;;  %2825 = vmatmul.mubr.f32.gmra.mrb[28].mxu1 %v9540_v22  ;;  %v9583_v22 = vpack.c.bf16 %v2887_v0, %v2883_v16  ;;  %v2919_v16 = vld [vmem:[#allocation11 + $0x330] sm:$0xff]  ;;  %v2922_v0 = vld [vmem:[#allocation11 + $0x348] sm:$0xff] }
 0x842   :  { %2717 = vmatprep.mubr.f32.mxu0 %v9560_v45  ;;  %2830 = vmatprep.mubr.f32.mxu1 %v9560_v45  ;;  %v9632_v25 = vpack.c.bf16 %v2919_v16, %v2915_v7  ;;  %v9634_v40 = vpack.c.bf16 %v2926_v19, %v2922_v0  ;;  %v2941_v7 = vld [vmem:[#allocation11 + $0x3e0] sm:$0xff]  ;;  %v9662_v16 = vpack.c.bf16 %v2944_v24, %v2940_v5  ;;  %v2939_v19 = vld [vmem:[#allocation11 + $0x3d0] sm:$0xff] }
 0x843   :  { %7254 = vmatpush1.bf16.msra.mxu1 %v9583_v22  ;;  %7224 = vmatprep.subr.bf16.mxu0 %v9588_v62  ;;  %v9664_v0 = vpack.c.bf16 %v2941_v7, %v2937_v21  ;;  %v9667_v32 = vpack.c.bf16 %v2943_v14, %v2939_v19 }
 0x844   :  { %7256 = vmatprep.subr.bf16.mxu1 %v9590_v52  ;;  %7226 = vmatpush1.bf16.msra.mxu0 %v9592_v11 }
 0x845   :  { %7228 = vmatprep.subr.bf16.mxu0 %v9600_v10 }
 0x847   :  { %7258 = vmatpush1.bf16.msra.mxu1 %v9595_v49 }
 0x848   :  { %7260 = vmatprep.subr.bf16.mxu1 %v9602_v54  ;;  %7230 = vmatpush1.bf16.msra.mxu0 %v9604_v58 }
 0x849   :  { %7232 = vmatprep.subr.bf16.mxu0 %v9612_v3 }
 0x84b   :  { %7262 = vmatpush1.bf16.msra.mxu1 %v9607_v47 }
 0x84c   :  { %7264 = vmatprep.subr.bf16.mxu1 %v9614_v18  ;;  %7234 = vmatpush1.bf16.msra.mxu0 %v9616_v43 }
 0x84d   :  { %7236 = vmatprep.subr.bf16.mxu0 %v9623_v42 }
 0x84f   :  { %7266 = vmatpush1.bf16.msra.mxu1 %v9619_v8 }
 0x850   :  { %7268 = vmatprep.subr.bf16.mxu1 %v9625_v28  ;;  %7238 = vmatpush1.bf16.msra.mxu0 %v9628_v2 }
 0x851   :  { %7240 = vmatprep.subr.bf16.mxu0 %v9634_v40 }
 0x853   :  { %7270 = vmatpush1.bf16.msra.mxu1 %v9632_v25 }
 0x854   :  { %7272 = vmatprep.subr.bf16.mxu1 %v9636_v12  ;;  %7242 = vmatpush1.bf16.msra.mxu0 %v9639_v15 }
 0x855   :  { %7244 = vmatprep.subr.bf16.mxu0 %v9645_v27 }
 0x857   :  { %7274 = vmatpush1.bf16.msra.mxu1 %v9643_v9 }
 0x858   :  { %7276 = vmatprep.subr.bf16.mxu1 %v9648_v26  ;;  %7246 = vmatpush1.bf16.msra.mxu0 %v9651_v56 }
 0x859   :  { %7248 = vmatprep.subr.bf16.mxu0 %v9660_v50 }
 0x85b   :  { %7278 = vmatpush1.bf16.msra.mxu1 %v9655_v4 }
 0x85c   :  { %7280 = vmatprep.subr.bf16.mxu1 %v9662_v16  ;;  %7250 = vmatpush1.bf16.msra.mxu0 %v9664_v0 }
 0x85d   :  { %7284 = vmatprep.subr.bf16.mxu0 %v9576_v29 }
 0x85f   :  { %7282 = vmatpush1.bf16.msra.mxu1 %v9667_v32 }
 0x860   :  { %7316 = vmatprep.subr.bf16.mxu1 %v9578_v63 }
 0x8dc   :  { %v2402_v46 = vpop.f32.mrb[14].mxu0  ;;  %v2473_v38 = vpop.f32.mrb[14].mxu1 }
 0x8dd   :  { %v8001_v51 = vadd.f32 %v2402_v46, %v9182_v37  ;;  %v2404_v1 = vpop.f32.mrb[15].mxu0  ;;  %v2475_v13 = vpop.f32.mrb[15].mxu1  ;;  %v8017_v44 = vadd.f32 %v2473_v38, %v9199_v61 }
 0x8de   :  { %v8002_v23 = vadd.f32 %v2404_v1, %v9186_v39  ;;  %v8018_v59 = vadd.f32 %v2475_v13, %v9193_v55 }
 0x8df   :  { %v5985_v36 = vmul.f32 -1.442695, %v8001_v51  ;;  %v2870_v51 = vld [vmem:[#allocation14 + $0x8] sm:$0xff] }
 0x8e0   :  { %v5986_v53 = vmul.f32 -1.442695, %v8002_v23  ;;  %v5987_v17 = vmul.f32 -1.442695, %v8018_v59 }
 0x8e1   :  { %8254 = vpow2.f32 %v5985_v36 }
 0x8e2   :  { %8256 = vpow2.f32 %v5986_v53 }
 0x8e3   :  { %8258 = vpow2.f32 %v5987_v17 }
 0x8e4   :  { %8260 = vtanh.f32 %v8017_v44 }
 0x8eb   :  { %v8255_v48 = vpop.eup %8254 }
 0x8ec   :  { %v8257_v20 = vpop.eup %8256  ;;  %v2485_v34 = vadd.f32 1.0, %v8255_v48 }
 0x8ed   :  { %v2491_v5 = vadd.f32 1.0, %v8257_v20  ;;  %v8259_v37 = vpop.eup %8258 }
 0x8ee   :  { %8262 = vrcp.f32 %v2485_v34  ;;  %v8261_v24 = vpop.eup %8260  ;;  %v2498_v19 = vadd.f32 1.0, %v8259_v37 }
 0x8ef   :  { %8264 = vrcp.f32 %v2491_v5 }
 0x8f0   :  { %8266 = vrcp.f32 %v2498_v19 }
 0x8f8   :  { %v8263_v39 = vpop.eup %8262 }
 0x8f9   :  { %v8265_v21 = vpop.eup %8264  ;;  %v2503_v7 = vmul.f32 %v8263_v39, %v8261_v24 }
 0x8fa   :  { %v2502_v14 = vmul.f32 %v8265_v21, %v9537_v60  ;;  %v8267_v61 = vpop.eup %8266  ;;  %v2589_v60 = vld [vmem:[#allocation12 + $0x4] sm:$0xf] }
 0x8fb   :  { %v9717_v1 = vrot.slane %v2589_v60, %v273_v33  ;;  %v9721_v13 = vrot.slane %v2589_v60, %v277_v35  ;;  %v9727_v34 = vrot.slane %v2589_v60, %v285_v41  ;;  %v9732_v35 = vrot.slane %v2589_v60, %v281_v57 }
 0x8fc   :  { %v2504_v55 = vadd.f32 %v2503_v7, %v2502_v14  ;;  %v5988_v14 = vld [vmem:[%s10367_s5 + $0x8] sm:$0xff]  ;;  %s8759_s5 = smov [#allocation24]  }
 0x8fd   :  { %s5912_s27 = sshll.u32 %s8759_s5, 4  ;;  %s5913_s27 = int_to_ptr.vmem [resolvable:$true] %s5912_s27 }
 0x8fe   :  { %8268 = vtanh.f32 %v2504_v55  ;;  %2514 = vst [vmem:[#allocation27] sm:$0xff] %v2504_v55  ;;  %s8634_s20 = scalar_lea.vmem %s5913_s27, 1024  ;;  %p8639_p11 = scmp.lt.s32.totalorder %s5913_s27, %s5913_s27 }
 0x8ff   :  { %p8635_p10 = scmp.ne.s32.totalorder %s5913_s27, %s8634_s20  ;;  %p8640_p12 = scmp.lt.s32.totalorder %s8634_s20, %s8634_s20 }
 0x901   :  { %p8641_p13 = por %p8640_p12, %p8639_p11 }
 0x903   :  { %p8642_p0 = pnand %p8641_p13, %p8635_p10 }
 0x908   :  { %v8269_v46 = vpop.eup %8268 }
 0x909   :  { %v2506_v38 = vmul.f32 %v8269_v46, %v8267_v61 }
 0x90b   :  { %2718 = vmatmul.mubr.f32.gmra.mrb[30].mxu0 %v2506_v38  ;;  %2512 = vst [vmem:[#allocation26] sm:$0xff] %v2506_v38  ;;  %2831 = vmatmul.mubr.f32.gmra.mrb[30].mxu1 %v2506_v38 }
 0x90c   :  { %3009 = vmatprep.mubr.f32.mxu0 %v9560_v45  ;;  %3080 = vmatprep.mubr.f32.mxu1 %v9560_v45 }
 0x90f   :  { %3010 = vmatmul.mubr.f32.vlgmr.msra.gmra.mrb[16].mxu0 %v2870_v51  ;;  %3081 = vmatmul.mubr.f32.vlgmr.msra.gmra.mrb[16].mxu1 %v2870_v51 }
 0x910   :  { %7286 = vmatpush1.bf16.msra.mxu0 %v9580_v6  ;;  %7318 = vmatpush1.bf16.msra.mxu1 %v9583_v22 }
 0x911   :  { %7288 = vmatprep.subr.bf16.mxu0 %v9588_v62  ;;  %7320 = vmatprep.subr.bf16.mxu1 %v9590_v52 }
 0x912   :  { %3252 = vmatprep.mubr.f32.mxu0 %v9560_v45  ;;  %3323 = vmatprep.mubr.f32.mxu1 %v9560_v45 }
 0x914   :  { %7290 = vmatpush1.bf16.msra.mxu0 %v9592_v11  ;;  %7322 = vmatpush1.bf16.msra.mxu1 %v9595_v49 }
 0x915   :  { %7292 = vmatprep.subr.bf16.mxu0 %v9600_v10  ;;  %7324 = vmatprep.subr.bf16.mxu1 %v9602_v54 }
 0x918   :  { %7294 = vmatpush1.bf16.msra.mxu0 %v9604_v58  ;;  %7326 = vmatpush1.bf16.msra.mxu1 %v9607_v47 }
 0x919   :  { %7296 = vmatprep.subr.bf16.mxu0 %v9612_v3  ;;  %7328 = vmatprep.subr.bf16.mxu1 %v9614_v18 }
 0x91c   :  { %7298 = vmatpush1.bf16.msra.mxu0 %v9616_v43  ;;  %7330 = vmatpush1.bf16.msra.mxu1 %v9619_v8 }
 0x91d   :  { %7300 = vmatprep.subr.bf16.mxu0 %v9623_v42  ;;  %7332 = vmatprep.subr.bf16.mxu1 %v9625_v28 }
 0x920   :  { %7302 = vmatpush1.bf16.msra.mxu0 %v9628_v2  ;;  %7334 = vmatpush1.bf16.msra.mxu1 %v9632_v25 }
 0x921   :  { %7304 = vmatprep.subr.bf16.mxu0 %v9634_v40  ;;  %7336 = vmatprep.subr.bf16.mxu1 %v9636_v12 }
 0x924   :  { %7306 = vmatpush1.bf16.msra.mxu0 %v9639_v15  ;;  %7338 = vmatpush1.bf16.msra.mxu1 %v9643_v9 }
 0x925   :  { %7308 = vmatprep.subr.bf16.mxu0 %v9645_v27  ;;  %7340 = vmatprep.subr.bf16.mxu1 %v9648_v26 }
 0x928   :  { %7310 = vmatpush1.bf16.msra.mxu0 %v9651_v56  ;;  %7342 = vmatpush1.bf16.msra.mxu1 %v9655_v4 }
 0x929   :  { %7312 = vmatprep.subr.bf16.mxu0 %v9660_v50  ;;  %7344 = vmatprep.subr.bf16.mxu1 %v9662_v16 }
 0x92c   :  { %7314 = vmatpush1.bf16.msra.mxu0 %v9664_v0  ;;  %7346 = vmatpush1.bf16.msra.mxu1 %v9667_v32 }
 0x92d   :  { %7348 = vmatprep.subr.bf16.mxu0 %v9576_v29  ;;  %7380 = vmatprep.subr.bf16.mxu1 %v9578_v63 }
 0x9e2   :  { %v3011_v23 = vpop.f32.mrb[16].mxu0  ;;  %v3082_v36 = vpop.f32.mrb[16].mxu1 }
 0x9e3   :  { %v8019_v53 = vadd.f32 %v3011_v23, %v9717_v1  ;;  %v3013_v59 = vpop.f32.mrb[17].mxu0  ;;  %v3084_v17 = vpop.f32.mrb[17].mxu1  ;;  %v8035_v37 = vadd.f32 %v3082_v36, %v9732_v35 }
 0x9e4   :  { %v8020_v44 = vadd.f32 %v3013_v59, %v9721_v13  ;;  %v8036_v33 = vadd.f32 %v3084_v17, %v9727_v34 }
 0x9e5   :  { %v5989_v48 = vmul.f32 -1.442695, %v8019_v53 }
 0x9e6   :  { %v5990_v20 = vmul.f32 -1.442695, %v8020_v44  ;;  %v5991_v5 = vmul.f32 -1.442695, %v8036_v33 }
 0x9e7   :  { %8270 = vpow2.f32 %v5989_v48 }
 0x9e8   :  { %8272 = vpow2.f32 %v5990_v20 }
 0x9e9   :  { %8274 = vpow2.f32 %v5991_v5 }
 0x9ea   :  { %8276 = vtanh.f32 %v8035_v37 }
 0x9f1   :  { %v8271_v24 = vpop.eup %8270 }
 0x9f2   :  { %v8273_v39 = vpop.eup %8272  ;;  %v3094_v21 = vadd.f32 1.0, %v8271_v24 }
 0x9f3   :  { %v3100_v7 = vadd.f32 1.0, %v8273_v39  ;;  %v8275_v41 = vpop.eup %8274 }
 0x9f4   :  { %8278 = vrcp.f32 %v3094_v21  ;;  %v8277_v19 = vpop.eup %8276  ;;  %v3107_v46 = vadd.f32 1.0, %v8275_v41 }
 0x9f5   :  { %8280 = vrcp.f32 %v3100_v7 }
 0x9f6   :  { %8282 = vrcp.f32 %v3107_v46 }
 0x9fe   :  { %v8279_v55 = vpop.eup %8278 }
 0x9ff   :  { %v8281_v57 = vpop.eup %8280  ;;  %v3112_v61 = vmul.f32 %v8279_v55, %v8277_v19 }
 0xa00   :  { %v3111_v38 = vmul.f32 %v8281_v57, %v5988_v14  ;;  %v8283_v60 = vpop.eup %8282 }
 0xa02   :  { %v9738_v51 = vadd.f32 %v3112_v61, %v3111_v38 }
 0xa04   :  { %8284 = vtanh.f32 %v9738_v51 }
 0xa0e   :  { %v8285_v23 = vpop.eup %8284 }
 0xa0f   :  { %v9741_v36 = vmul.f32 %v8285_v23, %v8283_v60 }
 0xa11   :  { %3253 = vmatmul.mubr.f32.vlgmr.msra.gmra.mrb[18].mxu0 %v9741_v36  ;;  %3324 = vmatmul.mubr.f32.vlgmr.msra.gmra.mrb[18].mxu1 %v9741_v36 }
 0xa12   :  { %7350 = vmatpush1.bf16.msra.mxu0 %v9580_v6  ;;  %7382 = vmatpush1.bf16.msra.mxu1 %v9583_v22 }
 0xa13   :  { %7352 = vmatprep.subr.bf16.mxu0 %v9588_v62  ;;  %7384 = vmatprep.subr.bf16.mxu1 %v9590_v52 }
 0xa14   :  { %3495 = vmatprep.mubr.f32.mxu0 %v9560_v45  ;;  %3566 = vmatprep.mubr.f32.mxu1 %v9560_v45 }
 0xa16   :  { %7354 = vmatpush1.bf16.msra.mxu0 %v9592_v11  ;;  %7386 = vmatpush1.bf16.msra.mxu1 %v9595_v49 }
 0xa17   :  { %7356 = vmatprep.subr.bf16.mxu0 %v9600_v10  ;;  %7388 = vmatprep.subr.bf16.mxu1 %v9602_v54 }
 0xa1a   :  { %7358 = vmatpush1.bf16.msra.mxu0 %v9604_v58  ;;  %7390 = vmatpush1.bf16.msra.mxu1 %v9607_v47 }
 0xa1b   :  { %7360 = vmatprep.subr.bf16.mxu0 %v9612_v3  ;;  %7392 = vmatprep.subr.bf16.mxu1 %v9614_v18 }
 0xa1e   :  { %7362 = vmatpush1.bf16.msra.mxu0 %v9616_v43  ;;  %7394 = vmatpush1.bf16.msra.mxu1 %v9619_v8 }
 0xa1f   :  { %7364 = vmatprep.subr.bf16.mxu0 %v9623_v42  ;;  %7396 = vmatprep.subr.bf16.mxu1 %v9625_v28 }
 0xa22   :  { %7366 = vmatpush1.bf16.msra.mxu0 %v9628_v2  ;;  %7398 = vmatpush1.bf16.msra.mxu1 %v9632_v25 }
 0xa23   :  { %7368 = vmatprep.subr.bf16.mxu0 %v9634_v40  ;;  %7400 = vmatprep.subr.bf16.mxu1 %v9636_v12 }
 0xa26   :  { %7370 = vmatpush1.bf16.msra.mxu0 %v9639_v15  ;;  %7402 = vmatpush1.bf16.msra.mxu1 %v9643_v9 }
 0xa27   :  { %7372 = vmatprep.subr.bf16.mxu0 %v9645_v27  ;;  %7404 = vmatprep.subr.bf16.mxu1 %v9648_v26 }
 0xa2a   :  { %7374 = vmatpush1.bf16.msra.mxu0 %v9651_v56  ;;  %7406 = vmatpush1.bf16.msra.mxu1 %v9655_v4 }
 0xa2b   :  { %7376 = vmatprep.subr.bf16.mxu0 %v9660_v50  ;;  %7408 = vmatprep.subr.bf16.mxu1 %v9662_v16 }
 0xa2e   :  { %7378 = vmatpush1.bf16.msra.mxu0 %v9664_v0  ;;  %7410 = vmatpush1.bf16.msra.mxu1 %v9667_v32 }
 0xa2f   :  { %7412 = vmatprep.subr.bf16.mxu0 %v9576_v29  ;;  %7444 = vmatprep.subr.bf16.mxu1 %v9578_v63 }
 0xae4   :  { %v3254_v53 = vpop.f32.mrb[18].mxu0  ;;  %v3325_v59 = vpop.f32.mrb[18].mxu1 }
 0xae5   :  { %v8021_v17 = vadd.f32 %v3254_v53, %v9717_v1  ;;  %v3256_v44 = vpop.f32.mrb[19].mxu0  ;;  %v3327_v48 = vpop.f32.mrb[19].mxu1  ;;  %v8037_v39 = vadd.f32 %v3325_v59, %v9732_v35  ;;  %v3853_v59 = vld [vmem:[#allocation11 + $0x200] sm:$0xff] }
 0xae6   :  { %v8022_v20 = vadd.f32 %v3256_v44, %v9721_v13  ;;  %v8038_v37 = vadd.f32 %v3327_v48, %v9727_v34 }
 0xae7   :  { %v5992_v33 = vmul.f32 -1.442695, %v8021_v17  ;;  %v3857_v17 = vld [vmem:[#allocation11 + $0x220] sm:$0xff] }
 0xae8   :  { %v5993_v5 = vmul.f32 -1.442695, %v8022_v20  ;;  %v5994_v24 = vmul.f32 -1.442695, %v8038_v37  ;;  %v9841_v48 = vpack.c.bf16 %v3857_v17, %v3853_v59  ;;  %v3855_v20 = vld [vmem:[#allocation11 + $0x210] sm:$0xff]  ;;  %v3866_v37 = vld [vmem:[#allocation11 + $0x268] sm:$0xff] }
 0xae9   :  { %8286 = vpow2.f32 %v5992_v33  ;;  %v3859_v33 = vld [vmem:[#allocation11 + $0x230] sm:$0xff] }
 0xaea   :  { %8288 = vpow2.f32 %v5993_v5  ;;  %v9844_v5 = vpack.c.bf16 %v3859_v33, %v3855_v20  ;;  %v3891_v59 = vld [vmem:[#allocation11 + $0x330] sm:$0xff]  ;;  %v3894_v20 = vld [vmem:[#allocation11 + $0x348] sm:$0xff] }
 0xaeb   :  { %8290 = vpow2.f32 %v5994_v24  ;;  %v3864_v24 = vld [vmem:[#allocation11 + $0x258] sm:$0xff]  ;;  %v3898_v33 = vld [vmem:[#allocation11 + $0x368] sm:$0xff] }
 0xaec   :  { %8292 = vtanh.f32 %v8037_v39 }
 0xaf3   :  { %v8287_v29 = vpop.eup %8286 }
 0xaf4   :  { %v8289_v21 = vpop.eup %8288  ;;  %v3337_v63 = vadd.f32 1.0, %v8287_v29  ;;  %v3868_v29 = vld [vmem:[#allocation11 + $0x278] sm:$0xff] }
 0xaf5   :  { %v3343_v7 = vadd.f32 1.0, %v8289_v21  ;;  %v8291_v41 = vpop.eup %8290  ;;  %v3861_v21 = vld [vmem:[#allocation11 + $0x240] sm:$0xff] }
 0xaf6   :  { %8294 = vrcp.f32 %v3337_v63  ;;  %v8293_v19 = vpop.eup %8292  ;;  %v3350_v61 = vadd.f32 1.0, %v8291_v41  ;;  %v3865_v63 = vld [vmem:[#allocation11 + $0x260] sm:$0xff] }
 0xaf7   :  { %8296 = vrcp.f32 %v3343_v7  ;;  %v9851_v7 = vpack.c.bf16 %v3868_v29, %v3864_v24  ;;  %v9853_v41 = vpack.c.bf16 %v3865_v63, %v3861_v21  ;;  %v3900_v24 = vld [vmem:[#allocation11 + $0x378] sm:$0xff]  ;;  %v3893_v29 = vld [vmem:[#allocation11 + $0x340] sm:$0xff] }
 0xaf8   :  { %8298 = vrcp.f32 %v3350_v61  ;;  %v3874_v61 = vld [vmem:[#allocation11 + $0x2a8] sm:$0xff]  ;;  %v3897_v21 = vld [vmem:[#allocation11 + $0x360] sm:$0xff] }
 0xb00   :  { %v8295_v14 = vpop.eup %8294 }
 0xb01   :  { %v8297_v55 = vpop.eup %8296  ;;  %v3355_v57 = vmul.f32 %v8295_v14, %v8293_v19  ;;  %v3863_v19 = vld [vmem:[#allocation11 + $0x250] sm:$0xff] }
 0xb02   :  { %v3354_v46 = vmul.f32 %v8297_v55, %v9738_v51  ;;  %v8299_v60 = vpop.eup %8298  ;;  %v3860_v51 = vld [vmem:[#allocation11 + $0x238] sm:$0xff]  ;;  %v3867_v14 = vld [vmem:[#allocation11 + $0x270] sm:$0xff] }
 0xb03   :  { %v9856_v55 = vpack.c.bf16 %v3867_v14, %v3863_v19  ;;  %v9901_v19 = vpack.c.bf16 %v3897_v21, %v3893_v29  ;;  %v3895_v14 = vld [vmem:[#allocation11 + $0x350] sm:$0xff] }
 0xb04   :  { %v9784_v38 = vadd.f32 %v3355_v57, %v3354_v46  ;;  %v3870_v57 = vld [vmem:[#allocation11 + $0x288] sm:$0xff]  ;;  %v3872_v46 = vld [vmem:[#allocation11 + $0x298] sm:$0xff] }
 0xb06   :  { %8300 = vtanh.f32 %v9784_v38 }
 0xb10   :  { %v8301_v23 = vpop.eup %8300 }
 0xb11   :  { %v9787_v53 = vmul.f32 %v8301_v23, %v8299_v60  ;;  %v3876_v60 = vld [vmem:[#allocation11 + $0x2b8] sm:$0xff]  ;;  %v3869_v23 = vld [vmem:[#allocation11 + $0x280] sm:$0xff] }
 0xb13   :  { %3496 = vmatmul.mubr.f32.vlgmr.msra.gmra.mrb[20].mxu0 %v9787_v53  ;;  %3567 = vmatmul.mubr.f32.vlgmr.msra.gmra.mrb[20].mxu1 %v9787_v53 }
 0xb14   :  { %7414 = vmatpush1.bf16.msra.mxu0 %v9580_v6  ;;  %7446 = vmatpush1.bf16.msra.mxu1 %v9583_v22 }
 0xb15   :  { %7416 = vmatprep.subr.bf16.mxu0 %v9588_v62  ;;  %7448 = vmatprep.subr.bf16.mxu1 %v9590_v52 }
 0xb16   :  { %3738 = vmatprep.mubr.f32.mxu0 %v9560_v45  ;;  %3809 = vmatprep.mubr.f32.mxu1 %v9560_v45 }
 0xb18   :  { %7418 = vmatpush1.bf16.msra.mxu0 %v9592_v11  ;;  %7450 = vmatpush1.bf16.msra.mxu1 %v9595_v49 }
 0xb19   :  { %7420 = vmatprep.subr.bf16.mxu0 %v9600_v10  ;;  %7452 = vmatprep.subr.bf16.mxu1 %v9602_v54 }
 0xb1c   :  { %7422 = vmatpush1.bf16.msra.mxu0 %v9604_v58  ;;  %7454 = vmatpush1.bf16.msra.mxu1 %v9607_v47 }
 0xb1d   :  { %7424 = vmatprep.subr.bf16.mxu0 %v9612_v3  ;;  %7456 = vmatprep.subr.bf16.mxu1 %v9614_v18 }
 0xb20   :  { %7426 = vmatpush1.bf16.msra.mxu0 %v9616_v43  ;;  %7458 = vmatpush1.bf16.msra.mxu1 %v9619_v8 }
 0xb21   :  { %7428 = vmatprep.subr.bf16.mxu0 %v9623_v42  ;;  %7460 = vmatprep.subr.bf16.mxu1 %v9625_v28 }
 0xb24   :  { %7430 = vmatpush1.bf16.msra.mxu0 %v9628_v2  ;;  %7462 = vmatpush1.bf16.msra.mxu1 %v9632_v25 }
 0xb25   :  { %7432 = vmatprep.subr.bf16.mxu0 %v9634_v40  ;;  %7464 = vmatprep.subr.bf16.mxu1 %v9636_v12 }
 0xb28   :  { %7434 = vmatpush1.bf16.msra.mxu0 %v9639_v15  ;;  %7466 = vmatpush1.bf16.msra.mxu1 %v9643_v9 }
 0xb29   :  { %7436 = vmatprep.subr.bf16.mxu0 %v9645_v27  ;;  %7468 = vmatprep.subr.bf16.mxu1 %v9648_v26 }
 0xb2c   :  { %7438 = vmatpush1.bf16.msra.mxu0 %v9651_v56  ;;  %7470 = vmatpush1.bf16.msra.mxu1 %v9655_v4 }
 0xb2d   :  { %7440 = vmatprep.subr.bf16.mxu0 %v9660_v50  ;;  %7472 = vmatprep.subr.bf16.mxu1 %v9662_v16  ;;  %v3854_v50 = vld [vmem:[#allocation11 + $0x208] sm:$0xff] }
 0xb2e   :  { %v3858_v16 = vld [vmem:[#allocation11 + $0x228] sm:$0xff] }
 0xb30   :  { %7442 = vmatpush1.bf16.msra.mxu0 %v9664_v0  ;;  %7474 = vmatpush1.bf16.msra.mxu1 %v9667_v32  ;;  %v3856_v0 = vld [vmem:[#allocation11 + $0x218] sm:$0xff]  ;;  %v9837_v32 = vpack.c.bf16 %v3858_v16, %v3854_v50  ;;  %v3889_v50 = vld [vmem:[#allocation11 + $0x320] sm:$0xff] }
 0xb31   :  { %v9839_v44 = vpack.c.bf16 %v3860_v51, %v3856_v0  ;;  %v3887_v51 = vld [vmem:[#allocation11 + $0x310] sm:$0xff] }
 0xb32   :  { %7476 = vmatprep.subr.bf16.mxu0 %v9837_v32  ;;  %v9892_v17 = vpack.c.bf16 %v3891_v59, %v3887_v51  ;;  %v3911_v51 = vld [vmem:[#allocation11 + $0x3d0] sm:$0xff] }
 0xb33   :  { %7508 = vmatprep.subr.bf16.mxu1 %v9839_v44  ;;  %v3915_v59 = vld [vmem:[#allocation11 + $0x3f0] sm:$0xff] }
 0xbe6   :  { %v3497_v6 = vpop.f32.mrb[20].mxu0  ;;  %v3568_v22 = vpop.f32.mrb[20].mxu1 }
 0xbe7   :  { %v8023_v62 = vadd.f32 %v3497_v6, %v9717_v1  ;;  %v3499_v52 = vpop.f32.mrb[21].mxu0  ;;  %v3570_v11 = vpop.f32.mrb[21].mxu1  ;;  %v8039_v3 = vadd.f32 %v3568_v22, %v9732_v35  ;;  %v3873_v6 = vld [vmem:[#allocation11 + $0x2a0] sm:$0xff]  ;;  %v9863_v22 = vpack.c.bf16 %v3876_v60, %v3872_v46  ;;  %v3906_v60 = vld [vmem:[#allocation11 + $0x3a8] sm:$0xff] }
 0xbe8   :  { %v8024_v49 = vadd.f32 %v3499_v52, %v9721_v13  ;;  %v8040_v58 = vadd.f32 %v3570_v11, %v9727_v34  ;;  %v3871_v52 = vld [vmem:[#allocation11 + $0x290] sm:$0xff] }
 0xbe9   :  { %v5995_v10 = vmul.f32 -1.442695, %v8023_v62  ;;  %v9865_v62 = vpack.c.bf16 %v3873_v6, %v3869_v23  ;;  %v3875_v11 = vld [vmem:[#allocation11 + $0x2b0] sm:$0xff]  ;;  %v3904_v23 = vld [vmem:[#allocation11 + $0x398] sm:$0xff] }
 0xbea   :  { %v5996_v54 = vmul.f32 -1.442695, %v8024_v49  ;;  %v5997_v47 = vmul.f32 -1.442695, %v8040_v58  ;;  %v9868_v49 = vpack.c.bf16 %v3875_v11, %v3871_v52  ;;  %v3880_v58 = vld [vmem:[#allocation11 + $0x2d8] sm:$0xff] }
 0xbeb   :  { %8302 = vpow2.f32 %v5995_v10  ;;  %v3878_v10 = vld [vmem:[#allocation11 + $0x2c8] sm:$0xff]  ;;  %v3908_v6 = vld [vmem:[#allocation11 + $0x3b8] sm:$0xff] }
 0xbec   :  { %8304 = vpow2.f32 %v5996_v54  ;;  %v3882_v54 = vld [vmem:[#allocation11 + $0x2e8] sm:$0xff]  ;;  %v9909_v11 = vpack.c.bf16 %v3908_v6, %v3904_v23 }
 0xbed   :  { %8306 = vpow2.f32 %v5997_v47  ;;  %v9873_v47 = vpack.c.bf16 %v3882_v54, %v3878_v10  ;;  %v3901_v10 = vld [vmem:[#allocation11 + $0x380] sm:$0xff] }
 0xbee   :  { %8308 = vtanh.f32 %v8039_v3  ;;  %v3884_v3 = vld [vmem:[#allocation11 + $0x2f8] sm:$0xff]  ;;  %v3905_v54 = vld [vmem:[#allocation11 + $0x3a0] sm:$0xff] }
 0xbf5   :  { %v8303_v18 = vpop.eup %8302 }
 0xbf6   :  { %v8305_v43 = vpop.eup %8304  ;;  %v3580_v8 = vadd.f32 1.0, %v8303_v18  ;;  %v3877_v18 = vld [vmem:[#allocation11 + $0x2c0] sm:$0xff] }
 0xbf7   :  { %v3586_v42 = vadd.f32 1.0, %v8305_v43  ;;  %v8307_v28 = vpop.eup %8306  ;;  %v3881_v43 = vld [vmem:[#allocation11 + $0x2e0] sm:$0xff] }
 0xbf8   :  { %8310 = vrcp.f32 %v3580_v8  ;;  %v8309_v2 = vpop.eup %8308  ;;  %v3593_v15 = vadd.f32 1.0, %v8307_v28  ;;  %v9875_v8 = vpack.c.bf16 %v3884_v3, %v3880_v58  ;;  %v3879_v28 = vld [vmem:[#allocation11 + $0x2d0] sm:$0xff]  ;;  %v9912_v3 = vpack.c.bf16 %v3905_v54, %v3901_v10 }
 0xbf9   :  { %8312 = vrcp.f32 %v3586_v42  ;;  %v9877_v42 = vpack.c.bf16 %v3881_v43, %v3877_v18  ;;  %v3903_v58 = vld [vmem:[#allocation11 + $0x390] sm:$0xff]  ;;  %v3910_v43 = vld [vmem:[#allocation11 + $0x3c8] sm:$0xff] }
 0xbfa   :  { %8314 = vrcp.f32 %v3593_v15  ;;  %v3888_v15 = vld [vmem:[#allocation11 + $0x318] sm:$0xff]  ;;  %v3907_v18 = vld [vmem:[#allocation11 + $0x3b0] sm:$0xff] }
 0xc02   :  { %v8311_v25 = vpop.eup %8310 }
 0xc03   :  { %v8313_v40 = vpop.eup %8312  ;;  %v3598_v12 = vmul.f32 %v8311_v25, %v8309_v2  ;;  %v3883_v2 = vld [vmem:[#allocation11 + $0x2f0] sm:$0xff] }
 0xc04   :  { %v3597_v9 = vmul.f32 %v8313_v40, %v9784_v38  ;;  %v8315_v26 = vpop.eup %8314  ;;  %v9861_v38 = vpack.c.bf16 %v3874_v61, %v3870_v57  ;;  %v9880_v25 = vpack.c.bf16 %v3883_v2, %v3879_v28  ;;  %v3886_v40 = vld [vmem:[#allocation11 + $0x308] sm:$0xff]  ;;  %v3899_v57 = vld [vmem:[#allocation11 + $0x370] sm:$0xff]  ;;  %v9916_v2 = vpack.c.bf16 %v3907_v18, %v3903_v58 }
 0xc05   :  { %v3902_v61 = vld [vmem:[#allocation11 + $0x388] sm:$0xff]  ;;  %v9904_v46 = vpack.c.bf16 %v3899_v57, %v3895_v14 }
 0xc06   :  { %v9828_v27 = vadd.f32 %v3598_v12, %v3597_v9  ;;  %v3890_v12 = vld [vmem:[#allocation11 + $0x328] sm:$0xff]  ;;  %v9907_v52 = vpack.c.bf16 %v3906_v60, %v3902_v61 }
 0xc07   :  { %v9885_v9 = vpack.c.bf16 %v3890_v12, %v3886_v40  ;;  %v3914_v28 = vld [vmem:[#allocation11 + $0x3e8] sm:$0xff]  ;;  %v3912_v12 = vld [vmem:[#allocation11 + $0x3d8] sm:$0xff] }
 0xc08   :  { %8316 = vtanh.f32 %v9828_v27  ;;  %v9918_v40 = vpack.c.bf16 %v3914_v28, %v3910_v43 }
 0xc12   :  { %v8317_v56 = vpop.eup %8316 }
 0xc13   :  { %v9831_v4 = vmul.f32 %v8317_v56, %v8315_v26  ;;  %v3892_v26 = vld [vmem:[#allocation11 + $0x338] sm:$0xff]  ;;  %v3885_v56 = vld [vmem:[#allocation11 + $0x300] sm:$0xff] }
 0xc14   :  { %v9887_v16 = vpack.c.bf16 %v3892_v26, %v3888_v15  ;;  %v9889_v0 = vpack.c.bf16 %v3889_v50, %v3885_v56  ;;  %v3916_v15 = vld [vmem:[#allocation11 + $0x3f8] sm:$0xff]  ;;  %v3909_v26 = vld [vmem:[#allocation11 + $0x3c0] sm:$0xff] }
 0xc15   :  { %3739 = vmatmul.mubr.f32.vlgmr.msra.gmra.mrb[22].mxu0 %v9831_v4  ;;  %3810 = vmatmul.mubr.f32.vlgmr.msra.gmra.mrb[22].mxu1 %v9831_v4  ;;  %v9921_v56 = vpack.c.bf16 %v3916_v15, %v3912_v12  ;;  %v3913_v50 = vld [vmem:[#allocation11 + $0x3e0] sm:$0xff] }
 0xc16   :  { %3981 = vmatprep.mubr.f32.mxu0 %v9560_v45  ;;  %4052 = vmatprep.mubr.f32.mxu1 %v9560_v45  ;;  %v3862_v45 = vld [vmem:[#allocation11 + $0x248] sm:$0xff] }
 0xc17   :  { %7478 = vmatpush1.bf16.msra.mxu0 %v9841_v48  ;;  %7510 = vmatpush1.bf16.msra.mxu1 %v9844_v5  ;;  %v9849_v39 = vpack.c.bf16 %v3866_v37, %v3862_v45  ;;  %v3896_v45 = vld [vmem:[#allocation11 + $0x358] sm:$0xff]  ;;  %v9896_v37 = vpack.c.bf16 %v3898_v33, %v3894_v20  ;;  %v9924_v20 = vpack.c.bf16 %v3913_v50, %v3909_v26 }
 0xc18   :  { %7512 = vmatprep.subr.bf16.mxu1 %v9851_v7  ;;  %v9899_v63 = vpack.c.bf16 %v3900_v24, %v3896_v45  ;;  %v9928_v33 = vpack.c.bf16 %v3915_v59, %v3911_v51 }
 0xc19   :  { %7480 = vmatprep.subr.bf16.mxu0 %v9849_v39 }
 0xc1b   :  { %7482 = vmatpush1.bf16.msra.mxu0 %v9853_v41  ;;  %7514 = vmatpush1.bf16.msra.mxu1 %v9856_v55 }
 0xc1c   :  { %7484 = vmatprep.subr.bf16.mxu0 %v9861_v38  ;;  %7516 = vmatprep.subr.bf16.mxu1 %v9863_v22 }
 0xc1f   :  { %7486 = vmatpush1.bf16.msra.mxu0 %v9865_v62  ;;  %7518 = vmatpush1.bf16.msra.mxu1 %v9868_v49 }
 0xc20   :  { %7488 = vmatprep.subr.bf16.mxu0 %v9873_v47  ;;  %7520 = vmatprep.subr.bf16.mxu1 %v9875_v8 }
 0xc23   :  { %7490 = vmatpush1.bf16.msra.mxu0 %v9877_v42  ;;  %7522 = vmatpush1.bf16.msra.mxu1 %v9880_v25 }
 0xc24   :  { %7492 = vmatprep.subr.bf16.mxu0 %v9885_v9  ;;  %7524 = vmatprep.subr.bf16.mxu1 %v9887_v16 }
 0xc27   :  { %7494 = vmatpush1.bf16.msra.mxu0 %v9889_v0  ;;  %7526 = vmatpush1.bf16.msra.mxu1 %v9892_v17 }
 0xc28   :  { %7496 = vmatprep.subr.bf16.mxu0 %v9896_v37  ;;  %7528 = vmatprep.subr.bf16.mxu1 %v9899_v63 }
 0xc2b   :  { %7498 = vmatpush1.bf16.msra.mxu0 %v9901_v19  ;;  %7530 = vmatpush1.bf16.msra.mxu1 %v9904_v46 }
 0xc2c   :  { %7500 = vmatprep.subr.bf16.mxu0 %v9907_v52  ;;  %7532 = vmatprep.subr.bf16.mxu1 %v9909_v11 }
 0xc2f   :  { %7502 = vmatpush1.bf16.msra.mxu0 %v9912_v3  ;;  %7534 = vmatpush1.bf16.msra.mxu1 %v9916_v2 }
 0xc30   :  { %7504 = vmatprep.subr.bf16.mxu0 %v9918_v40  ;;  %7536 = vmatprep.subr.bf16.mxu1 %v9921_v56 }
 0xc33   :  { %7506 = vmatpush1.bf16.msra.mxu0 %v9924_v20  ;;  %7538 = vmatpush1.bf16.msra.mxu1 %v9928_v33 }
 0xc34   :  { %7540 = vmatprep.subr.bf16.mxu0 %v9837_v32  ;;  %7572 = vmatprep.subr.bf16.mxu1 %v9839_v44 }
 0xce8   :  { %v3740_v45 = vpop.f32.mrb[22].mxu0  ;;  %v3811_v24 = vpop.f32.mrb[22].mxu1 }
 0xce9   :  { %v8025_v29 = vadd.f32 %v3740_v45, %v9717_v1  ;;  %v3742_v21 = vpop.f32.mrb[23].mxu0  ;;  %v3813_v14 = vpop.f32.mrb[23].mxu1  ;;  %v8041_v10 = vadd.f32 %v3811_v24, %v9732_v35 }
 0xcea   :  { %v8026_v57 = vadd.f32 %v3742_v21, %v9721_v13  ;;  %v8042_v23 = vadd.f32 %v3813_v14, %v9727_v34 }
 0xceb   :  { %v5998_v61 = vmul.f32 -1.442695, %v8025_v29 }
 0xcec   :  { %v5999_v60 = vmul.f32 -1.442695, %v8026_v57  ;;  %v6000_v6 = vmul.f32 -1.442695, %v8042_v23 }
 0xced   :  { %8318 = vpow2.f32 %v5998_v61 }
 0xcee   :  { %8320 = vpow2.f32 %v5999_v60 }
 0xcef   :  { %8322 = vpow2.f32 %v6000_v6 }
 0xcf0   :  { %8324 = vtanh.f32 %v8041_v10 }
 0xcf7   :  { %v8319_v54 = vpop.eup %8318 }
 0xcf8   :  { %v8321_v58 = vpop.eup %8320  ;;  %v3823_v18 = vadd.f32 1.0, %v8319_v54 }
 0xcf9   :  { %v3829_v43 = vadd.f32 1.0, %v8321_v58  ;;  %v8323_v28 = vpop.eup %8322 }
 0xcfa   :  { %8326 = vrcp.f32 %v3823_v18  ;;  %v8325_v12 = vpop.eup %8324  ;;  %v3836_v51 = vadd.f32 1.0, %v8323_v28 }
 0xcfb   :  { %8328 = vrcp.f32 %v3829_v43 }
 0xcfc   :  { %8330 = vrcp.f32 %v3836_v51 }
 0xd04   :  { %v8327_v15 = vpop.eup %8326 }
 0xd05   :  { %v8329_v26 = vpop.eup %8328  ;;  %v3841_v50 = vmul.f32 %v8327_v15, %v8325_v12 }
 0xd06   :  { %v3840_v59 = vmul.f32 %v8329_v26, %v9828_v27  ;;  %v8331_v24 = vpop.eup %8330  ;;  %v9951_v27 = vld [vmem:[#allocation23 + $0x10] sm:$0xff] }
 0xd08   :  { %v9940_v45 = vadd.f32 %v3841_v50, %v3840_v59 }
 0xd0a   :  { %8332 = vtanh.f32 %v9940_v45 }
 0xd14   :  { %v8333_v29 = vpop.eup %8332 }
 0xd15   :  { %v9943_v21 = vmul.f32 %v8333_v29, %v8331_v24 }
 0xd17   :  { %3982 = vmatmul.mubr.f32.vlgmr.msra.gmra.mrb[24].mxu0 %v9943_v21  ;;  %4053 = vmatmul.mubr.f32.vlgmr.msra.gmra.mrb[24].mxu1 %v9943_v21 }
 0xd18   :  { %7542 = vmatpush1.bf16.msra.mxu0 %v9841_v48  ;;  %7574 = vmatpush1.bf16.msra.mxu1 %v9844_v5 }
 0xd19   :  { %7544 = vmatprep.subr.bf16.mxu0 %v9849_v39  ;;  %7576 = vmatprep.subr.bf16.mxu1 %v9851_v7 }
 0xd1a   :  { %4224 = vmatprep.mubr.f32.mxu0 %v9951_v27  ;;  %4295 = vmatprep.mubr.f32.mxu1 %v9951_v27 }
 0xd1c   :  { %7546 = vmatpush1.bf16.msra.mxu0 %v9853_v41  ;;  %7578 = vmatpush1.bf16.msra.mxu1 %v9856_v55 }
 0xd1d   :  { %7548 = vmatprep.subr.bf16.mxu0 %v9861_v38  ;;  %7580 = vmatprep.subr.bf16.mxu1 %v9863_v22 }
 0xd20   :  { %7550 = vmatpush1.bf16.msra.mxu0 %v9865_v62  ;;  %7582 = vmatpush1.bf16.msra.mxu1 %v9868_v49 }
 0xd21   :  { %7552 = vmatprep.subr.bf16.mxu0 %v9873_v47  ;;  %7584 = vmatprep.subr.bf16.mxu1 %v9875_v8 }
 0xd24   :  { %7554 = vmatpush1.bf16.msra.mxu0 %v9877_v42  ;;  %7586 = vmatpush1.bf16.msra.mxu1 %v9880_v25 }
 0xd25   :  { %7556 = vmatprep.subr.bf16.mxu0 %v9885_v9  ;;  %7588 = vmatprep.subr.bf16.mxu1 %v9887_v16 }
 0xd28   :  { %7558 = vmatpush1.bf16.msra.mxu0 %v9889_v0  ;;  %7590 = vmatpush1.bf16.msra.mxu1 %v9892_v17 }
 0xd29   :  { %7560 = vmatprep.subr.bf16.mxu0 %v9896_v37  ;;  %7592 = vmatprep.subr.bf16.mxu1 %v9899_v63 }
 0xd2c   :  { %7562 = vmatpush1.bf16.msra.mxu0 %v9901_v19  ;;  %7594 = vmatpush1.bf16.msra.mxu1 %v9904_v46 }
 0xd2d   :  { %7564 = vmatprep.subr.bf16.mxu0 %v9907_v52  ;;  %7596 = vmatprep.subr.bf16.mxu1 %v9909_v11 }
 0xd30   :  { %7566 = vmatpush1.bf16.msra.mxu0 %v9912_v3  ;;  %7598 = vmatpush1.bf16.msra.mxu1 %v9916_v2 }
 0xd31   :  { %7568 = vmatprep.subr.bf16.mxu0 %v9918_v40  ;;  %7600 = vmatprep.subr.bf16.mxu1 %v9921_v56 }
 0xd34   :  { %7570 = vmatpush1.bf16.msra.mxu0 %v9924_v20  ;;  %7602 = vmatpush1.bf16.msra.mxu1 %v9928_v33 }
 0xd35   :  { %7604 = vmatprep.subr.bf16.mxu0 %v9837_v32  ;;  %7636 = vmatprep.subr.bf16.mxu1 %v9839_v44 }
 0xdea   :  { %v3983_v14 = vpop.f32.mrb[24].mxu0  ;;  %v4054_v57 = vpop.f32.mrb[24].mxu1 }
 0xdeb   :  { %v8027_v61 = vadd.f32 %v3983_v14, %v9717_v1  ;;  %v3985_v60 = vpop.f32.mrb[25].mxu0  ;;  %v4056_v23 = vpop.f32.mrb[25].mxu1  ;;  %v8043_v43 = vadd.f32 %v4054_v57, %v9732_v35 }
 0xdec   :  { %v8028_v6 = vadd.f32 %v3985_v60, %v9721_v13  ;;  %v8044_v58 = vadd.f32 %v4056_v23, %v9727_v34 }
 0xded   :  { %v6001_v10 = vmul.f32 -1.442695, %v8027_v61 }
 0xdee   :  { %v6002_v54 = vmul.f32 -1.442695, %v8028_v6  ;;  %v6003_v18 = vmul.f32 -1.442695, %v8044_v58 }
 0xdef   :  { %8334 = vpow2.f32 %v6001_v10 }
 0xdf0   :  { %8336 = vpow2.f32 %v6002_v54 }
 0xdf1   :  { %8338 = vpow2.f32 %v6003_v18 }
 0xdf2   :  { %8340 = vtanh.f32 %v8043_v43 }
 0xdf9   :  { %v8335_v28 = vpop.eup %8334 }
 0xdfa   :  { %v8337_v12 = vpop.eup %8336  ;;  %v4066_v15 = vadd.f32 1.0, %v8335_v28 }
 0xdfb   :  { %v4072_v26 = vadd.f32 1.0, %v8337_v12  ;;  %v8339_v50 = vpop.eup %8338 }
 0xdfc   :  { %8342 = vrcp.f32 %v4066_v15  ;;  %v8341_v51 = vpop.eup %8340  ;;  %v4079_v14 = vadd.f32 1.0, %v8339_v50 }
 0xdfd   :  { %8344 = vrcp.f32 %v4072_v26 }
 0xdfe   :  { %8346 = vrcp.f32 %v4079_v14 }
 0xe06   :  { %v8343_v59 = vpop.eup %8342 }
 0xe07   :  { %v8345_v24 = vpop.eup %8344  ;;  %v4084_v29 = vmul.f32 %v8343_v59, %v8341_v51 }
 0xe08   :  { %v4083_v61 = vmul.f32 %v8345_v24, %v9940_v45  ;;  %v8347_v57 = vpop.eup %8346 }
 0xe0a   :  { %v9988_v60 = vadd.f32 %v4084_v29, %v4083_v61 }
 0xe0c   :  { %8348 = vtanh.f32 %v9988_v60 }
 0xe16   :  { %v8349_v23 = vpop.eup %8348 }
 0xe17   :  { %v9991_v6 = vmul.f32 %v8349_v23, %v8347_v57 }
 0xe19   :  { %4225 = vmatmul.mubr.f32.vlgmr.msra.gmra.mrb[26].mxu0 %v9991_v6  ;;  %4296 = vmatmul.mubr.f32.vlgmr.msra.gmra.mrb[26].mxu1 %v9991_v6 }
 0xe1a   :  { %7606 = vmatpush1.bf16.msra.mxu0 %v9841_v48  ;;  %7638 = vmatpush1.bf16.msra.mxu1 %v9844_v5 }
 0xe1b   :  { %7608 = vmatprep.subr.bf16.mxu0 %v9849_v39  ;;  %7640 = vmatprep.subr.bf16.mxu1 %v9851_v7 }
 0xe1c   :  { %4467 = vmatprep.mubr.f32.mxu0 %v9951_v27  ;;  %4538 = vmatprep.mubr.f32.mxu1 %v9951_v27 }
 0xe1e   :  { %7610 = vmatpush1.bf16.msra.mxu0 %v9853_v41  ;;  %7642 = vmatpush1.bf16.msra.mxu1 %v9856_v55 }
 0xe1f   :  { %7612 = vmatprep.subr.bf16.mxu0 %v9861_v38  ;;  %7644 = vmatprep.subr.bf16.mxu1 %v9863_v22 }
 0xe22   :  { %7614 = vmatpush1.bf16.msra.mxu0 %v9865_v62  ;;  %7646 = vmatpush1.bf16.msra.mxu1 %v9868_v49 }
 0xe23   :  { %7616 = vmatprep.subr.bf16.mxu0 %v9873_v47  ;;  %7648 = vmatprep.subr.bf16.mxu1 %v9875_v8 }
 0xe26   :  { %7618 = vmatpush1.bf16.msra.mxu0 %v9877_v42  ;;  %7650 = vmatpush1.bf16.msra.mxu1 %v9880_v25 }
 0xe27   :  { %7620 = vmatprep.subr.bf16.mxu0 %v9885_v9  ;;  %7652 = vmatprep.subr.bf16.mxu1 %v9887_v16 }
 0xe2a   :  { %7622 = vmatpush1.bf16.msra.mxu0 %v9889_v0  ;;  %7654 = vmatpush1.bf16.msra.mxu1 %v9892_v17 }
 0xe2b   :  { %7624 = vmatprep.subr.bf16.mxu0 %v9896_v37  ;;  %7656 = vmatprep.subr.bf16.mxu1 %v9899_v63 }
 0xe2e   :  { %7626 = vmatpush1.bf16.msra.mxu0 %v9901_v19  ;;  %7658 = vmatpush1.bf16.msra.mxu1 %v9904_v46 }
 0xe2f   :  { %7628 = vmatprep.subr.bf16.mxu0 %v9907_v52  ;;  %7660 = vmatprep.subr.bf16.mxu1 %v9909_v11 }
 0xe32   :  { %7630 = vmatpush1.bf16.msra.mxu0 %v9912_v3  ;;  %7662 = vmatpush1.bf16.msra.mxu1 %v9916_v2 }
 0xe33   :  { %7632 = vmatprep.subr.bf16.mxu0 %v9918_v40  ;;  %7664 = vmatprep.subr.bf16.mxu1 %v9921_v56 }
 0xe36   :  { %7634 = vmatpush1.bf16.msra.mxu0 %v9924_v20  ;;  %7666 = vmatpush1.bf16.msra.mxu1 %v9928_v33 }
 0xe37   :  { %7668 = vmatprep.subr.bf16.mxu0 %v9837_v32  ;;  %7700 = vmatprep.subr.bf16.mxu1 %v9839_v44 }
 0xeec   :  { %v4226_v45 = vpop.f32.mrb[26].mxu0  ;;  %v4297_v10 = vpop.f32.mrb[26].mxu1 }
 0xeed   :  { %v8029_v54 = vadd.f32 %v4226_v45, %v9717_v1  ;;  %v4228_v58 = vpop.f32.mrb[27].mxu0  ;;  %v4299_v18 = vpop.f32.mrb[27].mxu1  ;;  %v8045_v50 = vadd.f32 %v4297_v10, %v9732_v35 }
 0xeee   :  { %v8030_v43 = vadd.f32 %v4228_v58, %v9721_v13  ;;  %v8046_v15 = vadd.f32 %v4299_v18, %v9727_v34 }
 0xeef   :  { %v6004_v28 = vmul.f32 -1.442695, %v8029_v54 }
 0xef0   :  { %v6005_v12 = vmul.f32 -1.442695, %v8030_v43  ;;  %v6006_v26 = vmul.f32 -1.442695, %v8046_v15  ;;  %v4837_v43 = vld [vmem:[#allocation18 + $0x18] sm:$0xff] }
 0xef1   :  { %8350 = vpow2.f32 %v6004_v28  ;;  %v4957_v28 = vld [vmem:[#allocation21 + $0x10] sm:$0xff] }
 0xef2   :  { %8352 = vpow2.f32 %v6005_v12  ;;  %v4958_v12 = vld [vmem:[#allocation21 + $0x18] sm:$0xff] }
 0xef3   :  { %8354 = vpow2.f32 %v6006_v26 }
 0xef4   :  { %8356 = vtanh.f32 %v8045_v50  ;;  %v4838_v50 = vld [vmem:[#allocation18 + $0x20] sm:$0xff] }
 0xefb   :  { %v8351_v32 = vpop.eup %8350 }
 0xefc   :  { %v8353_v51 = vpop.eup %8352  ;;  %v4309_v44 = vadd.f32 1.0, %v8351_v32 }
 0xefd   :  { %v4315_v59 = vadd.f32 1.0, %v8353_v51  ;;  %v8355_v24 = vpop.eup %8354  ;;  %v7767_v51 = vpack.c.bf16 %v4958_v12, %v4957_v28 }
 0xefe   :  { %8358 = vrcp.f32 %v4309_v44  ;;  %v8357_v29 = vpop.eup %8356  ;;  %v4322_v23 = vadd.f32 1.0, %v8355_v24  ;;  %v4839_v44 = vld [vmem:[#allocation18 + $0x28] sm:$0xff] }
 0xeff   :  { %8360 = vrcp.f32 %v4315_v59  ;;  %v4959_v59 = vld [vmem:[#allocation21 + $0x20] sm:$0xff]  ;;  %v4960_v24 = vld [vmem:[#allocation21 + $0x28] sm:$0xff] }
 0xf00   :  { %8362 = vrcp.f32 %v4322_v23  ;;  %v4961_v23 = vld [vmem:[#allocation21 + $0x30] sm:$0xff] }
 0xf08   :  { %v8359_v14 = vpop.eup %8358 }
 0xf09   :  { %v8361_v61 = vpop.eup %8360  ;;  %v4327_v57 = vmul.f32 %v8359_v14, %v8357_v29  ;;  %v7739_v29 = vpack.c.bf16 %v4839_v44, %v4838_v50  ;;  %v7771_v14 = vpack.c.bf16 %v4960_v24, %v4959_v59 }
 0xf0a   :  { %v4326_v45 = vmul.f32 %v8361_v61, %v9988_v60  ;;  %v8363_v10 = vpop.eup %8362  ;;  %v4840_v61 = vld [vmem:[#allocation18 + $0x30] sm:$0xff] }
 0xf0c   :  { %v10034_v54 = vadd.f32 %v4327_v57, %v4326_v45  ;;  %v4841_v57 = vld [vmem:[#allocation18 + $0x38] sm:$0xff] }
 0xf0d   :  { %v4962_v45 = vld [vmem:[#allocation21 + $0x38] sm:$0xff] }
 0xf0e   :  { %8364 = vtanh.f32 %v10034_v54 }
 0xf18   :  { %v8365_v58 = vpop.eup %8364 }
 0xf19   :  { %v10037_v18 = vmul.f32 %v8365_v58, %v8363_v10  ;;  %v7775_v10 = vpack.c.bf16 %v4962_v45, %v4961_v23  ;;  %v4842_v58 = vld [vmem:[#allocation18 + $0x40] sm:$0xff] }
 0xf1b   :  { %4468 = vmatmul.mubr.f32.vlgmr.msra.gmra.mrb[28].mxu0 %v10037_v18  ;;  %4539 = vmatmul.mubr.f32.vlgmr.msra.gmra.mrb[28].mxu1 %v10037_v18 }
 0xf1c   :  { %7670 = vmatpush1.bf16.msra.mxu0 %v9841_v48  ;;  %7702 = vmatpush1.bf16.msra.mxu1 %v9844_v5  ;;  %v4834_v48 = vld [vmem:[#allocation18] sm:$0xff]  ;;  %v4835_v5 = vld [vmem:[#allocation18 + $0x8] sm:$0xff] }
 0xf1d   :  { %7672 = vmatprep.subr.bf16.mxu0 %v9849_v39  ;;  %7704 = vmatprep.subr.bf16.mxu1 %v9851_v7  ;;  %v4955_v39 = vld [vmem:[#allocation21] sm:$0xff]  ;;  %v7731_v7 = vpack.c.bf16 %v4835_v5, %v4834_v48  ;;  %v4843_v48 = vld [vmem:[#allocation18 + $0x48] sm:$0xff] }
 0xf1e   :  { %4710 = vmatprep.mubr.f32.mxu0 %v9951_v27  ;;  %4781 = vmatprep.mubr.f32.mxu1 %v9951_v27  ;;  %v4963_v5 = vld [vmem:[#allocation21 + $0x40] sm:$0xff] }
 0xf20   :  { %7674 = vmatpush1.bf16.msra.mxu0 %v9853_v41  ;;  %7706 = vmatpush1.bf16.msra.mxu1 %v9856_v55  ;;  %v4956_v41 = vld [vmem:[#allocation21 + $0x8] sm:$0xff] }
 0xf21   :  { %7676 = vmatprep.subr.bf16.mxu0 %v9861_v38  ;;  %7708 = vmatprep.subr.bf16.mxu1 %v9863_v22  ;;  %v7763_v55 = vpack.c.bf16 %v4956_v41, %v4955_v39  ;;  %v4964_v39 = vld [vmem:[#allocation21 + $0x48] sm:$0xff]  ;;  %v4844_v41 = vld [vmem:[#allocation18 + $0x50] sm:$0xff] }
 0xf24   :  { %7678 = vmatpush1.bf16.msra.mxu0 %v9865_v62  ;;  %7710 = vmatpush1.bf16.msra.mxu1 %v9868_v49 }
 0xf25   :  { %7680 = vmatprep.subr.bf16.mxu0 %v9873_v47  ;;  %7712 = vmatprep.subr.bf16.mxu1 %v9875_v8 }
 0xf28   :  { %7682 = vmatpush1.bf16.msra.mxu0 %v9877_v42  ;;  %7714 = vmatpush1.bf16.msra.mxu1 %v9880_v25 }
 0xf29   :  { %7684 = vmatprep.subr.bf16.mxu0 %v9885_v9  ;;  %7716 = vmatprep.subr.bf16.mxu1 %v9887_v16 }
 0xf2c   :  { %7686 = vmatpush1.bf16.msra.mxu0 %v9889_v0  ;;  %7718 = vmatpush1.bf16.msra.mxu1 %v9892_v17 }
 0xf2d   :  { %7688 = vmatprep.subr.bf16.mxu0 %v9896_v37  ;;  %7720 = vmatprep.subr.bf16.mxu1 %v9899_v63 }
 0xf30   :  { %7690 = vmatpush1.bf16.msra.mxu0 %v9901_v19  ;;  %7722 = vmatpush1.bf16.msra.mxu1 %v9904_v46 }
 0xf31   :  { %7692 = vmatprep.subr.bf16.mxu0 %v9907_v52  ;;  %7724 = vmatprep.subr.bf16.mxu1 %v9909_v11 }
 0xf34   :  { %7694 = vmatpush1.bf16.msra.mxu0 %v9912_v3  ;;  %7726 = vmatpush1.bf16.msra.mxu1 %v9916_v2 }
 0xf35   :  { %7696 = vmatprep.subr.bf16.mxu0 %v9918_v40  ;;  %7728 = vmatprep.subr.bf16.mxu1 %v9921_v56 }
 0xf38   :  { %7698 = vmatpush1.bf16.msra.mxu0 %v9924_v20  ;;  %7730 = vmatpush1.bf16.msra.mxu1 %v9928_v33  ;;  %v4836_v33 = vld [vmem:[#allocation18 + $0x10] sm:$0xff] }
 0xf39   :  { %7732 = vmatprep.subr.bf16.mxu0 %v7731_v7  ;;  %7764 = vmatprep.subr.bf16.mxu1 %v7763_v55  ;;  %v7735_v32 = vpack.c.bf16 %v4837_v43, %v4836_v33 }
 0xfee   :  { %v4469_v38 = vpop.f32.mrb[28].mxu0  ;;  %v4540_v22 = vpop.f32.mrb[28].mxu1 }
 0xfef   :  { %v8031_v62 = vadd.f32 %v4469_v38, %v9717_v1  ;;  %v4471_v49 = vpop.f32.mrb[29].mxu0  ;;  %v4542_v47 = vpop.f32.mrb[29].mxu1  ;;  %v8047_v0 = vadd.f32 %v4540_v22, %v9732_v35  ;;  %v4965_v38 = vld [vmem:[#allocation21 + $0x50] sm:$0xff]  ;;  %v4966_v22 = vld [vmem:[#allocation21 + $0x58] sm:$0xff] }
 0xff0   :  { %v8032_v8 = vadd.f32 %v4471_v49, %v9721_v13  ;;  %v8048_v9 = vadd.f32 %v4542_v47, %v9727_v34  ;;  %v7783_v49 = vpack.c.bf16 %v4966_v22, %v4965_v38  ;;  %v4846_v47 = vld [vmem:[#allocation18 + $0x60] sm:$0xff]  ;;  %v10135_v38 = vand.u32 127, %v271_v30 }
 0xff1   :  { %v6007_v42 = vmul.f32 -1.442695, %v8031_v62  ;;  %v5080_v22 = vmul.u32 8, %v9176_v31 }
 0xff2   :  { %v6008_v25 = vmul.f32 -1.442695, %v8032_v8  ;;  %v6009_v16 = vmul.f32 -1.442695, %v8048_v9  ;;  %v4847_v8 = vld [vmem:[#allocation18 + $0x68] sm:$0xff] }
 0xff3   :  { %8366 = vpow2.f32 %v6007_v42  ;;  %v4967_v42 = vld [vmem:[#allocation21 + $0x60] sm:$0xff]  ;;  %v7755_v9 = vpack.c.bf16 %v4847_v8, %v4846_v47  ;;  %vm5081_vm1 = vcmp.eq.s32.totalorder %v10135_v38, %v5080_v22 }
 0xff4   :  { %8368 = vpow2.f32 %v6008_v25  ;;  %v4968_v25 = vld [vmem:[#allocation21 + $0x68] sm:$0xff]  ;;  %v6013_v30 = vsel %vm5081_vm1, 1.0, %v9951_v27 }
 0xff5   :  { %8370 = vpow2.f32 %v6009_v16  ;;  %v7787_v16 = vpack.c.bf16 %v4968_v25, %v4967_v42 }
 0xff6   :  { %8372 = vtanh.f32 %v8047_v0  ;;  %v4848_v0 = vld [vmem:[#allocation18 + $0x70] sm:$0xff] }
 0xffd   :  { %v8367_v17 = vpop.eup %8366 }
 0xffe   :  { %v8369_v37 = vpop.eup %8368  ;;  %v4552_v63 = vadd.f32 1.0, %v8367_v17  ;;  %v4849_v17 = vld [vmem:[#allocation18 + $0x78] sm:$0xff] }
 0xfff   :  { %v4558_v19 = vadd.f32 1.0, %v8369_v37  ;;  %v8371_v46 = vpop.eup %8370  ;;  %v4969_v37 = vld [vmem:[#allocation21 + $0x70] sm:$0xff] }
0x1000   :  { %8374 = vrcp.f32 %v4552_v63  ;;  %v8373_v52 = vpop.eup %8372  ;;  %v4565_v40 = vadd.f32 1.0, %v8371_v46  ;;  %v4970_v63 = vld [vmem:[#allocation21 + $0x78] sm:$0xff] }
0x1001   :  { %8376 = vrcp.f32 %v4558_v19  ;;  %v7759_v19 = vpack.c.bf16 %v4849_v17, %v4848_v0  ;;  %v7791_v46 = vpack.c.bf16 %v4970_v63, %v4969_v37  ;;  %v5230_v17 = vld [vmem:[#allocation15 + $0x10] sm:$0xff]  ;;  %v5231_v37 = vld [vmem:[#allocation15 + $0x18] sm:$0xff] }
0x1002   :  { %8378 = vrcp.f32 %v4565_v40  ;;  %v7823_v63 = vpack.c.bf16 %v5231_v37, %v5230_v17  ;;  %v5651_v37 = vld [vmem:[#allocation17 + $0x8] sm:$0xff] }
0x1003   :  { %vm5722_vm5 = vcmp.gt.f32.partialorder %v5651_v37, 0.5 }
0x100a   :  { %v8375_v11 = vpop.eup %8374 }
0x100b   :  { %v8377_v3 = vpop.eup %8376  ;;  %v4570_v2 = vmul.f32 %v8375_v11, %v8373_v52 }
0x100c   :  { %v4569_v56 = vmul.f32 %v8377_v3, %v10034_v54  ;;  %v8379_v60 = vpop.eup %8378  ;;  %v7743_v54 = vpack.c.bf16 %v4841_v57, %v4840_v61 }
0x100e   :  { %v10078_v20 = vadd.f32 %v4570_v2, %v4569_v56 }
0x1010   :  { %8380 = vtanh.f32 %v10078_v20 }
0x101a   :  { %v8381_v15 = vpop.eup %8380 }
0x101b   :  { %v10081_v26 = vmul.f32 %v8381_v15, %v8379_v60 }
0x101d   :  { %4711 = vmatmul.mubr.f32.vlgmr.msra.gmra.mrb[30].mxu0 %v10081_v26  ;;  %4782 = vmatmul.mubr.f32.vlgmr.msra.gmra.mrb[30].mxu1 %v10081_v26 }
0x101e   :  { %7734 = vmatpush3.bf16.msra.mxu0 %v7731_v7  ;;  %7766 = vmatpush3.bf16.msra.mxu1 %v7763_v55  ;;  %v7779_v7 = vpack.c.bf16 %v4964_v39, %v4963_v5  ;;  %v4845_v55 = vld [vmem:[#allocation18 + $0x58] sm:$0xff] }
0x101f   :  { %6237 = vmatprep.mubr.f32.mxu0 %v9741_v36  ;;  %6281 = vmatprep.mubr.f32.mxu1 %v9741_v36  ;;  %v7747_v36 = vpack.c.bf16 %v4843_v48, %v4842_v58  ;;  %v7751_v62 = vpack.c.bf16 %v4845_v55, %v4844_v41 }
0x1020   :  { %7736 = vmatprep.subr.bf16.mxu0 %v7735_v32  ;;  %7768 = vmatprep.subr.bf16.mxu1 %v7767_v51 }
0x1022   :  { %7738 = vmatpush3.bf16.msra.mxu0 %v7735_v32  ;;  %7770 = vmatpush3.bf16.msra.mxu1 %v7767_v51 }
0x1023   :  { %7740 = vmatprep.subr.bf16.mxu0 %v7739_v29  ;;  %7772 = vmatprep.subr.bf16.mxu1 %v7771_v14 }
0x1026   :  { %7742 = vmatpush3.bf16.msra.mxu0 %v7739_v29  ;;  %7774 = vmatpush3.bf16.msra.mxu1 %v7771_v14 }
0x1027   :  { %7744 = vmatprep.subr.bf16.mxu0 %v7743_v54  ;;  %7776 = vmatprep.subr.bf16.mxu1 %v7775_v10 }
0x102a   :  { %7746 = vmatpush3.bf16.msra.mxu0 %v7743_v54  ;;  %7778 = vmatpush3.bf16.msra.mxu1 %v7775_v10 }
0x102b   :  { %7748 = vmatprep.subr.bf16.mxu0 %v7747_v36  ;;  %7780 = vmatprep.subr.bf16.mxu1 %v7779_v7 }
0x102e   :  { %7750 = vmatpush3.bf16.msra.mxu0 %v7747_v36  ;;  %7782 = vmatpush3.bf16.msra.mxu1 %v7779_v7 }
0x102f   :  { %7752 = vmatprep.subr.bf16.mxu0 %v7751_v62  ;;  %7784 = vmatprep.subr.bf16.mxu1 %v7783_v49 }
0x1032   :  { %7754 = vmatpush3.bf16.msra.mxu0 %v7751_v62  ;;  %7786 = vmatpush3.bf16.msra.mxu1 %v7783_v49 }
0x1033   :  { %7756 = vmatprep.subr.bf16.mxu0 %v7755_v9  ;;  %7788 = vmatprep.subr.bf16.mxu1 %v7787_v16 }
0x1036   :  { %7758 = vmatpush3.bf16.msra.mxu0 %v7755_v9  ;;  %7790 = vmatpush3.bf16.msra.mxu1 %v7787_v16  ;;  %v5228_v9 = vld [vmem:[#allocation15] sm:$0xff]  ;;  %v5229_v16 = vld [vmem:[#allocation15 + $0x8] sm:$0xff] }
0x1037   :  { %7760 = vmatprep.subr.bf16.mxu0 %v7759_v19  ;;  %7792 = vmatprep.subr.bf16.mxu1 %v7791_v46  ;;  %v7820_v0 = vpack.c.bf16 %v5229_v16, %v5228_v9 }
0x103a   :  { %7762 = vmatpush3.bf16.msra.mxu0 %v7759_v19  ;;  %7794 = vmatpush3.bf16.msra.mxu1 %v7791_v46  ;;  %v5232_v19 = vld [vmem:[#allocation15 + $0x20] sm:$0xff]  ;;  %v5233_v46 = vld [vmem:[#allocation15 + $0x28] sm:$0xff] }
0x103d   :  { %6238 = vmatmul.mubr.f32.vlgmr.msra.gmra.mrb[32].mxu0 %v9787_v53  ;;  %6282 = vmatmul.mubr.f32.vlgmr.msra.gmra.mrb[32].mxu1 %v9787_v53  ;;  %v8757_v53 = vmov 0.0|0.0  }
0x103e   :  { %6240 = vmatprep.mubr.f32.mxu0 %v9831_v4  ;;  %6284 = vmatprep.mubr.f32.mxu1 %v9831_v4 }
0x103f   :  { %7795 = vmatprep.subr.bf16.mxu0 %v8757_v53  ;;  %7807 = vmatprep.subr.bf16.mxu1 %v8757_v53 }
0x1041   :  { %6241 = vmatmul.mubr.f32.gmra.mrb[34].mxu0 %v9943_v21  ;;  %6285 = vmatmul.mubr.f32.gmra.mrb[34].mxu1 %v9943_v21 }
0x1042   :  { %6243 = vmatprep.mubr.f32.mxu0 %v9991_v6  ;;  %6287 = vmatprep.mubr.f32.mxu1 %v9991_v6 }
0x1045   :  { %6244 = vmatmul.mubr.f32.gmra.mrb[36].mxu0 %v10037_v18  ;;  %6288 = vmatmul.mubr.f32.gmra.mrb[36].mxu1 %v10037_v18 }
0x1046   :  { %6246 = vmatprep.mubr.f32.mxu0 %v10081_v26  ;;  %6290 = vmatprep.mubr.f32.mxu1 %v10081_v26 }
0x10f0   :  { %v4712_v4 = vpop.f32.mrb[30].mxu0  ;;  %v4783_v52 = vpop.f32.mrb[30].mxu1 }
0x10f1   :  { %v8033_v21 = vadd.f32 %v4712_v4, %v9717_v1  ;;  %v4714_v11 = vpop.f32.mrb[31].mxu0  ;;  %v4785_v3 = vpop.f32.mrb[31].mxu1  ;;  %v8049_v33 = vadd.f32 %v4783_v52, %v9732_v35  ;;  %v7826_v4 = vpack.c.bf16 %v5233_v46, %v5232_v19  ;;  %v5234_v52 = vld [vmem:[#allocation15 + $0x30] sm:$0xff] }
0x10f2   :  { %v8034_v6 = vadd.f32 %v4714_v11, %v9721_v13  ;;  %v8050_v18 = vadd.f32 %v4785_v3, %v9727_v34  ;;  %v5236_v3 = vld [vmem:[#allocation15 + $0x40] sm:$0xff] }
0x10f3   :  { %v6010_v2 = vmul.f32 -1.442695, %v8033_v21  ;;  %v5235_v21 = vld [vmem:[#allocation15 + $0x38] sm:$0xff] }
0x10f4   :  { %v6011_v40 = vmul.f32 -1.442695, %v8034_v6  ;;  %v6012_v56 = vmul.f32 -1.442695, %v8050_v18  ;;  %v7829_v11 = vpack.c.bf16 %v5235_v21, %v5234_v52  ;;  %v5237_v6 = vld [vmem:[#allocation15 + $0x48] sm:$0xff]  ;;  %v5239_v18 = vld [vmem:[#allocation15 + $0x58] sm:$0xff] }
0x10f5   :  { %8382 = vpow2.f32 %v6010_v2  ;;  %v7832_v2 = vpack.c.bf16 %v5237_v6, %v5236_v3  ;;  %v5397_v52 = vld [vmem:[#allocation20] sm:$0xff]  ;;  %v5398_v21 = vld [vmem:[#allocation20 + $0x8] sm:$0xff] }
0x10f6   :  { %8384 = vpow2.f32 %v6011_v40  ;;  %v5238_v40 = vld [vmem:[#allocation15 + $0x50] sm:$0xff]  ;;  %v10223_v3 = vpack.c.bf16 %v5398_v21, %v5397_v52 }
0x10f7   :  { %8386 = vpow2.f32 %v6012_v56  ;;  %v7835_v56 = vpack.c.bf16 %v5239_v18, %v5238_v40  ;;  %v5400_v40 = vld [vmem:[#allocation20 + $0x18] sm:$0xff] }
0x10f8   :  { %8388 = vtanh.f32 %v8049_v33  ;;  %v5240_v33 = vld [vmem:[#allocation15 + $0x60] sm:$0xff] }
0x10ff   :  { %v8383_v60 = vpop.eup %8382 }
0x1100   :  { %v8385_v43 = vpop.eup %8384  ;;  %v4795_v28 = vadd.f32 1.0, %v8383_v60  ;;  %v5241_v60 = vld [vmem:[#allocation15 + $0x68] sm:$0xff] }
0x1101   :  { %v4801_v12 = vadd.f32 1.0, %v8385_v43  ;;  %v8387_v1 = vpop.eup %8386  ;;  %v7838_v43 = vpack.c.bf16 %v5241_v60, %v5240_v33  ;;  %v5401_v33 = vld [vmem:[#allocation20 + $0x20] sm:$0xff]  ;;  %v5402_v60 = vld [vmem:[#allocation20 + $0x28] sm:$0xff] }
0x1102   :  { %8390 = vrcp.f32 %v4795_v28  ;;  %v8389_v15 = vpop.eup %8388  ;;  %v4808_v32 = vadd.f32 1.0, %v8387_v1  ;;  %v5242_v28 = vld [vmem:[#allocation15 + $0x70] sm:$0xff] }
0x1103   :  { %8392 = vrcp.f32 %v4801_v12  ;;  %v5243_v12 = vld [vmem:[#allocation15 + $0x78] sm:$0xff] }
0x1104   :  { %8394 = vrcp.f32 %v4808_v32  ;;  %v7841_v1 = vpack.c.bf16 %v5243_v12, %v5242_v28  ;;  %v5634_v32 = vld [vmem:[#allocation15 + $0x80] sm:$0xff]  ;;  %v5403_v28 = vld [vmem:[#allocation20 + $0x30] sm:$0xff]  ;;  %v5404_v12 = vld [vmem:[#allocation20 + $0x38] sm:$0xff] }
0x110c   :  { %v8391_v13 = vpop.eup %8390 }
0x110d   :  { %v8393_v26 = vpop.eup %8392  ;;  %v4813_v50 = vmul.f32 %v8391_v13, %v8389_v15 }
0x110e   :  { %v4812_v51 = vmul.f32 %v8393_v26, %v10078_v20  ;;  %v8395_v7 = vpop.eup %8394  ;;  %v5486_v26 = vadd.s32 1, %v5080_v22  ;;  %v5244_v22 = vld [vmem:[#allocation17] sm:$0xff] }
0x110f   :  { %vm5315_vm4 = vcmp.gt.f32.partialorder %v5244_v22, 0.5 }
0x1110   :  { %v6239_v34 = vpop.f32.mrb[32].mxu0  ;;  %v6283_v44 = vpop.f32.mrb[32].mxu1  ;;  %v4814_v59 = vadd.f32 %v4813_v50, %v4812_v51  ;;  %vm5487_vm3 = vcmp.eq.s32.totalorder %v10135_v38, %v5486_v26  ;;  %v5635_v51 = vld [vmem:[#allocation15 + $0x88] sm:$0xff] }
0x1111   :  { %v4916_v35 = vpop.f32.mrb[33].mxu0  ;;  %v5037_v24 = vpop.f32.mrb[33].mxu1  ;;  %v10185_v50 = vsel %vm5487_vm3, 1.0, %v9951_v27  ;;  %v10192_v31 = vpack.c.bf16 %v5635_v51, %v5634_v32  ;;  %v5407_v32 = vld [vmem:[#allocation20 + $0x50] sm:$0xff]  ;;  %v5408_v51 = vld [vmem:[#allocation20 + $0x58] sm:$0xff] }
0x1112   :  { %v10106_v29 = vpack.c.bf16 %v6239_v34, %v4916_v35  ;;  %v10108_v14 = vpack.c.bf16 %v6283_v44, %v5037_v24  ;;  %8396 = vtanh.f32 %v4814_v59  ;;  %4825 = vst [vmem:[#allocation27 + $0x8] sm:$0xff] %v4814_v59  ;;  %v5636_v34 = vld [vmem:[#allocation15 + $0x90] sm:$0xff]  ;;  %v5637_v44 = vld [vmem:[#allocation15 + $0x98] sm:$0xff]  ;;  %v5638_v35 = vld [vmem:[#allocation15 + $0xa0] sm:$0xff] }
0x1113   :  { %v10196_v59 = vpack.c.bf16 %v5637_v44, %v5636_v34  ;;  %v5639_v24 = vld [vmem:[#allocation15 + $0xa8] sm:$0xff]  ;;  %v10246_v34 = vpack.c.bf16 %v5408_v51, %v5407_v32  ;;  %v5409_v44 = vld [vmem:[#allocation20 + $0x60] sm:$0xff] }
0x1114   :  { %v6242_v61 = vpop.f32.mrb[34].mxu0  ;;  %v6286_v57 = vpop.f32.mrb[34].mxu1  ;;  %7797 = vmatpush3.bf16.msra.mxu0 %v10106_v29  ;;  %7809 = vmatpush3.bf16.msra.mxu1 %v10108_v14 }
0x1115   :  { %v4926_v23 = vpop.f32.mrb[35].mxu0  ;;  %v5047_v20 = vpop.f32.mrb[35].mxu1  ;;  %7798 = vmatprep.subr.bf16.mxu0 %v8757_v53  ;;  %7810 = vmatprep.subr.bf16.mxu1 %v8757_v53 }
0x1116   :  { %v10114_v45 = vpack.c.bf16 %v6242_v61, %v4926_v23  ;;  %v10116_v54 = vpack.c.bf16 %v6286_v57, %v5047_v20  ;;  %v5641_v61 = vld [vmem:[#allocation15 + $0xb8] sm:$0xff]  ;;  %v5642_v23 = vld [vmem:[#allocation15 + $0xc0] sm:$0xff]  ;;  %v5643_v20 = vld [vmem:[#allocation15 + $0xc8] sm:$0xff] }
0x1118   :  { %v6245_v10 = vpop.f32.mrb[36].mxu0  ;;  %v6289_v58 = vpop.f32.mrb[36].mxu1  ;;  %7800 = vmatpush3.bf16.msra.mxu0 %v10114_v45  ;;  %7812 = vmatpush3.bf16.msra.mxu1 %v10116_v54 }
0x1119   :  { %v4936_v48 = vpop.f32.mrb[37].mxu0  ;;  %v5057_v5 = vpop.f32.mrb[37].mxu1  ;;  %7801 = vmatprep.subr.bf16.mxu0 %v8757_v53  ;;  %7813 = vmatprep.subr.bf16.mxu1 %v8757_v53 }
0x111a   :  { %v10122_v39 = vpack.c.bf16 %v6245_v10, %v4936_v48  ;;  %v10124_v36 = vpack.c.bf16 %v6289_v58, %v5057_v5  ;;  %v5644_v10 = vld [vmem:[#allocation15 + $0xd0] sm:$0xff]  ;;  %v5645_v58 = vld [vmem:[#allocation15 + $0xd8] sm:$0xff]  ;;  %v5646_v5 = vld [vmem:[#allocation15 + $0xe0] sm:$0xff] }
0x111b   :  { %v10212_v48 = vpack.c.bf16 %v5645_v58, %v5644_v10 }
0x111c   :  { %v8397_v41 = vpop.eup %8396  ;;  %7803 = vmatpush3.bf16.msra.mxu0 %v10122_v39  ;;  %7815 = vmatpush3.bf16.msra.mxu1 %v10124_v36 }
0x111d   :  { %v4816_v55 = vmul.f32 %v8397_v41, %v8395_v7  ;;  %7804 = vmatprep.subr.bf16.mxu0 %v8757_v53  ;;  %7816 = vmatprep.subr.bf16.mxu1 %v8757_v53  ;;  %v5648_v41 = vld [vmem:[#allocation15 + $0xf0] sm:$0xff] }
0x111f   :  { %6247 = vmatmul.mubr.f32.gmra.mrb[38].mxu0 %v4816_v55  ;;  %4822 = vst [vmem:[#allocation26 + $0x8] sm:$0xff] %v4816_v55  ;;  %6291 = vmatmul.mubr.f32.gmra.mrb[38].mxu1 %v4816_v55  ;;  %v5649_v55 = vld [vmem:[#allocation15 + $0xf8] sm:$0xff] }
0x1120   :  { %6309 = vmatprep.mubr.msk.f32.mxu0 %vm8758_vm0, %v9951_v27  ;;  %6328 = vmatprep.mubr.msk.f32.mxu1 %vm8758_vm0, %v9951_v27  ;;  %v10220_v38 = vpack.c.bf16 %v5649_v55, %v5648_v41 }
0x11f2   :  { %v6248_v62 = vpop.f32.mrb[38].mxu0  ;;  %v6292_v49 = vpop.f32.mrb[38].mxu1 }
0x11f3   :  { %v4946_v47 = vpop.f32.mrb[39].mxu0  ;;  %v5067_v8 = vpop.f32.mrb[39].mxu1 }
0x11f4   :  { %v10141_v42 = vpack.c.bf16 %v6248_v62, %v4946_v47  ;;  %v10143_v25 = vpack.c.bf16 %v6292_v49, %v5067_v8 }
0x11f6   :  { %7806 = vmatpush3.bf16.msra.mxu0 %v10141_v42  ;;  %7818 = vmatpush3.bf16.msra.mxu1 %v10143_v25 }
0x11f7   :  { %7819 = vmatprep.subr.bf16.mxu0 %v8757_v53  ;;  %7843 = vmatprep.subr.bf16.mxu1 %v8757_v53 }
0x11f9   :  { %6310 = vmatmul.mubr.msk.f32.vlgmr.msra.gmra.mrb[40].mxu0 %vm5084_vm2, %v6013_v30  ;;  %6329 = vmatmul.mubr.msk.f32.vlgmr.msra.gmra.mrb[40].mxu1 %vm5084_vm2, %v6013_v30 }
0x11fa   :  { %6363 = vmatprep.mubr.msk.f32.mxu0 %vm8758_vm0, %v9951_v27  ;;  %7845 = vmatpush3.bf16.msra.mxu1 %v7820_v0 }
0x11fb   :  { %7846 = vmatprep.subr.bf16.mxu1 %v8757_v53  ;;  %6398 = vmatprep.mubr.msk.f32.mxu1 %vm8758_vm0, %v9951_v27 }
0x11fe   :  { %7848 = vmatpush3.bf16.msra.mxu1 %v7823_v63 }
0x11ff   :  { %7821 = vmatpush3.bf16.xpose.msra.mxu0 %v7820_v0  ;;  %7849 = vmatprep.subr.bf16.mxu1 %v8757_v53 }
0x1200   :  { %7822 = vmatprep.subr.bf16.mxu0 %v8757_v53 }
0x1202   :  { %7851 = vmatpush3.bf16.msra.mxu1 %v7826_v4 }
0x1203   :  { %7852 = vmatprep.subr.bf16.mxu1 %v8757_v53 }
0x1206   :  { %7854 = vmatpush3.bf16.msra.mxu1 %v7829_v11 }
0x1207   :  { %7824 = vmatpush3.bf16.xpose.msra.mxu0 %v7823_v63  ;;  %7855 = vmatprep.subr.bf16.mxu1 %v8757_v53 }
0x1208   :  { %7825 = vmatprep.subr.bf16.mxu0 %v8757_v53 }
0x120a   :  { %7857 = vmatpush3.bf16.msra.mxu1 %v7832_v2 }
0x120b   :  { %7858 = vmatprep.subr.bf16.mxu1 %v8757_v53 }
0x120e   :  { %7860 = vmatpush3.bf16.msra.mxu1 %v7835_v56 }
0x120f   :  { %7827 = vmatpush3.bf16.xpose.msra.mxu0 %v7826_v4  ;;  %7861 = vmatprep.subr.bf16.mxu1 %v8757_v53 }
0x1210   :  { %7828 = vmatprep.subr.bf16.mxu0 %v8757_v53 }
0x1212   :  { %7863 = vmatpush3.bf16.msra.mxu1 %v7838_v43 }
0x1213   :  { %7864 = vmatprep.subr.bf16.mxu1 %v8757_v53 }
0x1216   :  { %7866 = vmatpush3.bf16.msra.mxu1 %v7841_v1 }
0x1217   :  { %7830 = vmatpush3.bf16.xpose.msra.mxu0 %v7829_v11  ;;  %7867 = vmatprep.subr.bf16.mxu1 %v8757_v53 }
0x1218   :  { %7831 = vmatprep.subr.bf16.mxu0 %v8757_v53 }
0x121f   :  { %7833 = vmatpush3.bf16.xpose.msra.mxu0 %v7832_v2  ;;  %v5399_v2 = vld [vmem:[#allocation20 + $0x10] sm:$0xff] }
0x1220   :  { %7834 = vmatprep.subr.bf16.mxu0 %v8757_v53  ;;  %v10226_v18 = vpack.c.bf16 %v5400_v40, %v5399_v2 }
0x1227   :  { %7836 = vmatpush3.bf16.xpose.msra.mxu0 %v7835_v56  ;;  %v10228_v56 = vld [vmem:[#allocation23 + $0x10] sm:$0xff] }
0x1228   :  { %7837 = vmatprep.subr.bf16.mxu0 %v8757_v53 }
0x122f   :  { %7839 = vmatpush3.bf16.xpose.msra.mxu0 %v7838_v43  ;;  %v10234_v43 = vpack.c.bf16 %v5402_v60, %v5401_v33 }
0x1230   :  { %7840 = vmatprep.subr.bf16.mxu0 %v8757_v53 }
0x1237   :  { %7842 = vmatpush3.bf16.xpose.msra.mxu0 %v7841_v1  ;;  %v10238_v1 = vpack.c.bf16 %v5404_v12, %v5403_v28 }
0x1238   :  { %7891 = vmatprep.subr.bf16.mxu0 %v8757_v53 }
0x12cc   :  { %v5154_v15 = vpop.f32.mrb[40].mxu0 }
0x12cd   :  { %v6311_v13 = vpop.f32.mrb[41].mxu0  ;;  %6364 = vmatmul.mubr.f32.vlgmr.msra.gmra.mrb[42].mxu0 %v5154_v15  ;;  %v5405_v15 = vld [vmem:[#allocation20 + $0x40] sm:$0xff] }
0x12ce   :  { %7893 = vmatpush3.bf16.msra.mxu0 %v10106_v29  ;;  %6452 = vmatprep.mubr.msk.f32.mxu0 %vm8758_vm0, %v9951_v27  ;;  %v10200_v29 = vpack.c.bf16 %v5639_v24, %v5638_v35  ;;  %v5406_v13 = vld [vmem:[#allocation20 + $0x48] sm:$0xff] }
0x12cf   :  { %7894 = vmatprep.subr.bf16.mxu0 %v8757_v53  ;;  %v10242_v26 = vpack.c.bf16 %v5406_v13, %v5405_v15  ;;  %v5410_v35 = vld [vmem:[#allocation20 + $0x68] sm:$0xff] }
0x12d0   :  { %v10250_v24 = vpack.c.bf16 %v5410_v35, %v5409_v44 }
0x12d2   :  { %7896 = vmatpush3.bf16.msra.mxu0 %v10114_v45  ;;  %v10208_v45 = vpack.c.bf16 %v5643_v20, %v5642_v23 }
0x12d3   :  { %7897 = vmatprep.subr.bf16.mxu0 %v8757_v53 }
0x12d6   :  { %7899 = vmatpush3.bf16.msra.mxu0 %v10122_v39  ;;  %v5647_v39 = vld [vmem:[#allocation15 + $0xe8] sm:$0xff] }
0x12d7   :  { %7900 = vmatprep.subr.bf16.mxu0 %v8757_v53  ;;  %v10216_v7 = vpack.c.bf16 %v5647_v39, %v5646_v5 }
0x12da   :  { %7902 = vmatpush3.bf16.msra.mxu0 %v10141_v42 }
0x12db   :  { %7915 = vmatprep.subr.bf16.mxu0 %v8757_v53 }
0x12dd   :  { %6453 = vmatmul.mubr.msk.f32.vlgmr.msra.gmra.mrb[44].mxu0 %vm5084_vm2, %v10185_v50 }
0x12de   :  { %6506 = vmatprep.mubr.msk.f32.mxu0 %vm8758_vm0, %v9951_v27  ;;  %v5640_v27 = vld [vmem:[#allocation15 + $0xb0] sm:$0xff] }
0x12df   :  { %v10204_v57 = vpack.c.bf16 %v5641_v61, %v5640_v27  ;;  %v5411_v27 = vld [vmem:[#allocation20 + $0x70] sm:$0xff]  ;;  %v5412_v61 = vld [vmem:[#allocation20 + $0x78] sm:$0xff] }
0x12e0   :  { %v7889_v23 = vpack.c.bf16 %v5412_v61, %v5411_v27 }
0x12e3   :  { %7917 = vmatpush3.bf16.xpose.msra.mxu0 %v10192_v31 }
0x12e4   :  { %7918 = vmatprep.subr.bf16.mxu0 %v8757_v53 }
0x12eb   :  { %7920 = vmatpush3.bf16.xpose.msra.mxu0 %v10196_v59 }
0x12ec   :  { %7921 = vmatprep.subr.bf16.mxu0 %v8757_v53 }
0x12f3   :  { %7923 = vmatpush3.bf16.xpose.msra.mxu0 %v10200_v29 }
0x12f4   :  { %7924 = vmatprep.subr.bf16.mxu0 %v8757_v53 }
0x12fb   :  { %7926 = vmatpush3.bf16.xpose.msra.mxu0 %v10204_v57 }
0x12fc   :  { %7927 = vmatprep.subr.bf16.mxu0 %v8757_v53 }
0x1303   :  { %7929 = vmatpush3.bf16.xpose.msra.mxu0 %v10208_v45 }
0x1304   :  { %7930 = vmatprep.subr.bf16.mxu0 %v8757_v53 }
0x130b   :  { %7932 = vmatpush3.bf16.xpose.msra.mxu0 %v10212_v48 }
0x130c   :  { %7933 = vmatprep.subr.bf16.mxu0 %v8757_v53 }
0x1313   :  { %7935 = vmatpush3.bf16.xpose.msra.mxu0 %v10216_v7 }
0x1314   :  { %7936 = vmatprep.subr.bf16.mxu0 %v8757_v53 }
0x131b   :  { %7938 = vmatpush3.bf16.xpose.msra.mxu0 %v10220_v38 }
0x13a0   :  { %v5311_v62 = vpop.f32.mrb[42].mxu0 }
0x13a1   :  { %v6365_v49 = vpop.f32.mrb[43].mxu0  ;;  %v5316_v47 = vsel %vm5315_vm4, %v5311_v62, -1e+30 }
0x13a2   :  { %5317 = vmax.xlane.f32.xlu0 %v5316_v47 }
0x13b0   :  { %v5559_v8 = vpop.f32.mrb[44].mxu0 }
0x13b1   :  { %6507 = vmatmul.mubr.f32.vlgmr.msra.gmra.mrb[46].mxu0 %v5559_v8  ;;  %v6454_v42 = vpop.f32.mrb[45].mxu0 }
0x142f   :  { %v5318_v9 = vpop.xlane.xlu0 %5317 }
0x1430   :  { %v5319_v16 = vsub.f32 %v5316_v47, %v5318_v9 }
0x1432   :  { %v5320_v30 = vmul.f32 1.442695, %v5319_v16 }
0x1434   :  { %8398 = vpow2.f32 %v5320_v30 }
0x143e   :  { %v8399_v0 = vpop.eup %8398 }
0x143f   :  { %v5322_v17 = vmul.f32 %v8399_v0, %v5244_v22 }
0x1441   :  { %5323 = vadd.xlane.f32.xlu0 %v5322_v17 }
0x1484   :  { %v5718_v63 = vpop.f32.mrb[46].mxu0 }
0x1485   :  { %v5723_v19 = vsel %vm5722_vm5, %v5718_v63, -1e+30  ;;  %v6508_v46 = vpop.f32.mrb[47].mxu0 }
0x1486   :  { %5724 = vmax.xlane.f32.xlu1 %v5723_v19 }
0x14ce   :  { %v5324_v4 = vpop.xlane.xlu0 %5323 }
0x14cf   :  { %8400 = vrcp.f32 %v5324_v4 }
0x14d9   :  { %v8401_v11 = vpop.eup %8400 }
0x14da   :  { %v5326_v6 = vmul.f32 %v8401_v11, %v5322_v17 }
0x14dc   :  { %6399 = vmatmul.mubr.f32.vlgmr.msra.gmra.mrb[42].mxu1 %v5326_v6  ;;  %5485 = vst [vmem:[#allocation24] sm:$0xff] %v5326_v6 }
0x14dd   :  { %7869 = vmatpush3.bf16.msra.mxu1 %v10223_v3  ;;  %6433 = vmatprep.mubr.msk.f32.mxu1 %vm8758_vm0, %v10228_v56 }
0x14de   :  { %7870 = vmatprep.subr.bf16.mxu1 %v8757_v53 }
0x14e1   :  { %7872 = vmatpush3.bf16.msra.mxu1 %v10226_v18 }
0x14e2   :  { %7873 = vmatprep.subr.bf16.mxu1 %v8757_v53 }
0x14e5   :  { %7875 = vmatpush3.bf16.msra.mxu1 %v10234_v43 }
0x14e6   :  { %7876 = vmatprep.subr.bf16.mxu1 %v8757_v53 }
0x14e9   :  { %7878 = vmatpush3.bf16.msra.mxu1 %v10238_v1 }
0x14ea   :  { %7879 = vmatprep.subr.bf16.mxu1 %v8757_v53 }
0x14ed   :  { %7881 = vmatpush3.bf16.msra.mxu1 %v10242_v26 }
0x14ee   :  { %7882 = vmatprep.subr.bf16.mxu1 %v8757_v53 }
0x14f1   :  { %7884 = vmatpush3.bf16.msra.mxu1 %v10246_v34 }
0x14f2   :  { %7885 = vmatprep.subr.bf16.mxu1 %v8757_v53 }
0x14f5   :  { %7887 = vmatpush3.bf16.msra.mxu1 %v10250_v24 }
0x14f6   :  { %7888 = vmatprep.subr.bf16.mxu1 %v8757_v53 }
0x14f9   :  { %7890 = vmatpush3.bf16.msra.mxu1 %v7889_v23 }
0x14fa   :  { %7903 = vmatprep.subr.bf16.mxu1 %v8757_v53 }
0x1513   :  { %v5725_v20 = vpop.xlane.xlu1 %5724 }
0x1514   :  { %v5726_v10 = vsub.f32 %v5723_v19, %v5725_v20 }
0x1516   :  { %v5727_v58 = vmul.f32 1.442695, %v5726_v10 }
0x1518   :  { %8402 = vpow2.f32 %v5727_v58 }
0x1522   :  { %v8403_v5 = vpop.eup %8402 }
0x1523   :  { %v5729_v39 = vmul.f32 %v8403_v5, %v5651_v37 }
0x1525   :  { %5730 = vadd.xlane.f32.xlu1 %v5729_v39 }
0x15af   :  { %v5393_v41 = vpop.f32.mrb[42].mxu1 }
0x15b0   :  { %v6400_v55 = vpop.f32.mrb[43].mxu1  ;;  %6434 = vmatmul.mubr.f32.vlgmr.msra.gmra.mrb[40].mxu1 %v5393_v41 }
0x15b1   :  { %7905 = vmatpush3.bf16.msra.mxu1 %v10108_v14  ;;  %6471 = vmatprep.mubr.msk.f32.mxu1 %vm8758_vm0, %v10228_v56 }
0x15b2   :  { %v5731_v22 = vpop.xlane.xlu1 %5730  ;;  %7906 = vmatprep.subr.bf16.mxu1 %v8757_v53 }
0x15b3   :  { %8404 = vrcp.f32 %v5731_v22 }
0x15b5   :  { %7908 = vmatpush3.bf16.msra.mxu1 %v10116_v54 }
0x15b6   :  { %7909 = vmatprep.subr.bf16.mxu1 %v8757_v53 }
0x15b9   :  { %7911 = vmatpush3.bf16.msra.mxu1 %v10124_v36 }
0x15ba   :  { %7912 = vmatprep.subr.bf16.mxu1 %v8757_v53 }
0x15bd   :  { %v8405_v62 = vpop.eup %8404  ;;  %7914 = vmatpush3.bf16.msra.mxu1 %v10143_v25 }
0x15be   :  { %7939 = vmatprep.subr.bf16.mxu1 %v8757_v53  ;;  %v5733_v14 = vmul.f32 %v8405_v62, %v5729_v39 }
0x15c0   :  { %6472 = vmatmul.mubr.msk.f32.vlgmr.msra.gmra.mrb[44].mxu1 %vm5084_vm2, %v10185_v50  ;;  %5894 = vst [vmem:[#allocation24 + $0x8] sm:$0xff] %v5733_v14 }
0x15c1   :  { %7941 = vmatpush3.bf16.msra.mxu1 %v10192_v31  ;;  %6541 = vmatprep.mubr.msk.f32.mxu1 %vm8758_vm0, %v10228_v56 }
0x15c2   :  { %7942 = vmatprep.subr.bf16.mxu1 %v8757_v53 }
0x15c5   :  { %7944 = vmatpush3.bf16.msra.mxu1 %v10196_v59 }
0x15c6   :  { %7945 = vmatprep.subr.bf16.mxu1 %v8757_v53 }
0x15c9   :  { %7947 = vmatpush3.bf16.msra.mxu1 %v10200_v29 }
0x15ca   :  { %7948 = vmatprep.subr.bf16.mxu1 %v8757_v53 }
0x15cd   :  { %7950 = vmatpush3.bf16.msra.mxu1 %v10204_v57 }
0x15ce   :  { %7951 = vmatprep.subr.bf16.mxu1 %v8757_v53 }
0x15d1   :  { %7953 = vmatpush3.bf16.msra.mxu1 %v10208_v45 }
0x15d2   :  { %7954 = vmatprep.subr.bf16.mxu1 %v8757_v53 }
0x15d5   :  { %7956 = vmatpush3.bf16.msra.mxu1 %v10212_v48 }
0x15d6   :  { %7957 = vmatprep.subr.bf16.mxu1 %v8757_v53 }
0x15d9   :  { %7959 = vmatpush3.bf16.msra.mxu1 %v10216_v7 }
0x15da   :  { %7960 = vmatprep.subr.bf16.mxu1 %v8757_v53 }
0x15dd   :  { %7962 = vmatpush3.bf16.msra.mxu1 %v10220_v38 }
0x15de   :  { %7963 = vmatprep.subr.bf16.mxu1 %v8757_v53 }
0x15e0   :  { %6542 = vmatmul.mubr.f32.vlgmr.msra.gmra.mrb[46].mxu1 %v5733_v14 }
0x15e1   :  { %7965 = vmatpush3.bf16.msra.mxu1 %v10223_v3  ;;  %6576 = vmatprep.mubr.msk.f32.mxu1 %vm8758_vm0, %v10228_v56 }
0x15e2   :  { %7966 = vmatprep.subr.bf16.mxu1 %v8757_v53 }
0x15e5   :  { %7968 = vmatpush3.bf16.msra.mxu1 %v10226_v18 }
0x15e6   :  { %7969 = vmatprep.subr.bf16.mxu1 %v8757_v53 }
0x15e9   :  { %7971 = vmatpush3.bf16.msra.mxu1 %v10234_v43 }
0x15ea   :  { %7972 = vmatprep.subr.bf16.mxu1 %v8757_v53 }
0x15ed   :  { %7974 = vmatpush3.bf16.msra.mxu1 %v10238_v1 }
0x15ee   :  { %7975 = vmatprep.subr.bf16.mxu1 %v8757_v53 }
0x15f1   :  { %7977 = vmatpush3.bf16.msra.mxu1 %v10242_v26 }
0x15f2   :  { %7978 = vmatprep.subr.bf16.mxu1 %v8757_v53 }
0x15f5   :  { %7980 = vmatpush3.bf16.msra.mxu1 %v10246_v34 }
0x15f6   :  { %7981 = vmatprep.subr.bf16.mxu1 %v8757_v53 }
0x15f9   :  { %7983 = vmatpush3.bf16.msra.mxu1 %v10250_v24 }
0x15fa   :  { %7984 = vmatprep.subr.bf16.mxu1 %v8757_v53 }
0x15fd   :  { %7986 = vmatpush3.bf16.msra.mxu1 %v7889_v23 }
0x1683   :  { %v5479_v54 = vpop.f32.mrb[40].mxu1 }
0x1684   :  { %8406 = vtanh.f32 %v5479_v54  ;;  %v6435_v36 = vpop.f32.mrb[41].mxu1 }
0x168e   :  { %v8407_v25 = vpop.eup %8406 }
0x168f   :  { %5484 = vst [vmem:[#allocation23] sm:$0xff] %v8407_v25 }
0x16b3   :  { %v5800_v50 = vpop.f32.mrb[46].mxu1 }
0x16b4   :  { %v6543_v31 = vpop.f32.mrb[47].mxu1  ;;  %6577 = vmatmul.mubr.f32.vlgmr.msra.gmra.mrb[44].mxu1 %v5800_v50 }
0x16b5   :  { %8645 = shalt.err (!%p8642_p0)
}
0x16b6   :  { %s8646_s24 = scalar_lea.hbm %s10374_s12, 1024 }
0x16b7   :  { %p8647_p1 = scmp.ne.s32.totalorder %s10374_s12, %s8646_s24  ;;  %p8650_p2 = scmp.lt.u32.totalorder %s8646_s24, %s10374_s12 }
0x16b9   :  { %p8652_p3 = pnand %p8650_p2, %p8647_p1 }
0x16bb   :  { %8655 = shalt.err (!%p8652_p3)
}
0x16bc   :  { %5918 = dma.vmem_to_hbm [thread:$0]  %s5913_s27, 1024, %s10374_s12, [#allocation25], %s8748_s28, %s8748_s28, %s8749_s1  }
0x16bd   :  { %s8760_s0 = smov [#allocation26]   ;;  %s8761_s26 = smov [#allocation27]  }
0x16be   :  { %s5924_s21 = sshll.u32 %s8760_s0, 4  ;;  %s5936_s29 = sshll.u32 %s8761_s26, 4  ;;  %s5925_s21 = int_to_ptr.vmem [resolvable:$true] %s5924_s21  ;;  %s5937_s29 = int_to_ptr.vmem [resolvable:$true] %s5936_s29 }
0x16bf   :  { %s8656_s17 = scalar_lea.vmem %s5925_s21, 256  ;;  %p8661_p5 = scmp.lt.s32.totalorder %s5925_s21, %s5925_s21 }
0x16c0   :  { %p8657_p4 = scmp.ne.s32.totalorder %s5925_s21, %s8656_s17  ;;  %p8662_p6 = scmp.lt.s32.totalorder %s8656_s17, %s8656_s17 }
0x16c2   :  { %p8663_p7 = por %p8662_p6, %p8661_p5 }
0x16c4   :  { %p8664_p8 = pnand %p8663_p7, %p8657_p4 }
0x16c6   :  { %8667 = shalt.err (!%p8664_p8)
}
0x16c7   :  { %s8668_s9 = scalar_lea.hbm %s10375_s13, 256 }
0x16c8   :  { %p8669_p9 = scmp.ne.s32.totalorder %s10375_s13, %s8668_s9  ;;  %p8672_p10 = scmp.lt.u32.totalorder %s8668_s9, %s10375_s13 }
0x16ca   :  { %p8674_p11 = pnand %p8672_p10, %p8669_p9 }
0x16cc   :  { %8677 = shalt.err (!%p8674_p11)
}
0x16cd   :  { %5930 = dma.vmem_to_hbm [thread:$0]  %s5925_s21, 256, %s10375_s13, [#allocation25], %s8748_s28, %s8748_s28, %s8749_s1  }
0x16ce   :  { %s8678_s5 = scalar_lea.vmem %s5937_s29, 256  ;;  %p8683_p13 = scmp.lt.s32.totalorder %s5937_s29, %s5937_s29 }
0x16cf   :  { %p8679_p12 = scmp.ne.s32.totalorder %s5937_s29, %s8678_s5  ;;  %p8684_p0 = scmp.lt.s32.totalorder %s8678_s5, %s8678_s5 }
0x16d1   :  { %p8685_p1 = por %p8684_p0, %p8683_p13 }
0x16d3   :  { %p8686_p2 = pnand %p8685_p1, %p8679_p12 }
0x16d5   :  { %8689 = shalt.err (!%p8686_p2)
}
0x16d6   :  { %s8690_s3 = scalar_lea.hbm %s10376_s14, 256 }
0x16d7   :  { %p8691_p3 = scmp.ne.s32.totalorder %s10376_s14, %s8690_s3  ;;  %p8694_p4 = scmp.lt.u32.totalorder %s8690_s3, %s10376_s14 }
0x16d9   :  { %p8696_p5 = pnand %p8694_p4, %p8691_p3 }
0x16db   :  { %8699 = shalt.err (!%p8696_p5)
}
0x16dc   :  { %5942 = dma.vmem_to_hbm [thread:$0]  %s5937_s29, 256, %s10376_s14, [#allocation28], %s8748_s28, %s8748_s28, %s8749_s1  }
0x16dd   :  { %s8762_s8 = smov [#allocation23]  }
0x16de   :  { %s5900_s23 = sshll.u32 %s8762_s8, 4  ;;  %s5901_s23 = int_to_ptr.vmem [resolvable:$true] %s5900_s23 }
0x16df   :  { %s8700_s25 = scalar_lea.vmem %s5901_s23, 1024  ;;  %p8705_p7 = scmp.lt.s32.totalorder %s5901_s23, %s5901_s23 }
0x16e0   :  { %p8701_p6 = scmp.ne.s32.totalorder %s5901_s23, %s8700_s25  ;;  %p8706_p8 = scmp.lt.s32.totalorder %s8700_s25, %s8700_s25 }
0x16e2   :  { %p8707_p9 = por %p8706_p8, %p8705_p7 }
0x16e4   :  { %p8708_p10 = pnand %p8707_p9, %p8701_p6 }
0x1787   :  { %v5886_v53 = vpop.f32.mrb[44].mxu1 }
0x1788   :  { %8408 = vtanh.f32 %v5886_v53  ;;  %v6578_v59 = vpop.f32.mrb[45].mxu1 }
0x1792   :  { %v8409_v29 = vpop.eup %8408 }
0x1793   :  { %5892 = vst [vmem:[#allocation23 + $0x8] sm:$0xff] %v8409_v29 }
0x1794   :  { %8711 = shalt.err (!%p8708_p10)
}
0x1795   :  { %s8712_s26 = scalar_lea.hbm %s10373_s11, 1024 }
0x1796   :  { %p8713_p11 = scmp.ne.s32.totalorder %s10373_s11, %s8712_s26  ;;  %p8716_p12 = scmp.lt.u32.totalorder %s8712_s26, %s10373_s11 }
0x1798   :  { %p8718_p13 = pnand %p8716_p12, %p8713_p11 }
0x179a   :  { %8721 = shalt.err (!%p8718_p13)
}
0x179b   :  { %5906 = dma.vmem_to_hbm [thread:$0]  %s5901_s23, 1024, %s10373_s11, [#allocation8], %s8748_s28, %s8748_s28, %s8749_s1  }
0x179c   :  { %8734 = dma.done.wait [#allocation8], 1024  }
0x179d   :  { %8735 = vsyncadd [#allocation8], 4294966272 }
0x179e   :  { %8736 = dma.done.wait [#allocation25], 1280  }
0x179f   :  { %8737 = vsyncadd [#allocation25], 4294966016 }
0x17a0   :  { %8738 = dma.done.wait [#allocation28], 256  }
0x17a1   :  { %8739 = vsyncadd [#allocation28], 4294967040 }
0x17a2   :  { %5955 = vsyncpa [#allocation7], 1 }
0x17a3   :  { %5956 = vsyncpa [#allocation10], 1 }
0x17a4   :  { %5957 = vsyncpa [#allocation13], 1 }
0x17a5   :  { %5958 = vsyncpa [#allocation16], 1 }
0x17a6   :  { %5959 = vsyncpa [#allocation19], 1 }
0x17a7   :  { %5960 = vsyncpa [#allocation22], 1 }
0x17a8   :  { %5961 = vsyncpa [#allocation8], 1 }
0x17a9   :  { %5962 = vsyncpa [#allocation25], 1 }
0x17aa   :  { %5963 = vsyncpa [#allocation28], 1 }

</bundles_post_ra>
